<compile_context>
chip_gen: v5e
topology: v5e:2x2
jax: 0.10.0
libtpu: 0.0.40
codegen_flags: <defaults>
</compile_context>

<pallas_src>
import numpy as np
import jax
import jax.numpy as jnp
from jax import lax
from jax.experimental import pallas as pl
from jax.experimental.pallas import tpu as pltpu

_BN_EPS = 1e-5
_LANE = 128   # lane width: channel dims padded to a multiple of this
_SUB = 16     # bf16 sublane pack: row counts padded to a multiple of this


def _round_up(x, m):
    return (x + m - 1) // m * m


# ------------------------------ Pallas kernel --------------------------------

def _make_conv3x3_kernel(*, tap_offsets, rows, has_mask, shortcut):
    """Fused 3x3 conv (9 shifted MXU dots on a flat slab) + bias [+ shortcut] + ReLU.

    tap_offsets : 9 static row offsets into the input slab (one per (ky, kx) tap).
    rows        : number of output rows computed (M dim of the GEMMs).
    has_mask    : multiply the result by a (rows, 1) {0,1} mask before the store
                  (used when the output doubles as the next conv's zero-padded slab).
    shortcut    : None | ("add", row_off) | ("dot", row_off); the shortcut window is
                  read from an extra slab ref at the given static row offset.
    """

    def kernel(*refs):
        it = iter(refs)
        slab_ref = next(it)
        w_ref = next(it)
        b_ref = next(it)
        mask_ref = next(it) if has_mask else None
        sc_ref = next(it) if shortcut is not None else None
        wsc_ref = next(it) if (shortcut is not None and shortcut[0] == "dot") else None
        o_ref = next(it)
        acc_ref = next(it)

        # 9 accumulating dots: tap t reads a unit-stride row window of the slab.
        for t, off in enumerate(tap_offsets):
            tap = slab_ref[pl.ds(off, rows), :]                       # (rows, K) bf16
            d = jnp.dot(tap, w_ref[t], preferred_element_type=jnp.float32)
            if t == 0:
                acc_ref[...] = d
            else:
                acc_ref[...] += d

        out = acc_ref[...] + b_ref[...]                               # folded BN bias (f32)

        if shortcut is not None:
            kind, roff = shortcut
            win = sc_ref[pl.ds(roff, rows), :]                        # bf16 window
            if kind == "add":                                         # identity residual
                out = out + win.astype(jnp.float32)
            else:                                                     # 1x1-conv shortcut
                out = out + jnp.dot(win, wsc_ref[...],
                                    preferred_element_type=jnp.float32)

        out = jnp.maximum(out, 0.0)
        if has_mask:
            out = out * mask_ref[...]                                 # zero pad borders
        o_ref[...] = out.astype(o_ref.dtype)

    return kernel


# ------------------------------ pallas_call wrapper ---------------------------

def _conv3x3_pallas(slab, w_taps, bias, *, tap_offsets, rows, out_dtype,
                    emit_mask=None, shortcut=None, sc_slab=None, wsc=None):
    """relu( conv3x3(slab) + bias [+ shortcut] ), one image per grid step."""
    N, r_in, K = slab.shape
    Cp = w_taps.shape[-1]
    itemsize_out = np.dtype(out_dtype).itemsize

    assert max(tap_offsets) + rows <= r_in
    if shortcut is not None:
        assert shortcut[1] + rows <= sc_slab.shape[1]

    in_specs = [
        pl.BlockSpec((None, r_in, K), lambda n: (n, 0, 0)),           # activation slab
        pl.BlockSpec(w_taps.shape, lambda n: (0, 0, 0)),              # resident tap weights
        pl.BlockSpec(bias.shape, lambda n: (0, 0)),                   # folded BN bias
    ]
    args = [slab, w_taps, bias]
    flops = 2 * N * len(tap_offsets) * rows * K * Cp
    bytes_accessed = slab.size * 2 + w_taps.size * 2 + bias.size * 4
    est = (2 * r_in * K * 2                      # slab (double-buffered, bf16)
           + 2 * w_taps.size * 2                 # tap weights
           + 2 * bias.size * 4
           + 2 * rows * Cp * itemsize_out        # output block
           + rows * Cp * 4)                      # f32 accumulator scratch

    if emit_mask is not None:
        in_specs.append(pl.BlockSpec(emit_mask.shape, lambda n: (0, 0)))
        args.append(emit_mask)
        bytes_accessed += emit_mask.size * 4
        est += 2 * emit_mask.size * 4
    if shortcut is not None:
        _, r_sc, K_sc = sc_slab.shape
        in_specs.append(pl.BlockSpec((None, r_sc, K_sc), lambda n: (n, 0, 0)))
        args.append(sc_slab)
        bytes_accessed += sc_slab.size * 2
        est += 2 * r_sc * K_sc * 2
        if shortcut[0] == "dot":
            in_specs.append(pl.BlockSpec(wsc.shape, lambda n: (0, 0)))
            args.append(wsc)
            bytes_accessed += wsc.size * 2
            flops += 2 * N * rows * K_sc * Cp
            est += 2 * wsc.size * 2
    bytes_accessed += N * rows * Cp * itemsize_out

    # VMEM budget from the actual footprint (+ headroom for compiler temporaries),
    # capped below the 64 MiB physical VMEM of a v7x TensorCore.
    assert est <= 44 * 1024 * 1024, f"per-step VMEM footprint too large: {est} bytes"
    vmem_limit = int(min(2 * est + (16 << 20), 48 << 20))

    kernel = _make_conv3x3_kernel(tap_offsets=tap_offsets, rows=rows,
                                  has_mask=emit_mask is not None, shortcut=shortcut)
    return pl.pallas_call(
        kernel,
        out_shape=jax.ShapeDtypeStruct((N, rows, Cp), out_dtype),
        grid=(N,),
        in_specs=in_specs,
        out_specs=pl.BlockSpec((None, rows, Cp), lambda n: (n, 0, 0)),
        scratch_shapes=[pltpu.VMEM((rows, Cp), jnp.float32)],
        compiler_params=pltpu.CompilerParams(
            dimension_semantics=("parallel",),
            vmem_limit_bytes=vmem_limit),
        cost_estimate=pl.CostEstimate(flops=int(flops), transcendentals=0,
                                      bytes_accessed=int(bytes_accessed)),
    )(*args)


# ------------------------------ JAX glue -------------------------------------

def _fold_bn(gamma, beta, mean, var):
    s = gamma / jnp.sqrt(var + _BN_EPS)
    b = beta - mean * s
    return s.astype(jnp.float32), b.astype(jnp.float32)


def _w3x3_taps(w_oihw, scale, cin_pad, cout_pad):
    """(Cout,Cin,3,3) -> (9, cin_pad, cout_pad) bf16 tap matrices, BN scale folded in."""
    Cout, Cin, _, _ = w_oihw.shape
    w = jnp.transpose(w_oihw, (2, 3, 1, 0)).astype(jnp.float32)       # (3,3,Cin,Cout)
    w = w * scale.reshape(1, 1, 1, Cout)
    w = jnp.pad(w, ((0, 0), (0, 0), (0, cin_pad - Cin), (0, cout_pad - Cout)))
    return w.reshape(9, cin_pad, cout_pad).astype(jnp.bfloat16)


def _w1x1_scaled(w_oihw, scale, cin_pad, cout_pad):
    Cout, Cin = w_oihw.shape[:2]
    w = w_oihw[:, :, 0, 0].T.astype(jnp.float32) * scale.reshape(1, Cout)
    w = jnp.pad(w, ((0, cin_pad - Cin), (0, cout_pad - Cout)))
    return w.astype(jnp.bfloat16)


def _pad_bias(b, cout_pad):
    return jnp.pad(b, (0, cout_pad - b.shape[0])).reshape(1, cout_pad).astype(jnp.float32)


def _emit_mask(rows, pitch, wo, ho):
    """{0,1} mask over flat rows: 1 only at interior pixels of the (ho+2, pitch) pad slab."""
    idx = np.arange(rows)
    col = idx % pitch
    valid = (col >= 1) & (col <= wo) & (idx >= pitch) & (idx < (ho + 1) * pitch)
    return jnp.asarray(valid.astype(np.float32).reshape(rows, 1))


def resblock_pallas(x_nchw, params, stride=1):
    x = jnp.transpose(x_nchw, (0, 2, 3, 1))                 # NHWC
    N, H, W, Cin = x.shape
    Cout = params["w1"].shape[0]
    Cp = _round_up(Cout, _LANE)                              # lane-dense output channels
    Kin = _round_up(Cin, _LANE)                              # lane-dense input channels
    has_sc_conv = (stride != 1) or (Cin != Cout)
    if not has_sc_conv:
        assert Kin == Cp

    Ho = (H - 1) // stride + 1
    Wo = (W - 1) // stride + 1
    pitch = Wo + 2                                           # row pitch of all flat slabs
    m2 = _round_up(Ho * pitch, _SUB)                         # conv2 output rows
    r2 = _round_up(2 * pitch + 2 + m2, _SUB)                 # rows of the y1 (conv2-input) slab
    lead = pitch + 1                                         # pre-shift so conv1 emits borders

    # ---- conv1 input slab (flat, bf16, channel-padded, pre-shifted by `lead` zeros) ----
    xb = jnp.pad(x.astype(jnp.bfloat16), ((0, 0), (0, 0), (0, 0), (0, Kin - Cin)))
    xp = jnp.pad(xb, ((0, 0), (1, 1), (1, 1), (0, 0)))       # zero border, (N, H+2, W+2, Kin)

    if stride == 1:
        flat = xp.reshape(N, (H + 2) * (W + 2), Kin)
        taps1 = tuple(ky * pitch + kx for ky in range(3) for kx in range(3))
        sc_off = 2 * pitch + 2                               # x[i, j] window for the shortcut
    else:  # stride == 2: 4-phase decomposition -> every tap is a unit-stride row window
        Hph, Wph = Ho + 2, Wo + 2
        phases = []
        for ph in range(2):
            for pw in range(2):
                p = xp[:, ph::2, pw::2, :]
                p = jnp.pad(p, ((0, 0), (0, Hph - p.shape[1]),
                                (0, Wph - p.shape[2]), (0, 0)))
                phases.append(p.reshape(N, Hph * Wph, Kin))
        flat = jnp.concatenate(phases, axis=1)
        taps1 = tuple((2 * (ky % 2) + (kx % 2)) * Hph * Wph + (ky // 2) * Wph + (kx // 2)
                      for ky in range(3) for kx in range(3))
        sc_off = 3 * Hph * Wph + Wph + 1                     # phase (1,1) -> x[2i, 2j]

    r1 = _round_up(max(lead + flat.shape[1], max(taps1) + r2, sc_off + m2), _SUB)
    slab1 = jnp.pad(flat, ((0, 0), (lead, r1 - lead - flat.shape[1]), (0, 0)))

    # -------------------- fold BN, build tap weights / biases --------------------
    s1, b1 = _fold_bn(*params["bn1"])
    s2, b2 = _fold_bn(*params["bn2"])
    w1t = _w3x3_taps(params["w1"], s1, Kin, Cp)              # (9, Kin, Cp) bf16
    w2t = _w3x3_taps(params["w2"], s2, Cp, Cp)               # (9, Cp,  Cp) bf16
    b1p = _pad_bias(b1, Cp)
    b2p = _pad_bias(b2, Cp)

    # ------------- conv1 + BN1 + ReLU -> y1 emitted as conv2's padded slab -------------
    y1slab = _conv3x3_pallas(
        slab1, w1t, b1p, tap_offsets=taps1, rows=r2, out_dtype=jnp.bfloat16,
        emit_mask=_emit_mask(r2, pitch, Wo, Ho))

    # ------------- conv2 + BN2 (+ shortcut) + residual add + ReLU ----------------------
    taps2 = tuple(ky * pitch + kx for ky in range(3) for kx in range(3))
    if has_sc_conv:
        ssc, bsc = _fold_bn(*params["bnsc"])
        wscg = _w1x1_scaled(params["wsc"], ssc, Kin, Cp)     # (Kin, Cp) bf16
        out_flat = _conv3x3_pallas(
            y1slab, w2t, b2p + _pad_bias(bsc, Cp),
            tap_offsets=taps2, rows=m2, out_dtype=jnp.float32,
            shortcut=("dot", sc_off), sc_slab=slab1, wsc=wscg)
    else:
        # identity shortcut: residual is read straight out of the conv1 input slab (bf16)
        out_flat = _conv3x3_pallas(
            y1slab, w2t, b2p,
            tap_offsets=taps2, rows=m2, out_dtype=jnp.float32,
            shortcut=("add", sc_off), sc_slab=slab1)

    out = out_flat[:, :Ho * pitch, :Cout].reshape(N, Ho, pitch, Cout)[:, :, :Wo, :]
    return jnp.transpose(out, (0, 3, 1, 2))                  # back to NCHW


# ------------------------------ pure-JAX reference ---------------------------

def resblock_ref(x, params, stride=1):
    def conv(x, w, s, pad):
        return lax.conv_general_dilated(x, w, (s, s), ((pad, pad), (pad, pad)),
                                        dimension_numbers=("NCHW", "OIHW", "NCHW"))

    def bn(x, g, b, m, v):
        sc = g / jnp.sqrt(v + _BN_EPS)
        return x * sc[None, :, None, None] + (b - m * sc)[None, :, None, None]

    Cin = x.shape[1]
    Cout = params["w1"].shape[0]
    out = jax.nn.relu(bn(conv(x, params["w1"], stride, 1), *params["bn1"]))
    out = bn(conv(out, params["w2"], 1, 1), *params["bn2"])
    if stride != 1 or Cin != Cout:
        sc = bn(conv(x, params["wsc"], stride, 0), *params["bnsc"])
    else:
        sc = x
    return jax.nn.relu(out + sc)


# ------------------------------ params / main --------------------------------

def init_params(key, Cin, Cout):
    ks = jax.random.split(key, 6)

    def bn_params(k):
        k1, k2, k3, k4 = jax.random.split(k, 4)
        gamma = jax.random.uniform(k1, (Cout,), jnp.float32, 0.5, 1.5)
        beta = 0.1 * jax.random.normal(k2, (Cout,), jnp.float32)
        mean = 0.1 * jax.random.normal(k3, (Cout,), jnp.float32)
        var = jax.random.uniform(k4, (Cout,), jnp.float32, 0.5, 1.5)
        return (gamma, beta, mean, var)

    return {
        "w1": 0.2 * jax.random.normal(ks[0], (Cout, Cin, 3, 3), jnp.float32),
        "bn1": bn_params(ks[1]),
        "w2": 0.2 * jax.random.normal(ks[2], (Cout, Cout, 3, 3), jnp.float32),
        "bn2": bn_params(ks[3]),
        "wsc": 0.2 * jax.random.normal(ks[4], (Cout, Cin, 1, 1), jnp.float32),
        "bnsc": bn_params(ks[5]),
    }


if __name__ == "__main__":
    key = jax.random.PRNGKey(0)

    cases = [
        # (N, Cin, H, W, Cout, stride)
        (2, 4, 16, 16, 8, 1),   # conv shortcut (Cin != Cout)
        (2, 8, 16, 16, 8, 1),   # identity shortcut
        (2, 4, 16, 16, 8, 2),   # conv shortcut with stride 2
    ]

    for idx, (N, Cin, H, W, Cout, stride) in enumerate(cases):
        kx, kp, key = jax.random.split(key, 3)
        x = jax.random.normal(kx, (N, Cin, H, W), jnp.float32)
        params = init_params(kp, Cin, Cout)

        out = jax.block_until_ready(resblock_pallas(x, params, stride))
        ref = jax.block_until_ready(resblock_ref(x, params, stride))

        Ho = (H - 1) // stride + 1
        assert out.shape == ref.shape == (N, Cout, Ho, Ho)

        out_np, ref_np = np.asarray(out), np.asarray(ref)
        # bf16 GEMM operands (f32 accumulation): loose elementwise tolerance plus a tight
        # relative-Frobenius check (any real logic bug produces errors orders larger).
        np.testing.assert_allclose(out_np, ref_np, rtol=2e-2, atol=2e-1)
        rel = np.linalg.norm(out_np - ref_np) / (np.linalg.norm(ref_np) + 1e-8)
        assert rel < 2e-2, f"case {idx}: relative error too large: {rel}"

    print("KERNEL_OK")
</pallas_src>

<mosaic_0001>
module attributes {stable_mosaic.version = 11 : i64} {
  func.func @kernel(%arg0: i32, %arg1: memref<1x384x128xbf16, #tpu.memory_space<vmem>>, %arg2: memref<9x128x128xbf16, #tpu.memory_space<vmem>>, %arg3: memref<1x128xf32, #tpu.memory_space<vmem>>, %arg4: memref<336x1xf32, #tpu.memory_space<vmem>>, %arg5: memref<1x336x128xbf16, #tpu.memory_space<vmem>>, %arg6: memref<336x128xf32, #tpu.memory_space<vmem>>) attributes {dimension_semantics = [#tpu.dimension_semantics<parallel>], iteration_bounds = array<i64: 2>, scalar_prefetch = 0 : i64, scratch_operands = 1 : i64, tpu.core_type = #tpu.core_type<tc>, window_params = [{transform_indices = @transform_0, window_bounds = array<i64: 1, 384, 128>}, {pipeline_mode = #tpu.pipeline_mode<synchronous>, transform_indices = @transform_1, window_bounds = array<i64: 9, 128, 128>}, {pipeline_mode = #tpu.pipeline_mode<synchronous>, transform_indices = @transform_2, window_bounds = array<i64: 1, 128>}, {pipeline_mode = #tpu.pipeline_mode<synchronous>, transform_indices = @transform_3, window_bounds = array<i64: 336, 1>}, {transform_indices = @transform_4, window_bounds = array<i64: 1, 336, 128>}]} {
    %c0 = arith.constant 0 : index
    %c0_0 = arith.constant 0 : index
    %c0_1 = arith.constant 0 : index
    %0 = vector.load %arg1[%c0, %c0_0, %c0_1] : memref<1x384x128xbf16, #tpu.memory_space<vmem>>, vector<1x336x128xbf16>
    %1 = vector.shape_cast %0 : vector<1x336x128xbf16> to vector<336x128xbf16>
    %c0_2 = arith.constant 0 : index
    %c0_3 = arith.constant 0 : index
    %c0_4 = arith.constant 0 : index
    %2 = vector.load %arg2[%c0_2, %c0_3, %c0_4] : memref<9x128x128xbf16, #tpu.memory_space<vmem>>, vector<1x128x128xbf16>
    %3 = vector.shape_cast %2 : vector<1x128x128xbf16> to vector<128x128xbf16>
    %cst = arith.constant dense<0.000000e+00> : vector<336x128xf32>
    %4 = tpu.matmul %1, %3, %cst {dimension_numbers = #tpu.dot_dimension_numbers<[1], [0], [0], [1], [0, 0, 1, 1], [], []>} : vector<336x128xbf16>, vector<128x128xbf16>, vector<336x128xf32> -> vector<336x128xf32>
    %c0_5 = arith.constant 0 : index
    %c0_6 = arith.constant 0 : index
    %5 = vector.load %arg6[%c0_5, %c0_6] : memref<336x128xf32, #tpu.memory_space<vmem>>, vector<336x128xf32>
    tpu.vector_store %arg6[%c0_5, %c0_6], %4 {strides = array<i32>} : memref<336x128xf32, #tpu.memory_space<vmem>>, vector<336x128xf32>,
    %c0_7 = arith.constant 0 : index
    %c1 = arith.constant 1 : index
    %c0_8 = arith.constant 0 : index
    %6 = vector.load %arg1[%c0_7, %c1, %c0_8] : memref<1x384x128xbf16, #tpu.memory_space<vmem>>, vector<1x336x128xbf16>
    %7 = vector.shape_cast %6 : vector<1x336x128xbf16> to vector<336x128xbf16>
    %c1_9 = arith.constant 1 : index
    %c0_10 = arith.constant 0 : index
    %c0_11 = arith.constant 0 : index
    %8 = vector.load %arg2[%c1_9, %c0_10, %c0_11] : memref<9x128x128xbf16, #tpu.memory_space<vmem>>, vector<1x128x128xbf16>
    %9 = vector.shape_cast %8 : vector<1x128x128xbf16> to vector<128x128xbf16>
    %cst_12 = arith.constant dense<0.000000e+00> : vector<336x128xf32>
    %10 = tpu.matmul %7, %9, %cst_12 {dimension_numbers = #tpu.dot_dimension_numbers<[1], [0], [0], [1], [0, 0, 1, 1], [], []>} : vector<336x128xbf16>, vector<128x128xbf16>, vector<336x128xf32> -> vector<336x128xf32>
    %c0_13 = arith.constant 0 : index
    %c0_14 = arith.constant 0 : index
    %11 = vector.load %arg6[%c0_13, %c0_14] : memref<336x128xf32, #tpu.memory_space<vmem>>, vector<336x128xf32>
    %12 = arith.addf %11, %10 : vector<336x128xf32>
    %c0_15 = arith.constant 0 : index
    %c0_16 = arith.constant 0 : index
    %13 = vector.load %arg6[%c0_15, %c0_16] : memref<336x128xf32, #tpu.memory_space<vmem>>, vector<336x128xf32>
    tpu.vector_store %arg6[%c0_15, %c0_16], %12 {strides = array<i32>} : memref<336x128xf32, #tpu.memory_space<vmem>>, vector<336x128xf32>,
    %c0_17 = arith.constant 0 : index
    %c2 = arith.constant 2 : index
    %c0_18 = arith.constant 0 : index
    %14 = vector.load %arg1[%c0_17, %c2, %c0_18] : memref<1x384x128xbf16, #tpu.memory_space<vmem>>, vector<1x336x128xbf16>
    %15 = vector.shape_cast %14 : vector<1x336x128xbf16> to vector<336x128xbf16>
    %c2_19 = arith.constant 2 : index
    %c0_20 = arith.constant 0 : index
    %c0_21 = arith.constant 0 : index
    %16 = vector.load %arg2[%c2_19, %c0_20, %c0_21] : memref<9x128x128xbf16, #tpu.memory_space<vmem>>, vector<1x128x128xbf16>
    %17 = vector.shape_cast %16 : vector<1x128x128xbf16> to vector<128x128xbf16>
    %cst_22 = arith.constant dense<0.000000e+00> : vector<336x128xf32>
    %18 = tpu.matmul %15, %17, %cst_22 {dimension_numbers = #tpu.dot_dimension_numbers<[1], [0], [0], [1], [0, 0, 1, 1], [], []>} : vector<336x128xbf16>, vector<128x128xbf16>, vector<336x128xf32> -> vector<336x128xf32>
    %c0_23 = arith.constant 0 : index
    %c0_24 = arith.constant 0 : index
    %19 = vector.load %arg6[%c0_23, %c0_24] : memref<336x128xf32, #tpu.memory_space<vmem>>, vector<336x128xf32>
    %20 = arith.addf %19, %18 : vector<336x128xf32>
    %c0_25 = arith.constant 0 : index
    %c0_26 = arith.constant 0 : index
    %21 = vector.load %arg6[%c0_25, %c0_26] : memref<336x128xf32, #tpu.memory_space<vmem>>, vector<336x128xf32>
    tpu.vector_store %arg6[%c0_25, %c0_26], %20 {strides = array<i32>} : memref<336x128xf32, #tpu.memory_space<vmem>>, vector<336x128xf32>,
    %c0_27 = arith.constant 0 : index
    %c18 = arith.constant 18 : index
    %c0_28 = arith.constant 0 : index
    %22 = vector.load %arg1[%c0_27, %c18, %c0_28] : memref<1x384x128xbf16, #tpu.memory_space<vmem>>, vector<1x336x128xbf16>
    %23 = vector.shape_cast %22 : vector<1x336x128xbf16> to vector<336x128xbf16>
    %c3 = arith.constant 3 : index
    %c0_29 = arith.constant 0 : index
    %c0_30 = arith.constant 0 : index
    %24 = vector.load %arg2[%c3, %c0_29, %c0_30] : memref<9x128x128xbf16, #tpu.memory_space<vmem>>, vector<1x128x128xbf16>
    %25 = vector.shape_cast %24 : vector<1x128x128xbf16> to vector<128x128xbf16>
    %cst_31 = arith.constant dense<0.000000e+00> : vector<336x128xf32>
    %26 = tpu.matmul %23, %25, %cst_31 {dimension_numbers = #tpu.dot_dimension_numbers<[1], [0], [0], [1], [0, 0, 1, 1], [], []>} : vector<336x128xbf16>, vector<128x128xbf16>, vector<336x128xf32> -> vector<336x128xf32>
    %c0_32 = arith.constant 0 : index
    %c0_33 = arith.constant 0 : index
    %27 = vector.load %arg6[%c0_32, %c0_33] : memref<336x128xf32, #tpu.memory_space<vmem>>, vector<336x128xf32>
    %28 = arith.addf %27, %26 : vector<336x128xf32>
    %c0_34 = arith.constant 0 : index
    %c0_35 = arith.constant 0 : index
    %29 = vector.load %arg6[%c0_34, %c0_35] : memref<336x128xf32, #tpu.memory_space<vmem>>, vector<336x128xf32>
    tpu.vector_store %arg6[%c0_34, %c0_35], %28 {strides = array<i32>} : memref<336x128xf32, #tpu.memory_space<vmem>>, vector<336x128xf32>,
    %c0_36 = arith.constant 0 : index
    %c19 = arith.constant 19 : index
    %c0_37 = arith.constant 0 : index
    %30 = vector.load %arg1[%c0_36, %c19, %c0_37] : memref<1x384x128xbf16, #tpu.memory_space<vmem>>, vector<1x336x128xbf16>
    %31 = vector.shape_cast %30 : vector<1x336x128xbf16> to vector<336x128xbf16>
    %c4 = arith.constant 4 : index
    %c0_38 = arith.constant 0 : index
    %c0_39 = arith.constant 0 : index
    %32 = vector.load %arg2[%c4, %c0_38, %c0_39] : memref<9x128x128xbf16, #tpu.memory_space<vmem>>, vector<1x128x128xbf16>
    %33 = vector.shape_cast %32 : vector<1x128x128xbf16> to vector<128x128xbf16>
    %cst_40 = arith.constant dense<0.000000e+00> : vector<336x128xf32>
    %34 = tpu.matmul %31, %33, %cst_40 {dimension_numbers = #tpu.dot_dimension_numbers<[1], [0], [0], [1], [0, 0, 1, 1], [], []>} : vector<336x128xbf16>, vector<128x128xbf16>, vector<336x128xf32> -> vector<336x128xf32>
    %c0_41 = arith.constant 0 : index
    %c0_42 = arith.constant 0 : index
    %35 = vector.load %arg6[%c0_41, %c0_42] : memref<336x128xf32, #tpu.memory_space<vmem>>, vector<336x128xf32>
    %36 = arith.addf %35, %34 : vector<336x128xf32>
    %c0_43 = arith.constant 0 : index
    %c0_44 = arith.constant 0 : index
    %37 = vector.load %arg6[%c0_43, %c0_44] : memref<336x128xf32, #tpu.memory_space<vmem>>, vector<336x128xf32>
    tpu.vector_store %arg6[%c0_43, %c0_44], %36 {strides = array<i32>} : memref<336x128xf32, #tpu.memory_space<vmem>>, vector<336x128xf32>,
    %c0_45 = arith.constant 0 : index
    %c20 = arith.constant 20 : index
    %c0_46 = arith.constant 0 : index
    %38 = vector.load %arg1[%c0_45, %c20, %c0_46] : memref<1x384x128xbf16, #tpu.memory_space<vmem>>, vector<1x336x128xbf16>
    %39 = vector.shape_cast %38 : vector<1x336x128xbf16> to vector<336x128xbf16>
    %c5 = arith.constant 5 : index
    %c0_47 = arith.constant 0 : index
    %c0_48 = arith.constant 0 : index
    %40 = vector.load %arg2[%c5, %c0_47, %c0_48] : memref<9x128x128xbf16, #tpu.memory_space<vmem>>, vector<1x128x128xbf16>
    %41 = vector.shape_cast %40 : vector<1x128x128xbf16> to vector<128x128xbf16>
    %cst_49 = arith.constant dense<0.000000e+00> : vector<336x128xf32>
    %42 = tpu.matmul %39, %41, %cst_49 {dimension_numbers = #tpu.dot_dimension_numbers<[1], [0], [0], [1], [0, 0, 1, 1], [], []>} : vector<336x128xbf16>, vector<128x128xbf16>, vector<336x128xf32> -> vector<336x128xf32>
    %c0_50 = arith.constant 0 : index
    %c0_51 = arith.constant 0 : index
    %43 = vector.load %arg6[%c0_50, %c0_51] : memref<336x128xf32, #tpu.memory_space<vmem>>, vector<336x128xf32>
    %44 = arith.addf %43, %42 : vector<336x128xf32>
    %c0_52 = arith.constant 0 : index
    %c0_53 = arith.constant 0 : index
    %45 = vector.load %arg6[%c0_52, %c0_53] : memref<336x128xf32, #tpu.memory_space<vmem>>, vector<336x128xf32>
    tpu.vector_store %arg6[%c0_52, %c0_53], %44 {strides = array<i32>} : memref<336x128xf32, #tpu.memory_space<vmem>>, vector<336x128xf32>,
    %c0_54 = arith.constant 0 : index
    %c36 = arith.constant 36 : index
    %c0_55 = arith.constant 0 : index
    %46 = vector.load %arg1[%c0_54, %c36, %c0_55] : memref<1x384x128xbf16, #tpu.memory_space<vmem>>, vector<1x336x128xbf16>
    %47 = vector.shape_cast %46 : vector<1x336x128xbf16> to vector<336x128xbf16>
    %c6 = arith.constant 6 : index
    %c0_56 = arith.constant 0 : index
    %c0_57 = arith.constant 0 : index
    %48 = vector.load %arg2[%c6, %c0_56, %c0_57] : memref<9x128x128xbf16, #tpu.memory_space<vmem>>, vector<1x128x128xbf16>
    %49 = vector.shape_cast %48 : vector<1x128x128xbf16> to vector<128x128xbf16>
    %cst_58 = arith.constant dense<0.000000e+00> : vector<336x128xf32>
    %50 = tpu.matmul %47, %49, %cst_58 {dimension_numbers = #tpu.dot_dimension_numbers<[1], [0], [0], [1], [0, 0, 1, 1], [], []>} : vector<336x128xbf16>, vector<128x128xbf16>, vector<336x128xf32> -> vector<336x128xf32>
    %c0_59 = arith.constant 0 : index
    %c0_60 = arith.constant 0 : index
    %51 = vector.load %arg6[%c0_59, %c0_60] : memref<336x128xf32, #tpu.memory_space<vmem>>, vector<336x128xf32>
    %52 = arith.addf %51, %50 : vector<336x128xf32>
    %c0_61 = arith.constant 0 : index
    %c0_62 = arith.constant 0 : index
    %53 = vector.load %arg6[%c0_61, %c0_62] : memref<336x128xf32, #tpu.memory_space<vmem>>, vector<336x128xf32>
    tpu.vector_store %arg6[%c0_61, %c0_62], %52 {strides = array<i32>} : memref<336x128xf32, #tpu.memory_space<vmem>>, vector<336x128xf32>,
    %c0_63 = arith.constant 0 : index
    %c37 = arith.constant 37 : index
    %c0_64 = arith.constant 0 : index
    %54 = vector.load %arg1[%c0_63, %c37, %c0_64] : memref<1x384x128xbf16, #tpu.memory_space<vmem>>, vector<1x336x128xbf16>
    %55 = vector.shape_cast %54 : vector<1x336x128xbf16> to vector<336x128xbf16>
    %c7 = arith.constant 7 : index
    %c0_65 = arith.constant 0 : index
    %c0_66 = arith.constant 0 : index
    %56 = vector.load %arg2[%c7, %c0_65, %c0_66] : memref<9x128x128xbf16, #tpu.memory_space<vmem>>, vector<1x128x128xbf16>
    %57 = vector.shape_cast %56 : vector<1x128x128xbf16> to vector<128x128xbf16>
    %cst_67 = arith.constant dense<0.000000e+00> : vector<336x128xf32>
    %58 = tpu.matmul %55, %57, %cst_67 {dimension_numbers = #tpu.dot_dimension_numbers<[1], [0], [0], [1], [0, 0, 1, 1], [], []>} : vector<336x128xbf16>, vector<128x128xbf16>, vector<336x128xf32> -> vector<336x128xf32>
    %c0_68 = arith.constant 0 : index
    %c0_69 = arith.constant 0 : index
    %59 = vector.load %arg6[%c0_68, %c0_69] : memref<336x128xf32, #tpu.memory_space<vmem>>, vector<336x128xf32>
    %60 = arith.addf %59, %58 : vector<336x128xf32>
    %c0_70 = arith.constant 0 : index
    %c0_71 = arith.constant 0 : index
    %61 = vector.load %arg6[%c0_70, %c0_71] : memref<336x128xf32, #tpu.memory_space<vmem>>, vector<336x128xf32>
    tpu.vector_store %arg6[%c0_70, %c0_71], %60 {strides = array<i32>} : memref<336x128xf32, #tpu.memory_space<vmem>>, vector<336x128xf32>,
    %c0_72 = arith.constant 0 : index
    %c38 = arith.constant 38 : index
    %c0_73 = arith.constant 0 : index
    %62 = vector.load %arg1[%c0_72, %c38, %c0_73] : memref<1x384x128xbf16, #tpu.memory_space<vmem>>, vector<1x336x128xbf16>
    %63 = vector.shape_cast %62 : vector<1x336x128xbf16> to vector<336x128xbf16>
    %c8 = arith.constant 8 : index
    %c0_74 = arith.constant 0 : index
    %c0_75 = arith.constant 0 : index
    %64 = vector.load %arg2[%c8, %c0_74, %c0_75] : memref<9x128x128xbf16, #tpu.memory_space<vmem>>, vector<1x128x128xbf16>
    %65 = vector.shape_cast %64 : vector<1x128x128xbf16> to vector<128x128xbf16>
    %cst_76 = arith.constant dense<0.000000e+00> : vector<336x128xf32>
    %66 = tpu.matmul %63, %65, %cst_76 {dimension_numbers = #tpu.dot_dimension_numbers<[1], [0], [0], [1], [0, 0, 1, 1], [], []>} : vector<336x128xbf16>, vector<128x128xbf16>, vector<336x128xf32> -> vector<336x128xf32>
    %c0_77 = arith.constant 0 : index
    %c0_78 = arith.constant 0 : index
    %67 = vector.load %arg6[%c0_77, %c0_78] : memref<336x128xf32, #tpu.memory_space<vmem>>, vector<336x128xf32>
    %68 = arith.addf %67, %66 : vector<336x128xf32>
    %c0_79 = arith.constant 0 : index
    %c0_80 = arith.constant 0 : index
    %69 = vector.load %arg6[%c0_79, %c0_80] : memref<336x128xf32, #tpu.memory_space<vmem>>, vector<336x128xf32>
    tpu.vector_store %arg6[%c0_79, %c0_80], %68 {strides = array<i32>} : memref<336x128xf32, #tpu.memory_space<vmem>>, vector<336x128xf32>,
    %c0_81 = arith.constant 0 : index
    %c0_82 = arith.constant 0 : index
    %70 = vector.load %arg6[%c0_81, %c0_82] : memref<336x128xf32, #tpu.memory_space<vmem>>, vector<336x128xf32>
    %c0_83 = arith.constant 0 : index
    %c0_84 = arith.constant 0 : index
    %71 = vector.load %arg3[%c0_83, %c0_84] : memref<1x128xf32, #tpu.memory_space<vmem>>, vector<1x128xf32>
    %72 = vector.broadcast %71 : vector<1x128xf32> to vector<336x128xf32>
    %73 = arith.addf %70, %72 : vector<336x128xf32>
    %cst_85 = arith.constant 0.000000e+00 : f32
    %74 = vector.broadcast %cst_85 : f32 to vector<336x128xf32>
    %75 = arith.maximumf %73, %74 : vector<336x128xf32>
    %c0_86 = arith.constant 0 : index
    %c0_87 = arith.constant 0 : index
    %76 = vector.load %arg4[%c0_86, %c0_87] : memref<336x1xf32, #tpu.memory_space<vmem>>, vector<336x1xf32>
    %77 = vector.broadcast %76 : vector<336x1xf32> to vector<336x128xf32>
    %78 = arith.mulf %75, %77 : vector<336x128xf32>
    %79 = arith.truncf %78 : vector<336x128xf32> to vector<336x128xbf16>
    %c0_88 = arith.constant 0 : index
    %c0_89 = arith.constant 0 : index
    %c0_90 = arith.constant 0 : index
    %80 = vector.load %arg5[%c0_88, %c0_89, %c0_90] : memref<1x336x128xbf16, #tpu.memory_space<vmem>>, vector<1x336x128xbf16>
    %81 = vector.shape_cast %80 : vector<1x336x128xbf16> to vector<336x128xbf16>
    %82 = vector.shape_cast %79 : vector<336x128xbf16> to vector<1x336x128xbf16>
    tpu.vector_store %arg5[%c0_88, %c0_89, %c0_90], %82 {strides = array<i32>} : memref<1x336x128xbf16, #tpu.memory_space<vmem>>, vector<1x336x128xbf16>,
    return
  }
  func.func @transform_0(%arg0: i32) -> (i32, i32, i32) {
    %c0_i32 = arith.constant 0 : i32
    %c0_i32_0 = arith.constant 0 : i32
    %c0_i32_1 = arith.constant 0 : i32
    return %arg0, %c0_i32, %c0_i32_0 : i32, i32, i32
  }
  func.func @transform_1(%arg0: i32) -> (i32, i32, i32) {
    %c0_i32 = arith.constant 0 : i32
    %c0_i32_0 = arith.constant 0 : i32
    %c0_i32_1 = arith.constant 0 : i32
    %c0_i32_2 = arith.constant 0 : i32
    return %c0_i32, %c0_i32_0, %c0_i32_1 : i32, i32, i32
  }
  func.func @transform_2(%arg0: i32) -> (i32, i32) {
    %c0_i32 = arith.constant 0 : i32
    %c0_i32_0 = arith.constant 0 : i32
    %c0_i32_1 = arith.constant 0 : i32
    return %c0_i32, %c0_i32_0 : i32, i32
  }
  func.func @transform_3(%arg0: i32) -> (i32, i32) {
    %c0_i32 = arith.constant 0 : i32
    %c0_i32_0 = arith.constant 0 : i32
    %c0_i32_1 = arith.constant 0 : i32
    return %c0_i32, %c0_i32_0 : i32, i32
  }
  func.func @transform_4(%arg0: i32) -> (i32, i32, i32) {
    %c0_i32 = arith.constant 0 : i32
    %c0_i32_0 = arith.constant 0 : i32
    %c0_i32_1 = arith.constant 0 : i32
    return %arg0, %c0_i32, %c0_i32_0 : i32, i32, i32
  }
}

</mosaic_0001>

<bundles_post_ra>
// kernel: tpu_custom_call.1
= control target key start
LH: loop header
LB: loop body
LE: loop exit
PB: predicated region body
PF: predicated region fallthrough
CT: control target
= control target key end

     0   :  { %9 = vsyncpa [#allocation4], 0  ;;  %s9005_s0 = inlined_call_operand.hbm [shape: bf16[2,384,128], index: 0, kind: input, shape index: {}]   ;;  %s9006_s1 = inlined_call_operand.hbm [shape: bf16[9,128,128], index: 1, kind: input, shape index: {}]   ;;  %s9007_s2 = inlined_call_operand.vmem [shape: f32[1,128], index: 2, kind: input, shape index: {}]   ;;  %s9008_s3 = inlined_call_operand.vmem [shape: f32[336,1], index: 3, kind: input, shape index: {}]   ;;  %s9009_s4 = inlined_call_operand.hbm [shape: bf16[2,336,128], index: 4, kind: output, shape index: {}]  }
   0x1   :  { %11 = vsyncpa [#allocation4 + $0x1], 0 }
   0x2   :  { %12 = vsyncpa [#allocation7], 0 }
   0x3   :  { %13 = vsyncpa [#allocation5], 0 }
   0x4   :  { %15 = vsyncpa [#allocation5 + $0x1], 0  ;;  %s7532_s15 = smov 0   ;;  %s7534_s16 = smov 0  }
   0x5   :  { %s7536_s17 = smov 0   ;;  %s7538_s18 = smov 0  }
   0x6 LB: > { %s7553_s19 = sadd.s32 4294967295, %s7499_s18   ;;  %s5833_s20 = sadd.s32 4294967294, %s7499_s18   ;;  %s7499_s18 = sphi %s7538_s18, %s9073_s18   ;;  %s7495_s17 = sphi %s7536_s17, %s9072_s17   ;;  %s7491_s16 = sphi %s7534_s16, %s9071_s16   ;;  %s7487_s15 = sphi %s7532_s15, %s9070_s15  }
   0x7   : > { %p41_p0 = scmp.ne.s32.totalorder %s7491_s16, %s7487_s15  ;;  %p42_p1 = scmp.eq.s32.totalorder %s7553_s19, 0 }
   0x8   : > { %p128_p2 = scmp.eq.s32.totalorder %s7553_s19, 1  ;;  %p134_p3 = scmp.eq.s32.totalorder %s5833_s20, 1 }
   0x9   : > { %p7562_p4 = por %p42_p1, %p41_p0  ;;  %p5834_p5 = scmp.ge.s32.totalorder %s7499_s18, 1 }
   0xa   : > { %p7567_p6 = por %p134_p3, %p41_p0  ;;  %p141_p7 = scmp.lt.s32.totalorder %s7499_s18, 3 }
   0xb   : > { %s152_s25 = sshll.u32 %s9006_s1, 4  ;;  %s7501_s27 = smov [#allocation6]   ;;  %s153_s25 = int_to_ptr.hbm [resolvable:$true] %s152_s25 }
   0xc   : > { %p7575_p8 = pnand %p5834_p5, %p141_p7  ;;  %s154_s28 = sshll.u32 %s7501_s27, 4  ;;  %s155_s28 = int_to_ptr.vmem [resolvable:$true] %s154_s28 }
   0xd   : > { %s7585_s29 = sadd.s32 1, %s7499_s18   ;;  %s9010_s30 = smov 64  }
   0xe   : > { %p7310_p9 = pneg %p7575_p8  ;;  %s9011_s5 = smov 4  }
   0xf   : > { %s25_s6 = ssub.s32 %s7499_s18, %s7585_s29  ;;  %s28_s7 = sadd.s32 1, %s7495_s17 }
  0x10   : > { %p7311_p10 = pnand %p7310_p9, %p42_p1  ;;  %p26_p12 = scmp.eq.s32.totalorder %s25_s6, 0 }
  0x11   : > { %p35_p13 = scmp.ne.s32.totalorder %s7495_s17, %s7491_s16  ;;  %p36_p0 = scmp.eq.s32.totalorder %s7499_s18, 0 }
  0x12   : > { %7313 = dma.hbm_to_vmem [thread:$0]  (!%p7311_p10), %s153_s25, 9216, %s155_s28, [#allocation7], %s9010_s30, %s9010_s30, %s9011_s5  }
  0x13   : > { %p7323_p3 = scmp.lt.s32.totalorder %s7499_s18, 2  ;;  %p37_p5 = por %p36_p0, %p35_p13 }
  0x14   : > { %s7598_s8 = scalar_select %p26_p12, %s7495_s17, %s28_s7  }
  0x15   : > { %p7602_p7 = por %p128_p2, %p35_p13  ;;  %s174_s10 = sand.u32 1, %s7495_s17  }
  0x16   : > { %s7298_s11 = smul.u32 192, %s7499_s18  ;;  %p7611_p9 = pnand %p7323_p3, %p37_p5 }
  0x17   : > { %s7297_s12 = smul.u32 192, %s174_s10  ;;  %s175_s28 = scalar_lea.sflag [#allocation4], %s174_s10 }
  0x18   : > { %s183_s20 = scalar_lea.hbm %s9005_s0, %s7298_s11  ;;  %p7403_p10 = pneg %p7611_p9 }
  0x19   : > { %s184_s24 = sshll.u32 %s183_s20, 4  ;;  %s178_s25 = scalar_lea.vmem [#allocation3], %s7297_s12  ;;  %s185_s24 = int_to_ptr.hbm [resolvable:$true] %s184_s24 }
  0x1a   : > { %s186_s27 = sshll.u32 %s178_s25, 4  ;;  %s7399_s6 = sshra.s32 %s185_s24, 4  ;;  %s187_s27 = int_to_ptr.vmem [resolvable:$true] %s186_s27  ;;  %s7400_s6 = int_to_ptr.hbm [resolvable:$true] %s7399_s6 }
  0x1b   : > { %s7401_s7 = scalar_lea.hbm %s7400_s6, 192  ;;  %s7406_s14 = scalar_lea.hbm %s9005_s0, 384 }
  0x1c   : > { %p7402_p2 = scmp.ne.s32.totalorder %s7400_s6, %s7401_s7  ;;  %p7407_p0 = scmp.lt.s32.totalorder %s7400_s6, %s9005_s0 }
  0x1d   : > { %p7408_p3 = scmp.lt.s32.totalorder %s7406_s14, %s7401_s7 }
  0x1e   : > { %p7404_p12 = pnand %p7403_p10, %p7402_p2 }
  0x1f   : > { %p7409_p5 = por %p7408_p3, %p7407_p0 }
  0x20   : > { %p7405_p13 = pneg %p7404_p12 }
  0x22   : > { %p7410_p11 = pnand %p7409_p5, %p7405_p13 }
  0x24   : > { %7413 = shalt.err (!%p7410_p11)
}
  0x25   : > { %s9021_s10 = smov 4   ;;  %s9022_s12 = smov 64  }
  0x26   : > { %7317 = dma.hbm_to_vmem [thread:$0]  (!%p7611_p9), %s185_s24, 3072, %s187_s27, %s175_s28, %s9022_s12, %s9022_s12, %s9021_s10  }
  0x27   : > { %198 = sbr.rel (%p7575_p8) target bundleno = 993 (0x3e1), region = 36 }
  0x2c   : > { %s7631_s20 = sand.u32 1, %s7491_s16  }
  0x2d   : > { %s7299_s30 = smul.u32 192, %s7631_s20  ;;  %s201_s5 = scalar_lea.sflag [#allocation4], %s7631_s20 }
  0x2f   : > { %s7635_s25 = scalar_lea.vmem [#allocation3], %s7299_s30 }
  0x30   : > { %7474 = dma.done.wait (%p7562_p4), %s201_s5, 3072  }
  0x31   : > { %7476 = vsyncadd (%p7562_p4), %s201_s5, 4294964224 }
  0x32   : > { %7478 = dma.done.wait (%p42_p1), [#allocation7], 9216  }
  0x33   : > { %7480 = vsyncadd (%p42_p1), [#allocation7], 4294958080  ;;  %v6915_v0 = vld [vmem:[#allocation6 + $0x38] sm:$0xff]  ;;  %v6914_v1 = vld [vmem:[#allocation6 + $0x30] sm:$0xff]  ;;  %vm1441_vm0 = vcmask 1046528   ;;  %vm3157_vm4 = vcmask 1045504  }
  0x34   : > { %7273 = vmatpush.bf16.msra.mxu1 %v6915_v0  ;;  %7274 = vmatpush.bf16.msra.mxu2 %v6915_v0  ;;  %v6913_v2 = vld [vmem:[#allocation6 + $0x28] sm:$0xff]  ;;  %v6912_v3 = vld [vmem:[#allocation6 + $0x20] sm:$0xff]  ;;  %v6911_v4 = vld [vmem:[#allocation6 + $0x18] sm:$0xff]  ;;  %vm791_vm1 = vsmask.f32 7424  ;;  %vm4873_vm5 = vcmask 1044480  }
  0x35   : > { %467 = vmatpush.bf16.msra.mxu0 %v6915_v0  ;;  %7275 = vmatpush.bf16.msra.mxu3 %v6915_v0  ;;  %v6910_v5 = vld [vmem:[#allocation6 + $0x10] sm:$0xff]  ;;  %v6909_v6 = vld [vmem:[#allocation6 + $0x8] sm:$0xff]  ;;  %v6908_v7 = vld [vmem:[#allocation6] sm:$0xff]  ;;  %vm2482_vm2 = vsmask.f32 6400  ;;  %s7300_s14 = smul.u32 168, %s7631_s20 }
  0x36   : > { %v6973_v8 = vld [vmem:[#allocation6 + $0xb8] sm:$0xff]  ;;  %v6893_v11 = vld [vmem:[%s7635_s25 + $0x30] sm:$0xff]  ;;  %v6899_v12 = vld [vmem:[%s7635_s25 + $0x60] sm:$0xff]  ;;  %vm4198_vm3 = vsmask.f32 5376  ;;  %s7449_s30 = scalar_lea.hbm %s9009_s4, 336 }
  0x37   : > { %v6944_v9 = vld [vmem:[#allocation6 + $0x78] sm:$0xff]  ;;  %v6887_v13 = vld [vmem:[%s7635_s25] sm:$0xff]  ;;  %v6972_v14 = vld [vmem:[#allocation6 + $0xb0] sm:$0xff]  ;;  %s8506_s10 = scalar_lea.vmem [#allocation8], %s7300_s14 }
  0x38   : > { %7276 = vmatpush.bf16.msra.mxu1 %v6914_v1  ;;  %7277 = vmatpush.bf16.msra.mxu2 %v6914_v1  ;;  %v7031_v10 = vld [vmem:[#allocation6 + $0x138] sm:$0xff]  ;;  %v6943_v15 = vld [vmem:[#allocation6 + $0x70] sm:$0xff]  ;;  %v6971_v17 = vld [vmem:[#allocation6 + $0xa8] sm:$0xff]  ;;  %s5747_s6 = sshll.u32 %s8506_s10, 4  ;;  %s5748_s6 = int_to_ptr.vmem [resolvable:$true] %s5747_s6 }
  0x39   : > { %468 = vmatpush.bf16.msra.mxu0 %v6914_v1  ;;  %7278 = vmatpush.bf16.msra.mxu3 %v6914_v1  ;;  %v7030_v16 = vld [vmem:[#allocation6 + $0x130] sm:$0xff]  ;;  %v6942_v19 = vld [vmem:[#allocation6 + $0x68] sm:$0xff]  ;;  %v6970_v21 = vld [vmem:[#allocation6 + $0xa0] sm:$0xff] }
  0x3a   : > { %v6905_v18 = vld [vmem:[%s7635_s25 + $0x90] sm:$0xff]  ;;  %v7029_v20 = vld [vmem:[#allocation6 + $0x128] sm:$0xff]  ;;  %v6941_v22 = vld [vmem:[#allocation6 + $0x60] sm:$0xff] }
  0x3b   : > { %v7028_v23 = vld [vmem:[#allocation6 + $0x120] sm:$0xff]  ;;  %v6894_v24 = vld [vmem:[%s7635_s25 + $0x38] sm:$0xff]  ;;  %v6900_v25 = vld [vmem:[%s7635_s25 + $0x68] sm:$0xff] }
  0x3c   : > { %7279 = vmatpush.bf16.msra.mxu1 %v6913_v2  ;;  %7280 = vmatpush.bf16.msra.mxu2 %v6913_v2  ;;  %v6888_v26 = vld [vmem:[%s7635_s25 + $0x8] sm:$0xff]  ;;  %v6969_v27 = vld [vmem:[#allocation6 + $0x98] sm:$0xff]  ;;  %v6968_v32 = vld [vmem:[#allocation6 + $0x90] sm:$0xff] }
  0x3d   : > { %469 = vmatpush.bf16.msra.mxu0 %v6913_v2  ;;  %7281 = vmatpush.bf16.msra.mxu3 %v6913_v2  ;;  %v7002_v28 = vld [vmem:[#allocation6 + $0xf8] sm:$0xff]  ;;  %v7001_v33 = vld [vmem:[#allocation6 + $0xf0] sm:$0xff]  ;;  %v7000_v34 = vld [vmem:[#allocation6 + $0xe8] sm:$0xff] }
  0x3e   : > { %v6940_v29 = vld [vmem:[#allocation6 + $0x58] sm:$0xff]  ;;  %v6895_v35 = vld [vmem:[%s7635_s25 + $0x40] sm:$0xff]  ;;  %v6901_v36 = vld [vmem:[%s7635_s25 + $0x70] sm:$0xff] }
  0x3f   : > { %v6906_v30 = vld [vmem:[%s7635_s25 + $0x98] sm:$0xff]  ;;  %v6889_v37 = vld [vmem:[%s7635_s25 + $0x10] sm:$0xff]  ;;  %v6999_v39 = vld [vmem:[#allocation6 + $0xe0] sm:$0xff] }
  0x40   : > { %7282 = vmatpush.bf16.msra.mxu1 %v6912_v3  ;;  %7283 = vmatpush.bf16.msra.mxu2 %v6912_v3  ;;  %v7027_v31 = vld [vmem:[#allocation6 + $0x118] sm:$0xff]  ;;  %v6939_v38 = vld [vmem:[#allocation6 + $0x50] sm:$0xff]  ;;  %v6967_v41 = vld [vmem:[#allocation6 + $0x88] sm:$0xff] }
  0x41   : > { %470 = vmatpush.bf16.msra.mxu0 %v6912_v3  ;;  %7284 = vmatpush.bf16.msra.mxu3 %v6912_v3  ;;  %v7026_v40 = vld [vmem:[#allocation6 + $0x110] sm:$0xff]  ;;  %v6907_v42 = vld [vmem:[%s7635_s25 + $0xa0] sm:$0xff]  ;;  %v6938_v43 = vld [vmem:[#allocation6 + $0x48] sm:$0xff] }
  0x42   : > { %v6998_v44 = vld [vmem:[#allocation6 + $0xd8] sm:$0xff]  ;;  %v6997_v45 = vld [vmem:[#allocation6 + $0xd0] sm:$0xff]  ;;  %v6896_v46 = vld [vmem:[%s7635_s25 + $0x48] sm:$0xff] }
  0x43   : > { %v6902_v47 = vld [vmem:[%s7635_s25 + $0x78] sm:$0xff]  ;;  %v7025_v49 = vld [vmem:[#allocation6 + $0x108] sm:$0xff]  ;;  %v6966_v51 = vld [vmem:[#allocation6 + $0x80] sm:$0xff] }
  0x44   : > { %7285 = vmatpush.bf16.msra.mxu1 %v6911_v4  ;;  %7286 = vmatpush.bf16.msra.mxu2 %v6911_v4  ;;  %v6890_v48 = vld [vmem:[%s7635_s25 + $0x18] sm:$0xff]  ;;  %v6996_v50 = vld [vmem:[#allocation6 + $0xc8] sm:$0xff]  ;;  %v6995_v52 = vld [vmem:[#allocation6 + $0xc0] sm:$0xff] }
  0x45   : > { %471 = vmatpush.bf16.msra.mxu0 %v6911_v4  ;;  %7287 = vmatpush.bf16.msra.mxu3 %v6911_v4  ;;  %v6937_v53 = vld [vmem:[#allocation6 + $0x40] sm:$0xff]  ;;  %v6190_v54 = vld [vmem:[%s7635_s25 + $0x8] sm:$0xe]  ;;  %v6974_v55 = vld [vmem:[%s7635_s25 + $0x8] sm:$0xf0] }
  0x46   : > { %v6975_v56 = vld [vmem:[%s7635_s25 + $0x10] sm:$0xff]  ;;  %v7024_v57 = vld [vmem:[#allocation6 + $0x100] sm:$0xff]  ;;  %v6191_v58 = vor.u32 %v6974_v55, %v6190_v54  ;;  %v7089_v1 = vld [vmem:[#allocation6 + $0x1b8] sm:$0xff] }
  0x47   : > { %v1963_v59 = vrot.slane %v6975_v56, 1  ;;  %v6897_v62 = vld [vmem:[%s7635_s25 + $0x50] sm:$0xff]  ;;  %v6903_v63 = vld [vmem:[%s7635_s25 + $0x80] sm:$0xff]  ;;  %v7118_v2 = vld [vmem:[#allocation6 + $0x1f8] sm:$0xff] }
  0x48   : > { %7288 = vmatpush.bf16.msra.mxu1 %v6910_v5  ;;  %7289 = vmatpush.bf16.msra.mxu2 %v6910_v5  ;;  %v1962_v60 = vrot.slane %v6191_v58, 1  ;;  %v6891_v0 = vld [vmem:[%s7635_s25 + $0x20] sm:$0xff]  ;;  %v7060_v3 = vld [vmem:[#allocation6 + $0x178] sm:$0xff]  ;;  %v7088_v55 = vld [vmem:[#allocation6 + $0x1b0] sm:$0xff] }
  0x49   : > { %472 = vmatpush.bf16.msra.mxu0 %v6910_v5  ;;  %7290 = vmatpush.bf16.msra.mxu3 %v6910_v5  ;;  %v6976_v4 = vld [vmem:[%s7635_s25 + $0x18] sm:$0xff] }
  0x4a   : > { %v1964_v61 = vsel %vm1441_vm0, %v1962_v60, %v1963_v59  ;;  %v7147_v5 = vld [vmem:[#allocation6 + $0x238] sm:$0xff] }
  0x4c   : > { %7291 = vmatpush.bf16.msra.mxu1 %v6909_v6  ;;  %7292 = vmatpush.bf16.msra.mxu2 %v6909_v6 }
  0x4d   : > { %473 = vmatpush.bf16.msra.mxu0 %v6909_v6  ;;  %7293 = vmatpush.bf16.msra.mxu3 %v6909_v6  ;;  %v1965_v6 = vrot.slane %v6976_v4, 1  ;;  %v6919_v4 = vld [vmem:[%s7635_s25 + $0x18] sm:$0xff] }
  0x50   : > { %7294 = vmatpush.bf16.msra.mxu1 %v6908_v7  ;;  %7295 = vmatpush.bf16.msra.mxu2 %v6908_v7 }
  0x51   : > { %474 = vmatpush.bf16.msra.mxu0 %v6908_v7  ;;  %7296 = vmatpush.bf16.msra.mxu3 %v6908_v7  ;;  %v1966_v7 = vsel %vm1441_vm0, %v1963_v59, %v1965_v6 }
  0x53   : > { %505 = vmatmul.bf16.vlgmr.msra.gmra.mxu1 %v6893_v11  ;;  %535 = vmatmul.bf16.vlgmr.msra.gmra.mxu2 %v6899_v12  ;;  %v6904_v11 = vld [vmem:[%s7635_s25 + $0x88] sm:$0xff] }
  0x54   : > { %1554 = vmatpush.bf16.msrb.mxu2 %v6973_v8  ;;  %1033 = vmatpush.bf16.msrb.mxu1 %v6944_v9  ;;  %v6306_v8 = vld [vmem:[%s7635_s25 + $0x8] sm:$0xe]  ;;  %v7003_v9 = vld [vmem:[%s7635_s25 + $0x8] sm:$0xf0] }
  0x55   : > { %2749 = vmatpush.bf16.msrb.mxu0 %v7031_v10  ;;  %565 = vmatmul.bf16.vlgmr.msra.gmra.mxu3 %v6905_v18  ;;  %v6898_v10 = vld [vmem:[%s7635_s25 + $0x58] sm:$0xff]  ;;  %v6892_v12 = vld [vmem:[%s7635_s25 + $0x28] sm:$0xff]  ;;  %v6074_v18 = vld [vmem:[%s7635_s25] sm:$0xe] }
  0x56   : > { %475 = vmatmul.bf16.vlgmr.msra.gmra.mxu0 %v6887_v13  ;;  %2074 = vmatpush.bf16.msrb.mxu3 %v7002_v28  ;;  %v6916_v13 = vld [vmem:[%s7635_s25] sm:$0xff] }
  0x58   : > { %1555 = vmatpush.bf16.msrb.mxu2 %v6972_v14  ;;  %1034 = vmatpush.bf16.msrb.mxu1 %v6943_v15  ;;  %v7004_v14 = vld [vmem:[%s7635_s25 + $0x10] sm:$0xff]  ;;  %v6307_v15 = vor.u32 %v7003_v9, %v6306_v8  ;;  %v816_v9 = vshll.u32 %v6919_v4, 16 }
  0x59   : > { %2750 = vmatpush.bf16.msrb.mxu0 %v7030_v16  ;;  %v6917_v16 = vld [vmem:[%s7635_s25 + $0x8] sm:$0xff] }
  0x5a   : > { %2075 = vmatpush.bf16.msrb.mxu3 %v7001_v33  ;;  %v800_v28 = vshll.u32 %v6917_v16, 16 }
  0x5c   : > { %1556 = vmatpush.bf16.msrb.mxu2 %v6971_v17  ;;  %1035 = vmatpush.bf16.msrb.mxu1 %v6942_v19  ;;  %v795_v17 = vshll.u32 %v6916_v13, 16  ;;  %v6977_v19 = vld [vmem:[%s7635_s25 + $0x20] sm:$0xff] }
  0x5d   : > { %2751 = vmatpush.bf16.msrb.mxu0 %v7029_v20  ;;  %v6945_v20 = vld [vmem:[%s7635_s25] sm:$0xf0] }
  0x5e   : > { %2076 = vmatpush.bf16.msrb.mxu3 %v7000_v34 }
  0x60   : > { %1557 = vmatpush.bf16.msrb.mxu2 %v6970_v21  ;;  %1036 = vmatpush.bf16.msrb.mxu1 %v6941_v22  ;;  %v2484_v21 = vshrl.u32 %v6307_v15, 16  ;;  %v2487_v22 = vshll.u32 %v6307_v15, 16 }
  0x61   : > { %2752 = vmatpush.bf16.msrb.mxu0 %v7028_v23  ;;  %v2492_v23 = vshrl.u32 %v7004_v14, 16 }
  0x62   : > { %2077 = vmatpush.bf16.msrb.mxu3 %v6999_v39 }
  0x63   : > { %510 = vmatmul.bf16.gmra.mxu1 %v6894_v24  ;;  %540 = vmatmul.bf16.gmra.mxu2 %v6900_v25  ;;  %v2495_v24 = vshll.u32 %v7004_v14, 16  ;;  %v1967_v25 = vrot.slane %v6977_v19, 1  ;;  %v2494_v33 = vrot.slane %v2492_v23, 1 }
  0x64   : > { %1558 = vmatpush.bf16.msrb.mxu2 %v6969_v27  ;;  %1037 = vmatpush.bf16.msrb.mxu1 %v6940_v29  ;;  %v797_v27 = vrot.slane %v795_v17, 1  ;;  %v6946_v29 = vld [vmem:[%s7635_s25 + $0x8] sm:$0xff] }
  0x65   : > { %570 = vmatmul.bf16.gmra.mxu3 %v6906_v30  ;;  %2753 = vmatpush.bf16.msrb.mxu0 %v7027_v31  ;;  %v6075_v30 = vor.u32 %v6945_v20, %v6074_v18  ;;  %v2486_v31 = vrot.slane %v2484_v21, 1  ;;  %v2497_v34 = vrot.slane %v2495_v24, 2  ;;  %v1443_v39 = vrot.slane %v6946_v29, 1 }
  0x66   : > { %480 = vmatmul.bf16.gmra.mxu0 %v6888_v26  ;;  %2078 = vmatpush.bf16.msrb.mxu3 %v6998_v44  ;;  %v793_v26 = vshrl.u32 %v6916_v13, 16 }
  0x68   : > { %1559 = vmatpush.bf16.msrb.mxu2 %v6968_v32  ;;  %1038 = vmatpush.bf16.msrb.mxu1 %v6939_v38  ;;  %v2489_v32 = vrot.slane %v2487_v22, 2  ;;  %v1442_v38 = vrot.slane %v6075_v30, 1 }
  0x69   : > { %2754 = vmatpush.bf16.msrb.mxu0 %v7026_v40 }
  0x6a   : > { %2079 = vmatpush.bf16.msrb.mxu3 %v6997_v45  ;;  %v2490_v40 = vor.u32 %v2489_v32, %v2486_v31  ;;  %v7005_v45 = vld [vmem:[%s7635_s25 + $0x18] sm:$0xff]  ;;  %v820_v31 = vshrl.u32 %v6919_v4, 16 }
  0x6c   : > { %1560 = vmatpush.bf16.msrb.mxu2 %v6967_v41  ;;  %1039 = vmatpush.bf16.msrb.mxu1 %v6938_v43  ;;  %v2498_v41 = vor.u32 %v2497_v34, %v2494_v33  ;;  %v1444_v43 = vsel %vm1441_vm0, %v1442_v38, %v1443_v39  ;;  %v6949_v33 = vld [vmem:[%s7635_s25 + $0x20] sm:$0xff]  ;;  %v6980_v34 = vld [vmem:[%s7635_s25 + $0x38] sm:$0xff] }
  0x6d   : > { %2755 = vmatpush.bf16.msrb.mxu0 %v7025_v49  ;;  %v804_v49 = vshrl.u32 %v6917_v16, 16  ;;  %v818_v16 = vrot.slane %v816_v9, 1  ;;  %v1973_v38 = vrot.slane %v6980_v34, 1 }
  0x6e   : > { %2080 = vmatpush.bf16.msrb.mxu3 %v6996_v50  ;;  %v2499_v44 = vsel %vm2482_vm2, %v2490_v40, %v2498_v41 }
  0x70   : > { %1561 = vmatpush.bf16.msrb.mxu2 %v6966_v51  ;;  %1040 = vmatpush.bf16.msrb.mxu1 %v6937_v53  ;;  %v6947_v51 = vld [vmem:[%s7635_s25 + $0x10] sm:$0xff] }
  0x71   : > { %2756 = vmatpush.bf16.msrb.mxu0 %v7024_v57  ;;  %v1445_v59 = vrot.slane %v6947_v51, 1  ;;  %v7008_v51 = vld [vmem:[%s7635_s25 + $0x30] sm:$0xff] }
  0x72   : > { %2081 = vmatpush.bf16.msrb.mxu3 %v6995_v52  ;;  %v6978_v52 = vld [vmem:[%s7635_s25 + $0x28] sm:$0xff] }
  0x73   : > { %515 = vmatmul.bf16.gmra.mxu1 %v6895_v35  ;;  %545 = vmatmul.bf16.gmra.mxu2 %v6901_v36  ;;  %v1968_v35 = vsel %vm1441_vm0, %v1965_v6, %v1967_v25  ;;  %v798_v36 = vor.u32 %v797_v27, %v793_v26  ;;  %v1969_v56 = vrot.slane %v6978_v52, 1  ;;  %v6920_v26 = vld [vmem:[%s7635_s25 + $0x20] sm:$0xff]  ;;  %v6921_v52 = vld [vmem:[%s7635_s25 + $0x28] sm:$0xff] }
  0x74   : > { %3790 = vmatpush.bf16.msra.mxu2 %v7089_v1  ;;  %3270 = vmatpush.bf16.msra.mxu1 %v7060_v3  ;;  %v7059_v1 = vld [vmem:[#allocation6 + $0x170] sm:$0xff]  ;;  %v7006_v3 = vld [vmem:[%s7635_s25 + $0x20] sm:$0xff]  ;;  %v824_v32 = vshll.u32 %v6920_v26, 16 }
  0x75   : > { %575 = vmatmul.bf16.gmra.mxu3 %v6907_v42  ;;  %4986 = vmatpush.bf16.msra.mxu0 %v7147_v5  ;;  %v1970_v60 = vsel %vm1441_vm0, %v1967_v25, %v1969_v56  ;;  %v2510_v5 = vshrl.u32 %v7006_v3, 16  ;;  %v2513_v6 = vshll.u32 %v7006_v3, 16  ;;  %v7007_v25 = vld [vmem:[%s7635_s25 + $0x28] sm:$0xff] }
  0x76   : > { %485 = vmatmul.bf16.gmra.mxu0 %v6889_v37  ;;  %4465 = vmatpush.bf16.msra.mxu3 %v7118_v2  ;;  %v802_v37 = vrot.slane %v800_v28, 1  ;;  %v2519_v27 = vshrl.u32 %v7007_v25, 16  ;;  %v2522_v28 = vshll.u32 %v7007_v25, 16  ;;  %v826_v40 = vrot.slane %v824_v32, 1  ;;  %v7058_v3 = vld [vmem:[#allocation6 + $0x168] sm:$0xff] }
  0x77   : > { %v2515_v13 = vrot.slane %v2513_v6, 2  ;;  %v6982_v32 = vld [vmem:[%s7635_s25 + $0x48] sm:$0xff] }
  0x78   : > { %v803_v42 = vsel %vm791_vm1, %v798_v36, %v802_v37  ;;  %3791 = vmatpush.bf16.msra.mxu2 %v7088_v55  ;;  %v806_v57 = vor.u32 %v804_v49, %v802_v37  ;;  %3271 = vmatpush.bf16.msra.mxu1 %v7059_v1  ;;  %v2521_v36 = vrot.slane %v2519_v27, 1  ;;  %v2524_v37 = vrot.slane %v2522_v28, 2  ;;  %v6951_v28 = vld [vmem:[%s7635_s25 + $0x30] sm:$0xff] }
  0x7c   : > { %3272 = vmatpush.bf16.msra.mxu1 %v7058_v3 }
  0x83   : > { %520 = vmatmul.bf16.gmra.mxu1 %v6896_v46  ;;  %550 = vmatmul.bf16.gmra.mxu2 %v6902_v47  ;;  %v6918_v46 = vld [vmem:[%s7635_s25 + $0x10] sm:$0xff]  ;;  %v2501_v47 = vshrl.u32 %v7005_v45, 16 }
  0x84   : > { %v808_v50 = vshll.u32 %v6918_v46, 16  ;;  %v812_v8 = vshrl.u32 %v6918_v46, 16 }
  0x85   : > { %2082 = vmatmul.bf16.vlgmr.msrb.gmra.mxu3 %v1964_v61  ;;  %v2503_v53 = vrot.slane %v2501_v47, 1 }
  0x86   : > { %490 = vmatmul.bf16.gmra.mxu0 %v6890_v48  ;;  %v2504_v48 = vshll.u32 %v7005_v45, 16  ;;  %v810_v58 = vrot.slane %v808_v50, 1 }
  0x88   : > { %v2506_v54 = vrot.slane %v2504_v48, 2  ;;  %v814_v15 = vor.u32 %v812_v8, %v810_v58 }
  0x8a   : > { %v2507_v61 = vor.u32 %v2506_v54, %v2503_v53  ;;  %v819_v21 = vsel %vm791_vm1, %v814_v15, %v818_v16  ;;  %v2528_v53 = vshrl.u32 %v7008_v51, 16  ;;  %v2531_v54 = vshll.u32 %v7008_v51, 16  ;;  %v7145_v15 = vld [vmem:[#allocation6 + $0x228] sm:$0xff] }
  0x8c   : > { %v2508_v2 = vsel %vm2482_vm2, %v2498_v41, %v2507_v61  ;;  %v1449_v41 = vrot.slane %v6949_v33, 1  ;;  %v2530_v1 = vrot.slane %v2528_v53, 1 }
  0x93   : > { %525 = vmatmul.bf16.gmra.mxu1 %v6897_v62  ;;  %555 = vmatmul.bf16.gmra.mxu2 %v6903_v63  ;;  %v7117_v62 = vld [vmem:[#allocation6 + $0x1f0] sm:$0xff]  ;;  %v811_v63 = vsel %vm791_vm1, %v806_v57, %v810_v58  ;;  %v828_v58 = vshrl.u32 %v6920_v26, 16  ;;  %v836_v26 = vshrl.u32 %v6921_v52, 16 }
  0x94   : > { %4466 = vmatpush.bf16.msra.mxu3 %v7117_v62  ;;  %v7116_v62 = vld [vmem:[#allocation6 + $0x1e8] sm:$0xff] }
  0x95   : > { %2087 = vmatmul.bf16.gmra.mxu3 %v1966_v7  ;;  %v7146_v7 = vld [vmem:[#allocation6 + $0x230] sm:$0xff] }
  0x96   : > { %495 = vmatmul.bf16.gmra.mxu0 %v6891_v0  ;;  %v1446_v0 = vsel %vm1441_vm0, %v1443_v39, %v1445_v59  ;;  %v822_v39 = vor.u32 %v820_v31, %v818_v16 }
  0x97   : > { %4987 = vmatpush.bf16.msra.mxu0 %v7146_v7 }
  0x98   : > { %v827_v46 = vsel %vm791_vm1, %v822_v39, %v826_v40  ;;  %4467 = vmatpush.bf16.msra.mxu3 %v7116_v62 }
  0x9b   : > { %4988 = vmatpush.bf16.msra.mxu0 %v7145_v15 }
  0xa3   : > { %530 = vmatmul.bf16.gmra.mxu1 %v6898_v10  ;;  %560 = vmatmul.bf16.gmra.mxu2 %v6904_v11  ;;  %v6948_v10 = vld [vmem:[%s7635_s25 + $0x18] sm:$0xff]  ;;  %v6979_v11 = vld [vmem:[%s7635_s25 + $0x30] sm:$0xff] }
  0xa4   : > { %v1971_v14 = vrot.slane %v6979_v11, 1  ;;  %v1447_v17 = vrot.slane %v6948_v10, 1 }
  0xa5   : > { %2092 = vmatmul.bf16.gmra.mxu3 %v1968_v35 }
  0xa6   : > { %500 = vmatmul.bf16.gmra.mxu0 %v6892_v12  ;;  %v2512_v12 = vrot.slane %v2510_v5, 1  ;;  %v1972_v18 = vsel %vm1441_vm0, %v1969_v56, %v1971_v14  ;;  %v1448_v22 = vsel %vm1441_vm0, %v1445_v59, %v1447_v17  ;;  %v1450_v47 = vsel %vm1441_vm0, %v1447_v17, %v1449_v41  ;;  %v7087_v56 = vld [vmem:[#allocation6 + $0x1a8] sm:$0xff] }
  0xa7   : > { %v832_v59 = vshll.u32 %v6921_v52, 16  ;;  %3792 = vmatpush.bf16.msra.mxu2 %v7087_v56  ;;  %v830_v5 = vor.u32 %v828_v58, %v826_v40  ;;  %v1453_v40 = vrot.slane %v6951_v28, 1  ;;  %v6923_v56 = vld [vmem:[%s7635_s25 + $0x38] sm:$0xff] }
  0xa8   : > { %v2516_v19 = vor.u32 %v2515_v13, %v2512_v12 }
  0xa9   : > { %v834_v6 = vrot.slane %v832_v59, 1 }
  0xaa   : > { %v2517_v24 = vsel %vm2482_vm2, %v2507_v61, %v2516_v19 }
  0xab   : > { %v835_v12 = vsel %vm791_vm1, %v830_v5, %v834_v6 }
  0xb3   : > { %1041 = vmatmul.bf16.vlgmr.msrb.gmra.mxu1 %v803_v42  ;;  %1562 = vmatmul.bf16.vlgmr.msrb.gmra.mxu2 %v1444_v43  ;;  %v1974_v42 = vsel %vm1441_vm0, %v1971_v14, %v1973_v38  ;;  %v2525_v43 = vor.u32 %v2524_v37, %v2521_v36  ;;  %v1977_v37 = vrot.slane %v6982_v32, 1  ;;  %v7011_v32 = vld [vmem:[%s7635_s25 + $0x48] sm:$0xff] }
  0xb5   : > { %2097 = vmatmul.bf16.gmra.mxu3 %v1970_v60  ;;  %v2526_v50 = vsel %vm2482_vm2, %v2516_v19, %v2525_v43  ;;  %v6950_v60 = vld [vmem:[%s7635_s25 + $0x28] sm:$0xff]  ;;  %v6922_v19 = vld [vmem:[%s7635_s25 + $0x30] sm:$0xff] }
  0xb6   : > { %2757 = vmatmul.bf16.vlgmr.msrb.gmra.mxu0 %v2499_v44  ;;  %v1451_v7 = vrot.slane %v6950_v60, 1  ;;  %v840_v27 = vshll.u32 %v6922_v19, 16 }
  0xb8   : > { %v1452_v13 = vsel %vm1441_vm0, %v1449_v41, %v1451_v7  ;;  %v842_v39 = vrot.slane %v840_v27, 1 }
  0xc3   : > { %1046 = vmatmul.bf16.gmra.mxu1 %v811_v63  ;;  %1567 = vmatmul.bf16.gmra.mxu2 %v1446_v0  ;;  %v6981_v63 = vld [vmem:[%s7635_s25 + $0x40] sm:$0xff] }
  0xc4   : > { %v1975_v4 = vrot.slane %v6981_v63, 1  ;;  %v844_v63 = vshrl.u32 %v6922_v19, 16 }
  0xc5   : > { %2102 = vmatmul.bf16.gmra.mxu3 %v1972_v18  ;;  %v7009_v18 = vld [vmem:[%s7635_s25 + $0x38] sm:$0xff] }
  0xc6   : > { %2762 = vmatmul.bf16.gmra.mxu0 %v2508_v2  ;;  %v2533_v2 = vrot.slane %v2531_v54, 2  ;;  %v1976_v8 = vsel %vm1441_vm0, %v1973_v38, %v1975_v4  ;;  %v838_v38 = vor.u32 %v836_v26, %v834_v6  ;;  %v1978_v41 = vsel %vm1441_vm0, %v1975_v4, %v1977_v37  ;;  %v7010_v54 = vld [vmem:[%s7635_s25 + $0x40] sm:$0xff]  ;;  %v6983_v4 = vld [vmem:[%s7635_s25 + $0x50] sm:$0xff] }
  0xc7   : > { %v2546_v58 = vshrl.u32 %v7010_v54, 16  ;;  %v2549_v59 = vshll.u32 %v7010_v54, 16 }
  0xc8   : > { %v2534_v9 = vor.u32 %v2533_v2, %v2530_v1  ;;  %v848_v1 = vshll.u32 %v6923_v56, 16  ;;  %v6952_v2 = vld [vmem:[%s7635_s25 + $0x38] sm:$0xff] }
  0xc9   : > { %v2548_v6 = vrot.slane %v2546_v58, 1  ;;  %v6984_v58 = vld [vmem:[%s7635_s25 + $0x58] sm:$0xff] }
  0xca   : > { %v2535_v17 = vsel %vm2482_vm2, %v2525_v43, %v2534_v9 }
  0xd0   : > { %v7698_v20 = vpop.f32.mrf.mxu1 }
  0xd3   : > { %v7702_v23 = vpop.f32.mrf.mxu0  ;;  %1051 = vmatmul.bf16.gmra.mxu1 %v819_v21  ;;  %1572 = vmatmul.bf16.gmra.mxu2 %v1448_v22  ;;  %v2537_v21 = vshrl.u32 %v7009_v18, 16  ;;  %v2540_v22 = vshll.u32 %v7009_v18, 16 }
  0xd5   : > { %2107 = vmatmul.bf16.gmra.mxu3 %v1974_v42  ;;  %v2539_v34 = vrot.slane %v2537_v21, 1  ;;  %v2542_v36 = vrot.slane %v2540_v22, 2 }
  0xd6   : > { %2767 = vmatmul.bf16.gmra.mxu0 %v2517_v24  ;;  %v7707_v29 = vpop.f32.mrf.mxu2 }
  0xd7   : > { %v2543_v42 = vor.u32 %v2542_v36, %v2539_v34  ;;  %v7086_v34 = vld [vmem:[#allocation6 + $0x1a0] sm:$0xff] }
  0xd8   : > { %v7709_v30 = vpop.f32.mrf.mxu1  ;;  %v7722_v48 = vpop.f32.mrf.mxu3  ;;  %v7115_v36 = vld [vmem:[#allocation6 + $0x1e0] sm:$0xff]  ;;  %3793 = vmatpush.bf16.msra.mxu2 %v7086_v34 }
  0xd9   : > { %9023 = vst [vmem:[#allocation12_spill] sm:$0xff] %v7722_v48  ;;  %v2544_v53 = vsel %vm2482_vm2, %v2534_v9, %v2543_v42  ;;  %v846_v9 = vor.u32 %v844_v63, %v842_v39  ;;  %4468 = vmatpush.bf16.msra.mxu3 %v7115_v36  ;;  %v6986_v48 = vld [vmem:[%s7635_s25 + $0x68] sm:$0xff] }
  0xdb   : > { %v7713_v35 = vpop.f32.mrf.mxu0 }
  0xde   : > { %v7716_v44 = vpop.f32.mrf.mxu2 }
  0xe0   : > { %v7718_v45 = vpop.f32.mrf.mxu1  ;;  %v7734_v61 = vpop.f32.mrf.mxu3 }
  0xe1   : > { %9024 = vst [vmem:[#allocation13_spill] sm:$0xff] %v7734_v61 }
  0xe3   : > { %v7724_v49 = vpop.f32.mrf.mxu0  ;;  %1056 = vmatmul.bf16.gmra.mxu1 %v827_v46  ;;  %1577 = vmatmul.bf16.gmra.mxu2 %v1450_v47  ;;  %v843_v47 = vsel %vm791_vm1, %v838_v38, %v842_v39  ;;  %v7057_v38 = vld [vmem:[#allocation6 + $0x160] sm:$0xff]  ;;  %v2555_v39 = vshrl.u32 %v7011_v32, 16 }
  0xe4   : > { %3273 = vmatpush.bf16.msra.mxu1 %v7057_v38  ;;  %v7012_v38 = vld [vmem:[%s7635_s25 + $0x50] sm:$0xff] }
  0xe5   : > { %2112 = vmatmul.bf16.gmra.mxu3 %v1976_v8  ;;  %v1979_v8 = vrot.slane %v6983_v4, 1  ;;  %v2557_v63 = vrot.slane %v2555_v39, 1  ;;  %v1981_v4 = vrot.slane %v6984_v58, 1  ;;  %v2564_v39 = vshrl.u32 %v7012_v38, 16  ;;  %v6954_v58 = vld [vmem:[%s7635_s25 + $0x48] sm:$0xff] }
  0xe6   : > { %2772 = vmatmul.bf16.gmra.mxu0 %v2526_v50  ;;  %v7729_v55 = vpop.f32.mrf.mxu2  ;;  %v1454_v50 = vsel %vm1441_vm0, %v1451_v7, %v1453_v40  ;;  %v2551_v7 = vrot.slane %v2549_v59, 2 }
  0xe7   : > { %v1980_v15 = vsel %vm1441_vm0, %v1977_v37, %v1979_v8  ;;  %v6924_v37 = vld [vmem:[%s7635_s25 + $0x40] sm:$0xff] }
  0xe8   : > { %v7731_v57 = vpop.f32.mrf.mxu1  ;;  %v7746_v14 = vpop.f32.mrf.mxu3 }
  0xe9   : > { %9025 = vst [vmem:[#allocation14_spill] sm:$0xff] %v7746_v14 }
  0xeb   : > { %v7737_v0 = vpop.f32.mrf.mxu0 }
  0xee   : > { %v7740_v10 = vpop.f32.mrf.mxu2 }
  0xf0   : > { %v7742_v11 = vpop.f32.mrf.mxu1  ;;  %v7758_v31 = vpop.f32.mrf.mxu3 }
  0xf1   : > { %9026 = vst [vmem:[#allocation15_spill] sm:$0xff] %v7758_v31 }
  0xf3   : > { %v7748_v16 = vpop.f32.mrf.mxu0  ;;  %1061 = vmatmul.bf16.gmra.mxu1 %v835_v12  ;;  %1582 = vmatmul.bf16.gmra.mxu2 %v1452_v13  ;;  %v850_v12 = vrot.slane %v848_v1, 1  ;;  %v1455_v13 = vrot.slane %v6952_v2, 1  ;;  %v7144_v2 = vld [vmem:[#allocation6 + $0x220] sm:$0xff] }
  0xf4   : > { %4989 = vmatpush.bf16.msra.mxu0 %v7144_v2 }
  0xf5   : > { %2117 = vmatmul.bf16.gmra.mxu3 %v1978_v41  ;;  %v851_v21 = vsel %vm791_vm1, %v846_v9, %v850_v12  ;;  %v1456_v22 = vsel %vm1441_vm0, %v1453_v40, %v1455_v13  ;;  %v2558_v41 = vshll.u32 %v7011_v32, 16 }
  0xf6   : > { %2777 = vmatmul.bf16.gmra.mxu0 %v2535_v17  ;;  %v7753_v24 = vpop.f32.mrf.mxu2  ;;  %v2552_v17 = vor.u32 %v2551_v7, %v2548_v6 }
  0xf7   : > { %v2560_v1 = vrot.slane %v2558_v41, 2  ;;  %v2567_v41 = vshll.u32 %v7012_v38, 16 }
  0xf8   : > { %v7755_v25 = vpop.f32.mrf.mxu1  ;;  %v7770_v51 = vpop.f32.mrf.mxu3  ;;  %v2553_v28 = vsel %vm2482_vm2, %v2543_v42, %v2552_v17  ;;  %v852_v42 = vshrl.u32 %v6923_v56, 16 }
  0xf9   : > { %9027 = vst [vmem:[#allocation16_spill] sm:$0xff] %v7770_v51  ;;  %v2561_v56 = vor.u32 %v2560_v1, %v2557_v63  ;;  %v6985_v1 = vld [vmem:[%s7635_s25 + $0x60] sm:$0xff] }
  0xfa   : > { %v854_v6 = vor.u32 %v852_v42, %v850_v12 }
  0xfb   : > { %v7761_v33 = vpop.f32.mrf.mxu0  ;;  %v2562_v36 = vsel %vm2482_vm2, %v2552_v17, %v2561_v56  ;;  %v2566_v17 = vrot.slane %v2564_v39, 1 }
  0xfe   : > { %v7764_v43 = vpop.f32.mrf.mxu2 }
 0x100   : > { %v7766_v46 = vpop.f32.mrf.mxu1  ;;  %v7782_v3 = vpop.f32.mrf.mxu3 }
 0x101   : > { %9028 = vst [vmem:[#allocation17_spill] sm:$0xff] %v7782_v3 }
 0x103   : > { %v7772_v52 = vpop.f32.mrf.mxu0  ;;  %1066 = vmatmul.bf16.gmra.mxu1 %v843_v47  ;;  %1587 = vmatmul.bf16.gmra.mxu2 %v1454_v50  ;;  %v856_v50 = vshll.u32 %v6924_v37, 16 }
 0x105   : > { %2122 = vmatmul.bf16.gmra.mxu3 %v1980_v15  ;;  %v858_v7 = vrot.slane %v856_v50, 1  ;;  %v1982_v15 = vsel %vm1441_vm0, %v1979_v8, %v1981_v4  ;;  %v6925_v8 = vld [vmem:[%s7635_s25 + $0x48] sm:$0xff] }
 0x106   : > { %2782 = vmatmul.bf16.gmra.mxu0 %v2544_v53  ;;  %v7777_v60 = vpop.f32.mrf.mxu2  ;;  %v6953_v53 = vld [vmem:[%s7635_s25 + $0x40] sm:$0xff] }
 0x107   : > { %v1457_v9 = vrot.slane %v6953_v53, 1  ;;  %v860_v53 = vshrl.u32 %v6924_v37, 16 }
 0x108   : > { %v7779_v62 = vpop.f32.mrf.mxu1  ;;  %v7794_v26 = vpop.f32.mrf.mxu3 }
 0x109   : > { %v1458_v32 = vsel %vm1441_vm0, %v1455_v13, %v1457_v9  ;;  %v864_v13 = vshll.u32 %v6925_v8, 16 }
 0x10b   : > { %v7785_v5 = vpop.f32.mrf.mxu0 }
 0x10e   : > { %v7788_v18 = vpop.f32.mrf.mxu2 }
 0x110   : > { %v7790_v19 = vpop.f32.mrf.mxu1  ;;  %v7806_v54 = vpop.f32.mrf.mxu3 }
 0x113   : > { %v7796_v27 = vpop.f32.mrf.mxu0  ;;  %1071 = vmatmul.bf16.gmra.mxu1 %v851_v21  ;;  %1592 = vmatmul.bf16.gmra.mxu2 %v1456_v22 }
 0x115   : > { %2127 = vmatmul.bf16.gmra.mxu3 %v1982_v15  ;;  %v1983_v15 = vrot.slane %v6985_v1, 1 }
 0x116   : > { %2787 = vmatmul.bf16.gmra.mxu0 %v2553_v28  ;;  %v7801_v40 = vpop.f32.mrf.mxu2  ;;  %v859_v28 = vsel %vm791_vm1, %v854_v6, %v858_v7  ;;  %v2569_v6 = vrot.slane %v2567_v41, 2  ;;  %v7013_v41 = vld [vmem:[%s7635_s25 + $0x58] sm:$0xff] }
 0x117   : > { %9029 = vst [vmem:[#allocation18_spill] sm:$0xff] %v7801_v40  ;;  %v1984_v38 = vsel %vm1441_vm0, %v1981_v4, %v1983_v15  ;;  %v7845_v4 = vld [vmem:[%s7635_s25 + $0x50] sm:$0xff] }
 0x118   : > { %v7803_v47 = vpop.f32.mrf.mxu1  ;;  %v7818_v34 = vpop.f32.mrf.mxu3  ;;  %v2570_v3 = vor.u32 %v2569_v6, %v2566_v17  ;;  %v868_v6 = vshrl.u32 %v6925_v8, 16 }
 0x11b   : > { %v7809_v59 = vpop.f32.mrf.mxu0 }
 0x11e   : > { %v7812_v21 = vpop.f32.mrf.mxu2 }
 0x11f   : > { %9030 = vst [vmem:[#allocation19_spill] sm:$0xff] %v7812_v21 }
 0x120   : > { %v7814_v22 = vpop.f32.mrf.mxu1  ;;  %v7830_v63 = vpop.f32.mrf.mxu3 }
 0x123   : > { %v7820_v12 = vpop.f32.mrf.mxu0  ;;  %1076 = vmatmul.bf16.gmra.mxu1 %v859_v28  ;;  %1597 = vmatmul.bf16.gmra.mxu2 %v1458_v32  ;;  %v862_v28 = vor.u32 %v860_v53, %v858_v7  ;;  %v866_v32 = vrot.slane %v864_v13, 1  ;;  %v2571_v7 = vsel %vm2482_vm2, %v2561_v56, %v2570_v3  ;;  %v2573_v13 = vshrl.u32 %v7013_v41, 16 }
 0x125   : > { %2132 = vmatmul.bf16.gmra.mxu3 %v1984_v38  ;;  %v867_v31 = vsel %vm791_vm1, %v862_v28, %v866_v32  ;;  %v872_v28 = vshll.u32 %v7845_v4, 16  ;;  %v7850_v38 = vld [vmem:[%s7635_s25 + $0x50] sm:$0xff]  ;;  %v870_v8 = vor.u32 %v868_v6, %v866_v32 }
 0x126   : > { %2792 = vmatmul.bf16.gmra.mxu0 %v2562_v36  ;;  %v7825_v42 = vpop.f32.mrf.mxu2  ;;  %v1459_v36 = vrot.slane %v6954_v58, 1  ;;  %v2576_v58 = vshll.u32 %v7013_v41, 16 }
 0x127   : > { %9031 = vst [vmem:[#allocation20_spill] sm:$0xff] %v7825_v42  ;;  %v7085_v42 = vld [vmem:[#allocation6 + $0x198] sm:$0xff] }
 0x128   : > { %v7827_v50 = vpop.f32.mrf.mxu1  ;;  %v1460_v14 = vsel %vm1441_vm0, %v1457_v9, %v1459_v36  ;;  %v7840_v61 = vpop.f32.mrf.mxu3  ;;  %3794 = vmatpush.bf16.msra.mxu2 %v7085_v42 }
 0x12b   : > { %v7833_v2 = vpop.f32.mrf.mxu0 }
 0x12e   : > { %v7836_v37 = vpop.f32.mrf.mxu2 }
 0x12f   : > { %9032 = vst [vmem:[#allocation21_spill] sm:$0xff] %v7836_v37  ;;  %v2578_v37 = vrot.slane %v2576_v58, 2 }
 0x130   : > { %v1042_v51 = vpop.f32.mrf.mxu1  ;;  %v7852_v56 = vpop.f32.mrf.mxu3 }
 0x131   : > { %v1189_v53 = vadd.f32 %v1042_v51, %v7702_v23  ;;  %v7114_v23 = vld [vmem:[#allocation6 + $0x1d8] sm:$0xff]  ;;  %v1985_v51 = vrot.slane %v6986_v48, 1 }
 0x132   : > { %4469 = vmatpush.bf16.msra.mxu3 %v7114_v23 }
 0x133   : > { %v2758_v39 = vpop.f32.mrf.mxu0  ;;  %1081 = vmatmul.bf16.gmra.mxu1 %v867_v31  ;;  %1602 = vmatmul.bf16.gmra.mxu2 %v1460_v14  ;;  %v1986_v21 = vsel %vm1441_vm0, %v1983_v15, %v1985_v51  ;;  %v7014_v15 = vld [vmem:[%s7635_s25 + $0x60] sm:$0xff] }
 0x135   : > { %2137 = vmatmul.bf16.gmra.mxu3 %v1986_v21  ;;  %v7143_v21 = vld [vmem:[#allocation6 + $0x218] sm:$0xff] }
 0x136   : > { %2797 = vmatmul.bf16.gmra.mxu0 %v2571_v7  ;;  %v1563_v1 = vpop.f32.mrf.mxu2  ;;  %v2575_v7 = vrot.slane %v2573_v13, 1 }
 0x137   : > { %v1710_v17 = vadd.f32 %v1563_v1, %v1189_v53  ;;  %v874_v53 = vrot.slane %v872_v28, 1  ;;  %v1461_v1 = vrot.slane %v7850_v38, 1  ;;  %v7056_v38 = vld [vmem:[#allocation6 + $0x158] sm:$0xff]  ;;  %4990 = vmatpush.bf16.msra.mxu0 %v7143_v21 }
 0x138   : > { %v1044_v9 = vpop.f32.mrf.mxu1  ;;  %3274 = vmatpush.bf16.msra.mxu1 %v7056_v38 }
 0x139   : > { %v2230_v14 = vadd.f32 %v7794_v26, %v1710_v17  ;;  %v1190_v40 = vadd.f32 %v1044_v9, %v7713_v35  ;;  %v2579_v26 = vor.u32 %v2578_v37, %v2575_v7  ;;  %v875_v48 = vsel %vm791_vm1, %v870_v8, %v874_v53  ;;  %v6956_v8 = vld [vmem:[%s7635_s25 + $0x58] sm:$0xff] }
 0x13a   : > { %v1462_v42 = vsel %vm1441_vm0, %v1459_v36, %v1461_v1  ;;  %v2582_v37 = vshrl.u32 %v7014_v15, 16  ;;  %v2585_v9 = vshll.u32 %v7014_v15, 16  ;;  %v876_v7 = vshrl.u32 %v7845_v4, 16 }
 0x13b   : > { %v2760_v31 = vpop.f32.mrf.mxu0  ;;  %v7856_v41 = vadd.f32 %v2758_v39, %v2230_v14  ;;  %v7863_v39 = vpop.f32.mrf.mxu3  ;;  %v2580_v28 = vsel %vm2482_vm2, %v2570_v3, %v2579_v26  ;;  %v1463_v38 = vrot.slane %v6956_v8, 1 }
 0x13e   : > { %v1565_v13 = vpop.f32.mrf.mxu2 }
 0x13f   : > { %v1711_v58 = vadd.f32 %v1565_v13, %v1190_v40  ;;  %v6927_v40 = vld [vmem:[%s7635_s25 + $0x58] sm:$0xff] }
 0x140   : > { %v1047_v17 = vpop.f32.mrf.mxu1  ;;  %v880_v23 = vshll.u32 %v6927_v40, 16 }
 0x141   : > { %v2231_v32 = vadd.f32 %v7806_v54, %v1711_v58  ;;  %v1191_v36 = vadd.f32 %v1047_v17, %v7724_v49  ;;  %v878_v17 = vor.u32 %v876_v7, %v874_v53  ;;  %v7015_v7 = vld [vmem:[%s7635_s25 + $0x68] sm:$0xff] }
 0x142   : > { %v882_v15 = vrot.slane %v880_v23, 1  ;;  %v2594_v8 = vshll.u32 %v7015_v7, 16 }
 0x143   : > { %v2763_v6 = vpop.f32.mrf.mxu0  ;;  %1086 = vmatmul.bf16.gmra.mxu1 %v875_v48  ;;  %1607 = vmatmul.bf16.gmra.mxu2 %v1462_v42  ;;  %v7868_v35 = vadd.f32 %v2760_v31, %v2231_v32  ;;  %v7874_v13 = vpop.f32.mrf.mxu3  ;;  %v6987_v31 = vld [vmem:[%s7635_s25 + $0x70] sm:$0xff]  ;;  %v2584_v42 = vrot.slane %v2582_v37, 1  ;;  %v2587_v32 = vrot.slane %v2585_v9, 2  ;;  %v1464_v9 = vsel %vm1441_vm0, %v1461_v1, %v1463_v38 }
 0x144   : > { %v883_v37 = vsel %vm791_vm1, %v878_v17, %v882_v15  ;;  %v2591_v1 = vshrl.u32 %v7015_v7, 16  ;;  %v6988_v17 = vld [vmem:[%s7635_s25 + $0x78] sm:$0xff] }
 0x145   : > { %9033 = vst [vmem:[#allocation22_spill] sm:$0xff] %v7868_v35 }
 0x146   : > { %2802 = vmatmul.bf16.gmra.mxu0 %v2580_v28  ;;  %v1568_v54 = vpop.f32.mrf.mxu2  ;;  %v1987_v28 = vrot.slane %v6987_v31, 1 }
 0x147   : > { %v1712_v14 = vadd.f32 %v1568_v54, %v1191_v36  ;;  %v2588_v36 = vor.u32 %v2587_v32, %v2584_v42 }
 0x148   : > { %v1049_v3 = vpop.f32.mrf.mxu1  ;;  %v1988_v21 = vsel %vm1441_vm0, %v1985_v51, %v1987_v28 }
 0x149   : > { %v2232_v58 = vadd.f32 %v7818_v34, %v1712_v14  ;;  %v1192_v4 = vadd.f32 %v1049_v3, %v7737_v0  ;;  %2142 = vmatmul.bf16.gmra.mxu3 %v1988_v21  ;;  %v2589_v51 = vsel %vm2482_vm2, %v2579_v26, %v2588_v36  ;;  %v7892_v3 = vld [vmem:[%s7635_s25 + $0x60] sm:$0xff] }
 0x14a   : > { %v888_v42 = vshll.u32 %v7892_v3, 16  ;;  %v7897_v26 = vld [vmem:[%s7635_s25 + $0x60] sm:$0xff] }
 0x14b   : > { %v2765_v48 = vpop.f32.mrf.mxu0  ;;  %v7878_v49 = vadd.f32 %v2763_v6, %v2232_v58  ;;  %v7884_v6 = vpop.f32.mrf.mxu3 }
 0x14e   : > { %v1570_v54 = vpop.f32.mrf.mxu2 }
 0x14f   : > { %v1713_v35 = vadd.f32 %v1570_v54, %v1192_v4  ;;  %v2593_v4 = vrot.slane %v2591_v1, 1  ;;  %v2596_v54 = vrot.slane %v2594_v8, 2 }
 0x150   : > { %v1052_v34 = vpop.f32.mrf.mxu1 }
 0x151   : > { %v2233_v53 = vadd.f32 %v7830_v63, %v1713_v35  ;;  %v1193_v23 = vadd.f32 %v1052_v34, %v7748_v16  ;;  %v884_v35 = vshrl.u32 %v6927_v40, 16  ;;  %v1465_v40 = vrot.slane %v7897_v26, 1 }
 0x152   : > { %v2597_v7 = vor.u32 %v2596_v54, %v2593_v4 }
 0x153   : > { %v2768_v14 = vpop.f32.mrf.mxu0  ;;  %1091 = vmatmul.bf16.gmra.mxu1 %v883_v37  ;;  %1612 = vmatmul.bf16.gmra.mxu2 %v1464_v9  ;;  %v7889_v0 = vadd.f32 %v2765_v48, %v2233_v53  ;;  %v7899_v32 = vpop.f32.mrf.mxu3  ;;  %v1989_v37 = vrot.slane %v6988_v17, 1  ;;  %v886_v34 = vor.u32 %v884_v35, %v882_v15  ;;  %v890_v9 = vrot.slane %v888_v42, 1  ;;  %v7084_v42 = vld [vmem:[#allocation6 + $0x190] sm:$0xff] }
 0x154   : > { %v2598_v35 = vsel %vm2482_vm2, %v2588_v36, %v2597_v7  ;;  %3795 = vmatpush.bf16.msra.mxu2 %v7084_v42  ;;  %v892_v36 = vshrl.u32 %v7892_v3, 16 }
 0x155   : > { %v1990_v53 = vsel %vm1441_vm0, %v1987_v28, %v1989_v37  ;;  %v891_v1 = vsel %vm791_vm1, %v886_v34, %v890_v9  ;;  %v7016_v28 = vld [vmem:[%s7635_s25 + $0x70] sm:$0xff]  ;;  %v7924_v34 = vld [vmem:[%s7635_s25 + $0x68] sm:$0xff] }
 0x156   : > { %2807 = vmatmul.bf16.gmra.mxu0 %v2589_v51  ;;  %v1573_v31 = vpop.f32.mrf.mxu2  ;;  %v2600_v26 = vshrl.u32 %v7016_v28, 16  ;;  %v2603_v17 = vshll.u32 %v7016_v28, 16  ;;  %v894_v3 = vor.u32 %v892_v36, %v890_v9  ;;  %v1467_v28 = vrot.slane %v7924_v34, 1  ;;  %v6930_v34 = vld [vmem:[%s7635_s25 + $0x70] sm:$0xff] }
 0x157   : > { %v1714_v58 = vadd.f32 %v1573_v31, %v1193_v23 }
 0x158   : > { %v1054_v63 = vpop.f32.mrf.mxu1 }
 0x159   : > { %v2234_v48 = vadd.f32 %v7840_v61, %v1714_v58  ;;  %v1194_v51 = vadd.f32 %v1054_v63, %v7761_v33  ;;  %2147 = vmatmul.bf16.gmra.mxu3 %v1990_v53  ;;  %v7918_v63 = vld [vmem:[%s7635_s25 + $0x68] sm:$0xff]  ;;  %v6989_v53 = vld [vmem:[%s7635_s25 + $0x80] sm:$0xff] }
 0x15a   : > { %v896_v54 = vshll.u32 %v7918_v63, 16 }
 0x15b   : > { %v2770_v21 = vpop.f32.mrf.mxu0  ;;  %v7903_v16 = vadd.f32 %v2768_v14, %v2234_v48  ;;  %v1466_v14 = vsel %vm1441_vm0, %v1463_v38, %v1465_v40  ;;  %v7910_v8 = vpop.f32.mrf.mxu3 }
 0x15e   : > { %v1575_v23 = vpop.f32.mrf.mxu2 }
 0x15f   : > { %v1715_v61 = vadd.f32 %v1575_v23, %v1194_v51 }
 0x160   : > { %v1057_v31 = vpop.f32.mrf.mxu1 }
 0x161   : > { %v2235_v15 = vadd.f32 %v7852_v56, %v1715_v61  ;;  %v1195_v38 = vadd.f32 %v1057_v31, %v7772_v52  ;;  %v2602_v61 = vrot.slane %v2600_v26, 1  ;;  %v2605_v52 = vrot.slane %v2603_v17, 2  ;;  %v7113_v31 = vld [vmem:[#allocation6 + $0x1d0] sm:$0xff] }
 0x162   : > { %4470 = vmatpush.bf16.msra.mxu3 %v7113_v31 }
 0x163   : > { %v2773_v58 = vpop.f32.mrf.mxu0  ;;  %1096 = vmatmul.bf16.gmra.mxu1 %v891_v1  ;;  %1617 = vmatmul.bf16.gmra.mxu2 %v1466_v14  ;;  %v7915_v33 = vadd.f32 %v2770_v21, %v2235_v15  ;;  %v7926_v21 = vpop.f32.mrf.mxu3  ;;  %v7055_v1 = vld [vmem:[#allocation6 + $0x150] sm:$0xff]  ;;  %v1991_v14 = vrot.slane %v6989_v53, 1 }
 0x164   : > { %3275 = vmatpush.bf16.msra.mxu1 %v7055_v1  ;;  %v904_v1 = vshll.u32 %v6930_v34, 16 }
 0x165   : > { %v1992_v42 = vsel %vm1441_vm0, %v1989_v37, %v1991_v14  ;;  %v7017_v37 = vld [vmem:[%s7635_s25 + $0x78] sm:$0xff] }
 0x166   : > { %2812 = vmatmul.bf16.gmra.mxu0 %v2598_v35  ;;  %v1578_v48 = vpop.f32.mrf.mxu2  ;;  %v898_v35 = vrot.slane %v896_v54, 1 }
 0x167   : > { %v1716_v56 = vadd.f32 %v1578_v48, %v1195_v38 }
 0x168   : > { %v1059_v4 = vpop.f32.mrf.mxu1 }
 0x169   : > { %v2236_v51 = vadd.f32 %v7863_v39, %v1716_v56  ;;  %v1196_v38 = vadd.f32 %v1059_v4, %v7785_v5  ;;  %v2606_v39 = vor.u32 %v2605_v52, %v2602_v61  ;;  %2152 = vmatmul.bf16.gmra.mxu3 %v1992_v42  ;;  %v899_v56 = vsel %vm791_vm1, %v894_v3, %v898_v35  ;;  %v7142_v5 = vld [vmem:[#allocation6 + $0x210] sm:$0xff] }
 0x16a   : > { %v2612_v61 = vshll.u32 %v7017_v37, 16  ;;  %4991 = vmatpush.bf16.msra.mxu0 %v7142_v5  ;;  %v6959_v3 = vld [vmem:[%s7635_s25 + $0x70] sm:$0xff] }
 0x16b   : > { %v2775_v23 = vpop.f32.mrf.mxu0  ;;  %v7930_v15 = vadd.f32 %v2773_v58, %v2236_v51  ;;  %v1468_v58 = vsel %vm1441_vm0, %v1465_v40, %v1467_v28  ;;  %v7937_v53 = vpop.f32.mrf.mxu3  ;;  %v2607_v54 = vsel %vm2482_vm2, %v2597_v7, %v2606_v39  ;;  %v2609_v40 = vshrl.u32 %v7017_v37, 16 }
 0x16c   : > { %v900_v7 = vshrl.u32 %v7918_v63, 16 }
 0x16e   : > { %v1580_v26 = vpop.f32.mrf.mxu2 }
 0x16f   : > { %v1717_v17 = vadd.f32 %v1580_v26, %v1196_v38  ;;  %v6990_v38 = vld [vmem:[%s7635_s25 + $0x88] sm:$0xff] }
 0x170   : > { %v1062_v48 = vpop.f32.mrf.mxu1 }
 0x171   : > { %v2237_v9 = vadd.f32 %v7874_v13, %v1717_v17  ;;  %v1197_v51 = vadd.f32 %v1062_v48, %v7796_v27  ;;  %v2611_v17 = vrot.slane %v2609_v40, 1  ;;  %v902_v48 = vor.u32 %v900_v7, %v898_v35  ;;  %v7018_v7 = vld [vmem:[%s7635_s25 + $0x80] sm:$0xff] }
 0x173   : > { %v2778_v36 = vpop.f32.mrf.mxu0  ;;  %1101 = vmatmul.bf16.gmra.mxu1 %v899_v56  ;;  %1622 = vmatmul.bf16.gmra.mxu2 %v1468_v58  ;;  %v7942_v4 = vadd.f32 %v2775_v23, %v2237_v9  ;;  %v7948_v42 = vpop.f32.mrf.mxu3  ;;  %v2614_v56 = vrot.slane %v2612_v61, 2  ;;  %v1993_v58 = vrot.slane %v6990_v38, 1  ;;  %v906_v9 = vrot.slane %v904_v1, 1 }
 0x175   : > { %v1994_v37 = vsel %vm1441_vm0, %v1991_v14, %v1993_v58  ;;  %v2615_v5 = vor.u32 %v2614_v56, %v2611_v17  ;;  %v907_v40 = vsel %vm791_vm1, %v902_v48, %v906_v9  ;;  %v908_v17 = vshrl.u32 %v6930_v34, 16 }
 0x176   : > { %2817 = vmatmul.bf16.gmra.mxu0 %v2607_v54  ;;  %v1583_v52 = vpop.f32.mrf.mxu2  ;;  %v1469_v54 = vrot.slane %v6959_v3, 1  ;;  %v2621_v3 = vshll.u32 %v7018_v7, 16 }
 0x177   : > { %v1718_v13 = vadd.f32 %v1583_v52, %v1197_v51  ;;  %v2616_v14 = vsel %vm2482_vm2, %v2606_v39, %v2615_v5  ;;  %v7971_v39 = vld [vmem:[%s7635_s25 + $0x78] sm:$0xff] }
 0x178   : > { %v1064_v31 = vpop.f32.mrf.mxu1  ;;  %v1470_v61 = vsel %vm1441_vm0, %v1467_v28, %v1469_v54  ;;  %v2618_v28 = vshrl.u32 %v7018_v7, 16  ;;  %v1471_v34 = vrot.slane %v7971_v39, 1 }
 0x179   : > { %v2238_v23 = vadd.f32 %v7884_v6, %v1718_v13  ;;  %v1198_v63 = vadd.f32 %v1064_v31, %v7809_v59  ;;  %2157 = vmatmul.bf16.gmra.mxu3 %v1994_v37  ;;  %v7966_v31 = vld [vmem:[%s7635_s25 + $0x78] sm:$0xff]  ;;  %v6991_v37 = vld [vmem:[%s7635_s25 + $0x90] sm:$0xff] }
 0x17a   : > { %v912_v56 = vshll.u32 %v7966_v31, 16 }
 0x17b   : > { %v2780_v26 = vpop.f32.mrf.mxu0  ;;  %v7952_v27 = vadd.f32 %v2778_v36, %v2238_v23  ;;  %v7958_v36 = vpop.f32.mrf.mxu3 }
 0x17e   : > { %v1585_v51 = vpop.f32.mrf.mxu2 }
 0x17f   : > { %v1719_v52 = vadd.f32 %v1585_v51, %v1198_v63  ;;  %v2620_v51 = vrot.slane %v2618_v28, 1 }
 0x180   : > { %v1067_v6 = vpop.f32.mrf.mxu1 }
 0x181   : > { %v2239_v35 = vadd.f32 %v7899_v32, %v1719_v52  ;;  %v1199_v1 = vadd.f32 %v1067_v6, %v7820_v12  ;;  %v2623_v52 = vrot.slane %v2621_v3, 2  ;;  %v910_v6 = vor.u32 %v908_v17, %v906_v9 }
 0x183   : > { %v2783_v13 = vpop.f32.mrf.mxu0  ;;  %1106 = vmatmul.bf16.gmra.mxu1 %v907_v40  ;;  %1627 = vmatmul.bf16.gmra.mxu2 %v1470_v61  ;;  %v7963_v59 = vadd.f32 %v2780_v26, %v2239_v35  ;;  %v7973_v48 = vpop.f32.mrf.mxu3  ;;  %v1995_v40 = vrot.slane %v6991_v37, 1  ;;  %v914_v61 = vrot.slane %v912_v56, 1  ;;  %v2624_v7 = vor.u32 %v2623_v52, %v2620_v51  ;;  %v7083_v56 = vld [vmem:[#allocation6 + $0x188] sm:$0xff]  ;;  %v7992_v37 = vld [vmem:[%s7635_s25 + $0x80] sm:$0xff] }
 0x184   : > { %3796 = vmatpush.bf16.msra.mxu2 %v7083_v56 }
 0x185   : > { %v1996_v35 = vsel %vm1441_vm0, %v1993_v58, %v1995_v40  ;;  %v915_v28 = vsel %vm791_vm1, %v910_v6, %v914_v61  ;;  %v2625_v17 = vsel %vm2482_vm2, %v2615_v5, %v2624_v7  ;;  %v7019_v58 = vld [vmem:[%s7635_s25 + $0x88] sm:$0xff]  ;;  %v916_v6 = vshrl.u32 %v7966_v31, 16 }
 0x186   : > { %2822 = vmatmul.bf16.gmra.mxu0 %v2616_v14  ;;  %v1588_v38 = vpop.f32.mrf.mxu2 }
 0x187   : > { %v1720_v23 = vadd.f32 %v1588_v38, %v1199_v1 }
 0x188   : > { %v1069_v32 = vpop.f32.mrf.mxu1 }
 0x189   : > { %v2240_v26 = vadd.f32 %v7910_v8, %v1720_v23  ;;  %v1200_v14 = vadd.f32 %v1069_v32, %v7833_v2  ;;  %2162 = vmatmul.bf16.gmra.mxu3 %v1996_v35  ;;  %v7112_v2 = vld [vmem:[#allocation6 + $0x1c8] sm:$0xff]  ;;  %v920_v35 = vshll.u32 %v7992_v37, 16 }
 0x18a   : > { %v7054_v32 = vld [vmem:[#allocation6 + $0x148] sm:$0xff]  ;;  %4471 = vmatpush.bf16.msra.mxu3 %v7112_v2 }
 0x18b   : > { %v2785_v63 = vpop.f32.mrf.mxu0  ;;  %v7977_v12 = vadd.f32 %v2783_v13, %v2240_v26  ;;  %v1472_v13 = vsel %vm1441_vm0, %v1469_v54, %v1471_v34  ;;  %v7984_v3 = vpop.f32.mrf.mxu3  ;;  %v2630_v26 = vshll.u32 %v7019_v58, 16  ;;  %3276 = vmatpush.bf16.msra.mxu1 %v7054_v32  ;;  %v922_v31 = vrot.slane %v920_v35, 1  ;;  %v7020_v35 = vld [vmem:[%s7635_s25 + $0x90] sm:$0xff] }
 0x18e   : > { %v1590_v1 = vpop.f32.mrf.mxu2 }
 0x18f   : > { %v1721_v38 = vadd.f32 %v1590_v1, %v1200_v14  ;;  %v6992_v1 = vld [vmem:[%s7635_s25 + $0x98] sm:$0xff] }
 0x190   : > { %v1072_v8 = vpop.f32.mrf.mxu1 }
 0x191   : > { %v2241_v9 = vadd.f32 %v7926_v21, %v1721_v38  ;;  %v1201_v54 = vadd.f32 %v1072_v8, %v7698_v20  ;;  %v2627_v21 = vshrl.u32 %v7019_v58, 16  ;;  %v2632_v8 = vrot.slane %v2630_v26, 2 }
 0x192   : > { %v918_v58 = vor.u32 %v916_v6, %v914_v61 }
 0x193   : > { %v2788_v23 = vpop.f32.mrf.mxu0  ;;  %1111 = vmatmul.bf16.gmra.mxu1 %v915_v28  ;;  %1632 = vmatmul.bf16.gmra.mxu2 %v1472_v13  ;;  %v7989_v39 = vadd.f32 %v2785_v63, %v2241_v9  ;;  %v7998_v63 = vld [vmem:[%s7635_s25 + $0x80] sm:$0xff]  ;;  %v8000_v14 = vpop.f32.mrf.mxu3  ;;  %v2629_v20 = vrot.slane %v2627_v21, 1  ;;  %v7141_v13 = vld [vmem:[#allocation6 + $0x208] sm:$0xff]  ;;  %v1997_v9 = vrot.slane %v6992_v1, 1  ;;  %v2639_v1 = vshll.u32 %v7020_v35, 16 }
 0x194   : > { %4992 = vmatpush.bf16.msra.mxu0 %v7141_v13  ;;  %v1473_v56 = vrot.slane %v7998_v63, 1  ;;  %v8025_v13 = vld [vmem:[%s7635_s25 + $0x88] sm:$0xff] }
 0x195   : > { %v1998_v2 = vsel %vm1441_vm0, %v1995_v40, %v1997_v9 }
 0x196   : > { %2827 = vmatmul.bf16.gmra.mxu0 %v2625_v17  ;;  %v1593_v5 = vpop.f32.mrf.mxu2 }
 0x197   : > { %v1722_v51 = vadd.f32 %v1593_v5, %v1201_v54  ;;  %v2633_v54 = vor.u32 %v2632_v8, %v2629_v20  ;;  %v923_v5 = vsel %vm791_vm1, %v918_v58, %v922_v31  ;;  %v924_v8 = vshrl.u32 %v7992_v37, 16 }
 0x198   : > { %v1074_v52 = vpop.f32.mrf.mxu1  ;;  %v1475_v37 = vrot.slane %v8025_v13, 1 }
 0x199   : > { %v2242_v38 = vadd.f32 %v7937_v53, %v1722_v51  ;;  %v1202_v32 = vadd.f32 %v1074_v52, %v7709_v30  ;;  %2167 = vmatmul.bf16.gmra.mxu3 %v1998_v2  ;;  %v2634_v40 = vsel %vm2482_vm2, %v2624_v7, %v2633_v54  ;;  %v8019_v52 = vld [vmem:[%s7635_s25 + $0x88] sm:$0xff] }
 0x19a   : > { %v928_v7 = vshll.u32 %v8019_v52, 16 }
 0x19b   : > { %v2790_v28 = vpop.f32.mrf.mxu0  ;;  %v8004_v17 = vadd.f32 %v2788_v23, %v2242_v38  ;;  %v1474_v23 = vsel %vm1441_vm0, %v1471_v34, %v1473_v56  ;;  %v8011_v51 = vpop.f32.mrf.mxu3  ;;  %v2636_v34 = vshrl.u32 %v7020_v35, 16 }
 0x19e   : > { %v1595_v53 = vpop.f32.mrf.mxu2 }
 0x19f   : > { %v1723_v21 = vadd.f32 %v1595_v53, %v1202_v32  ;;  %v2638_v53 = vrot.slane %v2636_v34, 1 }
 0x1a0   : > { %v1077_v26 = vpop.f32.mrf.mxu1 }
 0x1a1   : > { %v2243_v61 = vadd.f32 %v7948_v42, %v1723_v21  ;;  %v1203_v63 = vadd.f32 %v1077_v26, %v7718_v45  ;;  %v2641_v21 = vrot.slane %v2639_v1, 2 }
 0x1a3   : > { %v2793_v6 = vpop.f32.mrf.mxu0  ;;  %1116 = vmatmul.bf16.gmra.mxu1 %v923_v5  ;;  %1637 = vmatmul.bf16.gmra.mxu2 %v1474_v23  ;;  %v8016_v30 = vadd.f32 %v2790_v28, %v2243_v61  ;;  %v8027_v58 = vpop.f32.mrf.mxu3  ;;  %v6993_v28 = vld [vmem:[%s7635_s25 + $0xa0] sm:$0xff]  ;;  %v926_v5 = vor.u32 %v924_v8, %v922_v31  ;;  %v930_v23 = vrot.slane %v928_v7, 1  ;;  %v2642_v35 = vor.u32 %v2641_v21, %v2638_v53  ;;  %v7021_v8 = vld [vmem:[%s7635_s25 + $0x98] sm:$0xff]  ;;  %v8052_v21 = vld [vmem:[%s7635_s25 + $0x90] sm:$0xff] }
 0x1a4   : > { %v1999_v45 = vrot.slane %v6993_v28, 1  ;;  %v2648_v13 = vshll.u32 %v7021_v8, 16  ;;  %v932_v53 = vshrl.u32 %v8019_v52, 16 }
 0x1a5   : > { %v931_v34 = vsel %vm791_vm1, %v926_v5, %v930_v23 }
 0x1a6   : > { %2832 = vmatmul.bf16.gmra.mxu0 %v2634_v40  ;;  %v1598_v38 = vpop.f32.mrf.mxu2  ;;  %v2000_v61 = vsel %vm1441_vm0, %v1997_v9, %v1999_v45  ;;  %v2643_v9 = vsel %vm2482_vm2, %v2633_v54, %v2642_v35  ;;  %v934_v52 = vor.u32 %v932_v53, %v930_v23 }
 0x1a7   : > { %v1724_v20 = vadd.f32 %v1598_v38, %v1203_v63 }
 0x1a8   : > { %v1079_v42 = vpop.f32.mrf.mxu1 }
 0x1a9   : > { %v2244_v2 = vadd.f32 %v7958_v36, %v1724_v20  ;;  %v1204_v40 = vadd.f32 %v1079_v42, %v7731_v57  ;;  %2172 = vmatmul.bf16.gmra.mxu3 %v2000_v61  ;;  %v8046_v42 = vld [vmem:[%s7635_s25 + $0x90] sm:$0xff] }
 0x1aa   : > { %v936_v54 = vshll.u32 %v8046_v42, 16 }
 0x1ab   : > { %v2795_v32 = vpop.f32.mrf.mxu0  ;;  %v8031_v26 = vadd.f32 %v2793_v6, %v2244_v2  ;;  %v1476_v6 = vsel %vm1441_vm0, %v1473_v56, %v1475_v37  ;;  %v8038_v1 = vpop.f32.mrf.mxu3  ;;  %v2645_v56 = vshrl.u32 %v7021_v8, 16  ;;  %v1477_v8 = vrot.slane %v8052_v21, 1  ;;  %v7022_v21 = vld [vmem:[%s7635_s25 + $0xa0] sm:$0xff] }
 0x1ae   : > { %v1600_v63 = vpop.f32.mrf.mxu2 }
 0x1af   : > { %v1725_v36 = vadd.f32 %v1600_v63, %v1204_v40  ;;  %v2647_v63 = vrot.slane %v2645_v56, 1 }
 0x1b0   : > { %v1082_v38 = vpop.f32.mrf.mxu1 }
 0x1b1   : > { %v2245_v31 = vadd.f32 %v7973_v48, %v1725_v36  ;;  %v1205_v7 = vadd.f32 %v1082_v38, %v7742_v11  ;;  %v2650_v36 = vrot.slane %v2648_v13, 2  ;;  %v7082_v11 = vld [vmem:[#allocation6 + $0x180] sm:$0xff] }
 0x1b2   : > { %v7111_v38 = vld [vmem:[#allocation6 + $0x1c0] sm:$0xff]  ;;  %3797 = vmatpush.bf16.msra.mxu2 %v7082_v11  ;;  %v1836_v11 = vld [vmem:[%s7635_s25 + $0xb0] sm:$0x1] }
 0x1b3   : > { %v2798_v20 = vpop.f32.mrf.mxu0  ;;  %1121 = vmatmul.bf16.gmra.mxu1 %v931_v34  ;;  %1642 = vmatmul.bf16.gmra.mxu2 %v1476_v6  ;;  %v8043_v57 = vadd.f32 %v2795_v32, %v2245_v31  ;;  %v8054_v5 = vpop.f32.mrf.mxu3  ;;  %v6994_v32 = vld [vmem:[%s7635_s25 + $0xa8] sm:$0xff]  ;;  %v7053_v34 = vld [vmem:[#allocation6 + $0x140] sm:$0xff]  ;;  %v2651_v56 = vor.u32 %v2650_v36, %v2647_v63  ;;  %v2654_v63 = vshrl.u32 %v7022_v21, 16  ;;  %v2657_v36 = vshll.u32 %v7022_v21, 16 }
 0x1b4   : > { %v2001_v6 = vrot.slane %v6994_v32, 1  ;;  %4472 = vmatpush.bf16.msra.mxu3 %v7111_v38  ;;  %3277 = vmatpush.bf16.msra.mxu1 %v7053_v34  ;;  %v1939_v38 = vunpack.c.l.b16 %v1836_v11 }
 0x1b6   : > { %2837 = vmatmul.bf16.gmra.mxu0 %v2643_v9  ;;  %v1603_v28 = vpop.f32.mrf.mxu2  ;;  %v938_v9 = vrot.slane %v936_v54, 1 }
 0x1b7   : > { %v1726_v2 = vadd.f32 %v1603_v28, %v1205_v7  ;;  %v2002_v7 = vsel %vm1441_vm0, %v1999_v45, %v2001_v6  ;;  %v2652_v45 = vsel %vm2482_vm2, %v2642_v35, %v2651_v56 }
 0x1b8   : > { %v1084_v48 = vpop.f32.mrf.mxu1  ;;  %v939_v32 = vsel %vm791_vm1, %v934_v52, %v938_v9  ;;  %v940_v52 = vshrl.u32 %v8046_v42, 16 }
 0x1b9   : > { %v2246_v61 = vadd.f32 %v7984_v3, %v1726_v2  ;;  %v1206_v3 = vadd.f32 %v1084_v48, %v7755_v25  ;;  %2177 = vmatmul.bf16.gmra.mxu3 %v2002_v7  ;;  %v7140_v25 = vld [vmem:[#allocation6 + $0x200] sm:$0xff] }
 0x1ba   : > { %4993 = vmatpush.bf16.msra.mxu0 %v7140_v25 }
 0x1bb   : > { %v2800_v40 = vpop.f32.mrf.mxu0  ;;  %v8058_v31 = vadd.f32 %v2798_v20, %v2246_v61  ;;  %v1478_v20 = vsel %vm1441_vm0, %v1475_v37, %v1477_v8  ;;  %v8065_v23 = vpop.f32.mrf.mxu3  ;;  %v8073_v61 = vld [vmem:[%s7635_s25 + $0x98] sm:$0xff] }
 0x1bc   : > { %v944_v7 = vshll.u32 %v8073_v61, 16 }
 0x1be   : > { %v1605_v13 = vpop.f32.mrf.mxu2  ;;  %v946_v21 = vrot.slane %v944_v7, 1  ;;  %v7090_v7 = vld [vmem:[%s7635_s25 + $0x10] sm:$0xf0] }
 0x1bf   : > { %v1727_v28 = vadd.f32 %v1605_v13, %v1206_v3  ;;  %v8080_v3 = vld [vmem:[%s7635_s25 + $0x98] sm:$0xff]  ;;  %v1961_v13 = vpack.c.b16 %v1939_v38, %v1939_v38 }
 0x1c0   : > { %v1087_v2 = vpop.f32.mrf.mxu1  ;;  %v9012_v42 = vrot.slane %v8080_v3, 1 }
 0x1c1   : > { %v2247_v53 = vadd.f32 %v8000_v14, %v1727_v28  ;;  %v1207_v37 = vadd.f32 %v1087_v2, %v7766_v46  ;;  %v2656_v2 = vrot.slane %v2654_v63, 1 }
 0x1c3   : > { %v2803_v54 = vpop.f32.mrf.mxu0  ;;  %1126 = vmatmul.bf16.gmra.mxu1 %v939_v32  ;;  %1647 = vmatmul.bf16.gmra.mxu2 %v1478_v20  ;;  %v8070_v48 = vadd.f32 %v2800_v40, %v2247_v53  ;;  %v8082_v40 = vpop.f32.mrf.mxu3  ;;  %v2659_v32 = vrot.slane %v2657_v36, 2  ;;  %v2003_v20 = vrot.slane %v1961_v13, 1  ;;  %v1480_v36 = vsel %vm1441_vm0, %v1477_v8, %v9012_v42  ;;  %v7091_v8 = vld [vmem:[%s7635_s25 + $0x18] sm:$0xff] }
 0x1c5   : > { %9034 = vst [vmem:[#allocation23_spill] sm:$0xff] %v8070_v48  ;;  %v2004_v25 = vsel %vm1441_vm0, %v2001_v6, %v2003_v20  ;;  %v8090_v11 = vor.u32 %v2659_v32, %v2656_v2 }
 0x1c6   : > { %2842 = vmatmul.bf16.gmra.mxu0 %v2652_v45  ;;  %v1608_v14 = vpop.f32.mrf.mxu2  ;;  %v942_v45 = vor.u32 %v940_v52, %v938_v9  ;;  %v6654_v52 = vld [vmem:[%s7635_s25 + $0x10] sm:$0xc] }
 0x1c7   : > { %v1728_v34 = vadd.f32 %v1608_v14, %v1207_v37  ;;  %v2661_v38 = vsel %vm2482_vm2, %v2651_v56, %v8090_v11 }
 0x1c8   : > { %v1089_v35 = vpop.f32.mrf.mxu1  ;;  %v947_v9 = vsel %vm791_vm1, %v942_v45, %v946_v21 }
 0x1c9   : > { %v2248_v28 = vadd.f32 %v8011_v51, %v1728_v34  ;;  %v1208_v37 = vadd.f32 %v1089_v35, %v7779_v62  ;;  %2182 = vmatmul.bf16.gmra.mxu3 %v2004_v25  ;;  %v7023_v34 = vld [vmem:[%s7635_s25 + $0xa8] sm:$0xff]  ;;  %v8103_v35 = vld [vmem:[%s7635_s25 + $0xa0] sm:$0xff]  ;;  %v4208_v25 = vshrl.u32 %v7091_v8, 16 }
 0x1ca   : > { %v2666_v32 = vshll.u32 %v7023_v34, 16 }
 0x1cb   : > { %v2805_v46 = vpop.f32.mrf.mxu0  ;;  %v8085_v53 = vadd.f32 %v2803_v54, %v2248_v28  ;;  %v6655_v28 = vor.u32 %v7090_v7, %v6654_v52 }
 0x1cc   : > { %v8096_v14 = vpop.f32.mrf.mxu3 }
 0x1cd   : > { %9035 = vst [vmem:[#allocation24_spill] sm:$0xff] %v8085_v53  ;;  %v4200_v45 = vshrl.u32 %v6655_v28, 16  ;;  %v4203_v56 = vshll.u32 %v6655_v28, 16  ;;  %v2668_v28 = vrot.slane %v2666_v32, 2 }
 0x1ce   : > { %v1610_v51 = vpop.f32.mrf.mxu2 }
 0x1cf   : > { %v1729_v63 = vadd.f32 %v1610_v51, %v1208_v37  ;;  %v4211_v37 = vshll.u32 %v7091_v8, 16 }
 0x1d0   : > { %v1092_v54 = vpop.f32.mrf.mxu1 }
 0x1d1   : > { %v2249_v6 = vadd.f32 %v8027_v58, %v1729_v63  ;;  %v1209_v2 = vadd.f32 %v1092_v54, %v7790_v19  ;;  %v2663_v58 = vshrl.u32 %v7023_v34, 16  ;;  %v948_v63 = vshrl.u32 %v8073_v61, 16 }
 0x1d2   : > { %v4205_v19 = vrot.slane %v4203_v56, 3  ;;  %v4210_v54 = vrot.slane %v4208_v25, 2  ;;  %v4213_v34 = vrot.slane %v4211_v37, 3 }
 0x1d3   : > { %v2808_v62 = vpop.f32.mrf.mxu0  ;;  %1131 = vmatmul.bf16.gmra.mxu1 %v947_v9  ;;  %1652 = vmatmul.bf16.gmra.mxu2 %v1480_v36  ;;  %v8107_v13 = vadd.f32 %v2805_v46, %v2249_v6  ;;  %v952_v46 = vshll.u32 %v8103_v35, 16  ;;  %v8114_v36 = vld [vmem:[%s7635_s25 + $0xa0] sm:$0xff]  ;;  %v2665_v8 = vrot.slane %v2663_v58, 1 }
 0x1d4   : > { %v8116_v6 = vpop.f32.mrf.mxu3  ;;  %v1481_v48 = vrot.slane %v8114_v36, 1 }
 0x1d5   : > { %9036 = vst [vmem:[#allocation25_spill] sm:$0xff] %v8107_v13  ;;  %v950_v13 = vor.u32 %v948_v63, %v946_v21  ;;  %v954_v53 = vrot.slane %v952_v46, 1  ;;  %v2669_v25 = vor.u32 %v2668_v28, %v2665_v8  ;;  %v9037_v21 = vrot.slane %v8080_v3, 1 }
 0x1d6   : > { %2847 = vmatmul.bf16.gmra.mxu0 %v2661_v38  ;;  %v1613_v20 = vpop.f32.mrf.mxu2  ;;  %v4202_v38 = vrot.slane %v4200_v45, 2 }
 0x1d7   : > { %v1730_v51 = vadd.f32 %v1613_v20, %v1209_v2  ;;  %v2356_v2 = vld [vmem:[%s7635_s25 + $0xb0] sm:$0x3]  ;;  %v4214_v20 = vor.u32 %v4213_v34, %v4210_v54  ;;  %v1482_v63 = vsel %vm1441_vm0, %v9037_v21, %v1481_v48 }
 0x1d8   : > { %v1094_v9 = vpop.f32.mrf.mxu1  ;;  %v4206_v61 = vor.u32 %v4205_v19, %v4202_v38  ;;  %v2459_v37 = vunpack.c.l.b16 %v2356_v2  ;;  %v1315_v19 = vld [vmem:[%s7635_s25 + $0xa8] sm:$0x1] }
 0x1d9   : > { %v2250_v52 = vadd.f32 %v8038_v1, %v1730_v51  ;;  %v1210_v56 = vadd.f32 %v1094_v9, %v7803_v47  ;;  %v665_v1 = vld [vmem:[%s7635_s25 + $0xa8] sm:$0x1]  ;;  %v2670_v9 = vsel %vm2482_vm2, %v8090_v11, %v2669_v25  ;;  %v1418_v3 = vunpack.c.l.b16 %v1315_v19 }
 0x1da   : > { %v4215_v45 = vsel %vm4198_vm3, %v4206_v61, %v4214_v20  ;;  %v768_v46 = vunpack.c.l.b16 %v665_v1  ;;  %v2481_v54 = vpack.c.b16 %v2459_v37, %v2459_v37  ;;  %v956_v11 = vshrl.u32 %v8103_v35, 16 }
 0x1db   : > { %v2810_v7 = vpop.f32.mrf.mxu0  ;;  %v8120_v42 = vadd.f32 %v2808_v62, %v2250_v52  ;;  %4473 = vmatmul.bf16.vlgmr.msra.gmra.mxu3 %v4215_v45  ;;  %v955_v62 = vsel %vm791_vm1, %v950_v13, %v954_v53  ;;  %v7092_v52 = vld [vmem:[%s7635_s25 + $0x20] sm:$0xff] }
 0x1dc   : > { %v8130_v36 = vpop.f32.mrf.mxu3  ;;  %v790_v13 = vpack.c.b16 %v768_v46, %v768_v46  ;;  %v2672_v28 = vshrl.u32 %v2481_v54, 16  ;;  %v2675_v2 = vshll.u32 %v2481_v54, 16  ;;  %v4220_v45 = vshll.u32 %v7092_v52, 16 }
 0x1de   : > { %v1615_v58 = vpop.f32.mrf.mxu2  ;;  %v960_v37 = vshll.u32 %v790_v13, 16  ;;  %v2674_v46 = vrot.slane %v2672_v28, 1 }
 0x1df   : > { %v1731_v32 = vadd.f32 %v1615_v58, %v1210_v56  ;;  %v1440_v58 = vpack.c.b16 %v1418_v3, %v1418_v3 }
 0x1e0   : > { %v1097_v51 = vpop.f32.mrf.mxu1  ;;  %v962_v19 = vrot.slane %v960_v37, 1 }
 0x1e1   : > { %v2251_v38 = vadd.f32 %v8054_v5, %v1731_v32  ;;  %v1211_v8 = vadd.f32 %v1097_v51, %v7814_v22  ;;  %v4217_v5 = vshrl.u32 %v7092_v52, 16  ;;  %v2677_v22 = vrot.slane %v2675_v2, 2 }
 0x1e2   : > { %v1483_v54 = vrot.slane %v1440_v58, 1  ;;  %v7119_v58 = vld [vmem:[%s7635_s25 + $0x10] sm:$0xf0] }
 0x1e3   : > { %v2813_v47 = vpop.f32.mrf.mxu0  ;;  %1136 = vmatmul.bf16.gmra.mxu1 %v955_v62  ;;  %1657 = vmatmul.bf16.gmra.mxu2 %v1482_v63  ;;  %v8136_v34 = vadd.f32 %v2810_v7, %v2251_v38  ;;  %v4219_v7 = vrot.slane %v4217_v5, 2  ;;  %v4222_v62 = vrot.slane %v4220_v45, 3  ;;  %v2678_v3 = vor.u32 %v2677_v22, %v2674_v46  ;;  %v6422_v5 = vld [vmem:[%s7635_s25 + $0x8] sm:$0xc]  ;;  %v7032_v45 = vld [vmem:[%s7635_s25 + $0x8] sm:$0xf0] }
 0x1e4   : > { %v8141_v32 = vpop.f32.mrf.mxu3  ;;  %v8165_v46 = vld [vmem:[%s7635_s25 + $0x10] sm:$0xff]  ;;  %v8168_v22 = vld [vmem:[%s7635_s25 + $0x18] sm:$0xff] }
 0x1e5   : > { %v4223_v51 = vor.u32 %v4222_v62, %v4219_v7  ;;  %v2679_v2 = vsel %vm2482_vm2, %v2669_v25, %v2678_v3  ;;  %v8174_v3 = vld [vmem:[%s7635_s25 + $0x18] sm:$0xff] }
 0x1e6   : > { %2852 = vmatmul.bf16.gmra.mxu0 %v2670_v9  ;;  %v1618_v61 = vpop.f32.mrf.mxu2  ;;  %v958_v9 = vor.u32 %v956_v11, %v954_v53  ;;  %v1484_v53 = vsel %vm1441_vm0, %v1481_v48, %v1483_v54  ;;  %v6538_v11 = vld [vmem:[%s7635_s25 + $0x10] sm:$0xc] }
 0x1e7   : > { %v1732_v56 = vadd.f32 %v1618_v61, %v1211_v8  ;;  %v4224_v35 = vsel %vm4198_vm3, %v4214_v20, %v4223_v51 }
 0x1e8   : > { %v1099_v1 = vpop.f32.mrf.mxu1 }
 0x1e9   : > { %v2252_v21 = vadd.f32 %v8065_v23, %v1732_v56  ;;  %v1212_v13 = vadd.f32 %v1099_v1, %v7827_v50  ;;  %v7093_v56 = vld [vmem:[%s7635_s25 + $0x28] sm:$0xff]  ;;  %v7061_v1 = vld [vmem:[%s7635_s25 + $0x10] sm:$0xf0] }
 0x1ea   : > { %v4226_v7 = vshrl.u32 %v7093_v56, 16  ;;  %v4229_v25 = vshll.u32 %v7093_v56, 16 }
 0x1eb   : > { %v2815_v63 = vpop.f32.mrf.mxu0  ;;  %v8144_v38 = vadd.f32 %v2813_v47, %v2252_v21  ;;  %4478 = vmatmul.bf16.gmra.mxu3 %v4224_v35  ;;  %v963_v47 = vsel %vm791_vm1, %v958_v9, %v962_v19  ;;  %v6423_v21 = vor.u32 %v7032_v45, %v6422_v5  ;;  %v6539_v9 = vor.u32 %v7061_v1, %v6538_v11 }
 0x1ec   : > { %v8150_v28 = vpop.f32.mrf.mxu3  ;;  %v4228_v54 = vrot.slane %v4226_v7, 2  ;;  %v3679_v5 = vrot.slane %v8168_v22, 2  ;;  %v4875_v11 = vrot.slane %v8174_v3, 3  ;;  %v7063_v3 = vld [vmem:[%s7635_s25 + $0x20] sm:$0xff] }
 0x1ee   : > { %v1620_v52 = vpop.f32.mrf.mxu2 }
 0x1ef   : > { %v1733_v23 = vadd.f32 %v1620_v52, %v1212_v13 }
 0x1f0   : > { %v1102_v8 = vpop.f32.mrf.mxu1 }
 0x1f1   : > { %v2253_v50 = vadd.f32 %v8082_v40, %v1733_v23  ;;  %v1213_v48 = vadd.f32 %v1102_v8, %v7707_v29  ;;  %v6770_v40 = vld [vmem:[%s7635_s25 + $0x10] sm:$0x8]  ;;  %v4231_v29 = vrot.slane %v4229_v25, 3  ;;  %v5356_v23 = vld [vmem:[%s9008_s3] sm:$0xff]  ;;  %v7504_v8 = vmov 0  }
 0x1f2   : > { %v6771_v52 = vor.u32 %v7119_v58, %v6770_v40  ;;  %7364 = vset.pattern.permute.xlu0 %v7504_v8  ;;  %7365 = vset.pattern.permute.xlu1 %v7504_v8 }
 0x1f3   : > { %v2818_v20 = vpop.f32.mrf.mxu0  ;;  %1141 = vmatmul.bf16.gmra.mxu1 %v963_v47  ;;  %1662 = vmatmul.bf16.gmra.mxu2 %v1484_v53  ;;  %v8154_v61 = vadd.f32 %v2815_v63, %v2253_v50  ;;  %v4232_v47 = vor.u32 %v4231_v29, %v4228_v54  ;;  %v3158_v53 = vrot.slane %v6423_v21, 2  ;;  %v5357_v21 = vld [vmem:[%s9008_s3 + $0x8] sm:$0xff] }
 0x1f4   : > { %v8170_v19 = vpop.f32.mrf.mxu3  ;;  %5400 = vperm.xlu0 %7364, %v5356_v23   ;;  %7366 = vset.pattern.permute.xlu2 %v7504_v8 }
 0x1f5   : > { %v4233_v45 = vsel %vm4198_vm3, %v4223_v51, %v4232_v47 }
 0x1f6   : > { %2857 = vmatmul.bf16.gmra.mxu0 %v2679_v2  ;;  %v1623_v37 = vpop.f32.mrf.mxu2  ;;  %v3159_v2 = vrot.slane %v8165_v46, 2 }
 0x1f7   : > { %v1734_v62 = vadd.f32 %v1623_v37, %v1213_v48  ;;  %v4874_v48 = vrot.slane %v6771_v52, 3 }
 0x1f8   : > { %v1104_v63 = vpop.f32.mrf.mxu1  ;;  %v3160_v40 = vsel %vm3157_vm4, %v3158_v53, %v3159_v2 }
 0x1f9   : > { %v2254_v35 = vadd.f32 %v8096_v14, %v1734_v62  ;;  %v3678_v14 = vrot.slane %v6539_v9, 2  ;;  %v1214_v56 = vadd.f32 %v1104_v63, %v7716_v44  ;;  %v4876_v25 = vsel %vm4873_vm5, %v4874_v48, %v4875_v11  ;;  %v7094_v63 = vld [vmem:[%s7635_s25 + $0x30] sm:$0xff] }
 0x1fa   : > { %v4235_v22 = vshrl.u32 %v7094_v63, 16  ;;  %v4238_v9 = vshll.u32 %v7094_v63, 16 }
 0x1fb   : > { %v2820_v13 = vpop.f32.mrf.mxu0  ;;  %v8179_v50 = vadd.f32 %v2818_v20, %v2254_v35  ;;  %4483 = vmatmul.bf16.gmra.mxu3 %v4233_v45  ;;  %v3680_v58 = vsel %vm3157_vm4, %v3678_v14, %v3679_v5  ;;  %v7034_v35 = vld [vmem:[%s7635_s25 + $0x18] sm:$0xff]  ;;  %v7121_v14 = vld [vmem:[%s7635_s25 + $0x20] sm:$0xff] }
 0x1fc   : > { %v8188_v7 = vpop.f32.mrf.mxu3  ;;  %5405 = vperm.xlu0 %7364, %v5357_v21   ;;  %v4240_v23 = vrot.slane %v4238_v9, 3  ;;  %v3161_v48 = vrot.slane %v7034_v35, 2  ;;  %v7064_v35 = vld [vmem:[%s7635_s25 + $0x28] sm:$0xff] }
 0x1fe   : > { %v1625_v1 = vpop.f32.mrf.mxu2 }
 0x1ff   : > { %v1735_v37 = vadd.f32 %v1625_v1, %v1214_v56  ;;  %v3681_v1 = vrot.slane %v7063_v3, 2 }
 0x200   : > { %v1107_v20 = vpop.f32.mrf.mxu1 }
 0x201   : > { %v2255_v51 = vadd.f32 %v8116_v6, %v1735_v37  ;;  %v1215_v46 = vadd.f32 %v1107_v20, %v7729_v55  ;;  %v5358_v55 = vld [vmem:[%s9008_s3 + $0x10] sm:$0xff]  ;;  %v3682_v21 = vsel %vm3157_vm4, %v3679_v5, %v3681_v1  ;;  %v7095_v5 = vld [vmem:[%s7635_s25 + $0x38] sm:$0xff] }
 0x202   : > { %5410 = vperm.xlu1 %7365, %v5358_v55   ;;  %v4247_v9 = vshll.u32 %v7095_v5, 16 }
 0x203   : > { %v2823_v44 = vpop.f32.mrf.mxu0  ;;  %3278 = vmatmul.bf16.vlgmr.msra.gmra.mxu1 %v3160_v40  ;;  %3798 = vmatmul.bf16.vlgmr.msra.gmra.mxu2 %v3680_v58  ;;  %v8192_v62 = vadd.f32 %v2820_v13, %v2255_v51  ;;  %v4237_v13 = vrot.slane %v4235_v22, 2  ;;  %v4877_v40 = vrot.slane %v7121_v14, 3  ;;  %v4244_v22 = vshrl.u32 %v7095_v5, 16  ;;  %v7122_v14 = vld [vmem:[%s7635_s25 + $0x28] sm:$0xff] }
 0x204   : > { %v8201_v52 = vpop.f32.mrf.mxu3 }
 0x205   : > { %v4241_v45 = vor.u32 %v4240_v23, %v4237_v13  ;;  %v4246_v13 = vrot.slane %v4244_v22, 2  ;;  %v4249_v23 = vrot.slane %v4247_v9, 3 }
 0x206   : > { %4994 = vmatmul.bf16.vlgmr.msra.gmra.mxu0 %v4876_v25  ;;  %v1628_v6 = vpop.f32.mrf.mxu2  ;;  %v3162_v25 = vsel %vm3157_vm4, %v3159_v2, %v3161_v48  ;;  %v5359_v2 = vld [vmem:[%s9008_s3 + $0x18] sm:$0xff] }
 0x207   : > { %v1736_v54 = vadd.f32 %v1628_v6, %v1215_v46  ;;  %v4242_v37 = vsel %vm4198_vm3, %v4232_v47, %v4241_v45  ;;  %v4878_v47 = vsel %vm4873_vm5, %v4875_v11, %v4877_v40  ;;  %v7035_v11 = vld [vmem:[%s7635_s25 + $0x20] sm:$0xff]  ;;  %v4250_v55 = vor.u32 %v4249_v23, %v4246_v13 }
 0x208   : > { %v1109_v29 = vpop.f32.mrf.mxu1 }
 0x209   : > { %v2256_v8 = vadd.f32 %v8130_v36, %v1736_v54  ;;  %v1216_v20 = vadd.f32 %v1109_v29, %v7740_v10 }
 0x20a   : > { %5415 = vperm.xlu1 %7365, %v5359_v2  }
 0x20b   : > { %v2825_v53 = vpop.f32.mrf.mxu0  ;;  %v8208_v56 = vadd.f32 %v2823_v44, %v2256_v8  ;;  %4488 = vmatmul.bf16.gmra.mxu3 %v4242_v37 }
 0x20c   : > { %v8214_v63 = vpop.f32.mrf.mxu3 }
 0x20e   : > { %v1630_v36 = vpop.f32.mrf.mxu2 }
 0x20f   : > { %v1737_v58 = vadd.f32 %v1630_v36, %v1216_v20  ;;  %v3683_v20 = vrot.slane %v7064_v35, 2  ;;  %v4251_v36 = vsel %vm4198_vm3, %v4241_v45, %v4250_v55 }
 0x210   : > { %v1112_v51 = vpop.f32.mrf.mxu1 }
 0x211   : > { %v2257_v44 = vadd.f32 %v8141_v32, %v1737_v58  ;;  %v1217_v6 = vadd.f32 %v1112_v51, %v7753_v24  ;;  %v3163_v24 = vrot.slane %v7035_v11, 2  ;;  %v4879_v51 = vrot.slane %v7122_v14, 3 }
 0x213   : > { %v2828_v46 = vpop.f32.mrf.mxu0  ;;  %3283 = vmatmul.bf16.gmra.mxu1 %v3162_v25  ;;  %3803 = vmatmul.bf16.gmra.mxu2 %v3682_v21  ;;  %v8218_v10 = vadd.f32 %v2825_v53, %v2257_v44  ;;  %v4880_v45 = vsel %vm4873_vm5, %v4877_v40, %v4879_v51 }
 0x214   : > { %v8227_v3 = vpop.f32.mrf.mxu3 }
 0x216   : > { %4999 = vmatmul.bf16.gmra.mxu0 %v4878_v47  ;;  %v1633_v32 = vpop.f32.mrf.mxu2  ;;  %v3164_v47 = vsel %vm3157_vm4, %v3161_v48, %v3163_v24 }
 0x217   : > { %v1738_v54 = vadd.f32 %v1633_v32, %v1217_v6  ;;  %v7096_v6 = vld [vmem:[%s7635_s25 + $0x40] sm:$0xff] }
 0x218   : > { %v1114_v29 = vpop.f32.mrf.mxu1  ;;  %v4256_v22 = vshll.u32 %v7096_v6, 16 }
 0x219   : > { %v2258_v8 = vadd.f32 %v8150_v28, %v1738_v54  ;;  %v1218_v58 = vadd.f32 %v1114_v29, %v7764_v43  ;;  %v3684_v28 = vsel %vm3157_vm4, %v3681_v1, %v3683_v20  ;;  %v4253_v1 = vshrl.u32 %v7096_v6, 16  ;;  %v8246_v29 = vld [vmem:[%s7635_s25 + $0x28] sm:$0xff] }
 0x21a   : > { %v4258_v35 = vrot.slane %v4256_v22, 3 }
 0x21b   : > { %v2830_v53 = vpop.f32.mrf.mxu0  ;;  %v8231_v37 = vadd.f32 %v2828_v46, %v2258_v8  ;;  %4493 = vmatmul.bf16.gmra.mxu3 %v4251_v36  ;;  %v4255_v40 = vrot.slane %v4253_v1, 2  ;;  %v8255_v8 = vld [vmem:[%s7635_s25 + $0x30] sm:$0xff]  ;;  %v3165_v36 = vrot.slane %v8246_v29, 2 }
 0x21c   : > { %v8237_v2 = vpop.f32.mrf.mxu3 }
 0x21e   : > { %v1635_v25 = vpop.f32.mrf.mxu2 }
 0x21f   : > { %v1739_v21 = vadd.f32 %v1635_v25, %v1218_v58 }
 0x220   : > { %v1117_v44 = vpop.f32.mrf.mxu1 }
 0x221   : > { %v2259_v46 = vadd.f32 %v8170_v19, %v1739_v21  ;;  %v1219_v48 = vadd.f32 %v1117_v44, %v7777_v60  ;;  %v8249_v19 = vld [vmem:[%s7635_s25 + $0x30] sm:$0xff] }
 0x222   : > { %v5362_v60 = vld [vmem:[%s9008_s3 + $0x30] sm:$0xff]  ;;  %v3685_v58 = vrot.slane %v8249_v19, 2 }
 0x223   : > { %v2833_v5 = vpop.f32.mrf.mxu0  ;;  %3288 = vmatmul.bf16.gmra.mxu1 %v3164_v47  ;;  %3808 = vmatmul.bf16.gmra.mxu2 %v3684_v28  ;;  %v8241_v43 = vadd.f32 %v2830_v53, %v2259_v46  ;;  %v4259_v53 = vor.u32 %v4258_v35, %v4255_v40  ;;  %v3166_v46 = vsel %vm3157_vm4, %v3163_v24, %v3165_v36  ;;  %v5360_v24 = vld [vmem:[%s9008_s3 + $0x20] sm:$0xff]  ;;  %v8284_v19 = vld [vmem:[%s7635_s25 + $0x30] sm:$0xff]  ;;  %v8287_v40 = vld [vmem:[%s7635_s25 + $0x38] sm:$0xff] }
 0x224   : > { %v8251_v11 = vpop.f32.mrf.mxu3  ;;  %5430 = vperm.xlu0 %7364, %v5362_v60   ;;  %5420 = vperm.xlu2 %7366, %v5360_v24  }
 0x225   : > { %v4260_v25 = vsel %vm4198_vm3, %v4250_v55, %v4259_v53 }
 0x226   : > { %5004 = vmatmul.bf16.gmra.mxu0 %v4880_v45  ;;  %v1638_v32 = vpop.f32.mrf.mxu2 }
 0x227   : > { %v1740_v9 = vadd.f32 %v1638_v32, %v1219_v48  ;;  %v7097_v32 = vld [vmem:[%s7635_s25 + $0x48] sm:$0xff] }
 0x228   : > { %v1119_v54 = vpop.f32.mrf.mxu1  ;;  %v4262_v22 = vshrl.u32 %v7097_v32, 16 }
 0x229   : > { %v2260_v13 = vadd.f32 %v8188_v7, %v1740_v9  ;;  %v1220_v21 = vadd.f32 %v1119_v54, %v7788_v18  ;;  %v4881_v7 = vrot.slane %v8255_v8, 3  ;;  %v4265_v9 = vshll.u32 %v7097_v32, 16 }
 0x22b   : > { %v2835_v23 = vpop.f32.mrf.mxu0  ;;  %v8260_v14 = vadd.f32 %v2833_v5, %v2260_v13  ;;  %4498 = vmatmul.bf16.gmra.mxu3 %v4260_v25  ;;  %v3686_v5 = vsel %vm3157_vm4, %v3683_v20, %v3685_v58  ;;  %v4882_v55 = vsel %vm4873_vm5, %v4879_v51, %v4881_v7  ;;  %v5363_v20 = vld [vmem:[%s9008_s3 + $0x38] sm:$0xff]  ;;  %v4264_v13 = vrot.slane %v4262_v22, 2 }
 0x22c   : > { %v8269_v45 = vpop.f32.mrf.mxu3  ;;  %5435 = vperm.xlu1 %7365, %v5363_v20   ;;  %v7124_v25 = vld [vmem:[%s7635_s25 + $0x38] sm:$0xff] }
 0x22d   : > { %v4883_v24 = vrot.slane %v7124_v25, 3 }
 0x22e   : > { %v1640_v44 = vpop.f32.mrf.mxu2 }
 0x22f   : > { %v1741_v47 = vadd.f32 %v1640_v44, %v1220_v21  ;;  %v5361_v44 = vld [vmem:[%s9008_s3 + $0x28] sm:$0xff] }
 0x230   : > { %v1122_v28 = vpop.f32.mrf.mxu1  ;;  %5425 = vperm.xlu2 %7366, %v5361_v44  }
 0x231   : > { %v2261_v6 = vadd.f32 %v8201_v52, %v1741_v47  ;;  %v9038_v52 = vld [vmem:[#allocation18_spill] sm:$0xff] }
 0x232   : > { %v1221_v1 = vadd.f32 %v1122_v28, %v9038_v52  ;;  %v3167_v28 = vrot.slane %v8284_v19, 2 }
 0x233   : > { %v2838_v48 = vpop.f32.mrf.mxu0  ;;  %3293 = vmatmul.bf16.gmra.mxu1 %v3166_v46  ;;  %3813 = vmatmul.bf16.gmra.mxu2 %v3686_v5  ;;  %v8273_v18 = vadd.f32 %v2835_v23, %v2261_v6  ;;  %v4267_v23 = vrot.slane %v4265_v9, 3  ;;  %v3687_v46 = vrot.slane %v8287_v40, 2  ;;  %v9039_v6 = vld [vmem:[#allocation19_spill] sm:$0xff] }
 0x234   : > { %v8289_v35 = vpop.f32.mrf.mxu3  ;;  %v3168_v52 = vsel %vm3157_vm4, %v3165_v36, %v3167_v28  ;;  %v5365_v36 = vld [vmem:[%s9008_s3 + $0x48] sm:$0xff] }
 0x235   : > { %v4268_v21 = vor.u32 %v4267_v23, %v4264_v13  ;;  %5445 = vperm.xlu0 %7364, %v5365_v36  }
 0x236   : > { %5009 = vmatmul.bf16.gmra.mxu0 %v4882_v55  ;;  %v1643_v51 = vpop.f32.mrf.mxu2 }
 0x237   : > { %v1742_v54 = vadd.f32 %v1643_v51, %v1221_v1  ;;  %v4269_v5 = vsel %vm4198_vm3, %v4259_v53, %v4268_v21  ;;  %v4884_v53 = vsel %vm4873_vm5, %v4881_v7, %v4883_v24  ;;  %v8316_v7 = vld [vmem:[%s7635_s25 + $0x38] sm:$0xff] }
 0x238   : > { %v1124_v29 = vpop.f32.mrf.mxu1 }
 0x239   : > { %v2262_v8 = vadd.f32 %v8214_v63, %v1742_v54  ;;  %v1222_v55 = vadd.f32 %v1124_v29, %v9039_v6  ;;  %v9040_v54 = vld [vmem:[#allocation20_spill] sm:$0xff] }
 0x23b   : > { %v2840_v60 = vpop.f32.mrf.mxu0  ;;  %v8296_v47 = vadd.f32 %v2838_v48, %v2262_v8  ;;  %4503 = vmatmul.bf16.gmra.mxu3 %v4269_v5  ;;  %v3688_v48 = vsel %vm3157_vm4, %v3685_v58, %v3687_v46  ;;  %v7098_v58 = vld [vmem:[%s7635_s25 + $0x50] sm:$0xff]  ;;  %v8319_v8 = vld [vmem:[%s7635_s25 + $0x40] sm:$0xff] }
 0x23c   : > { %v8304_v1 = vpop.f32.mrf.mxu3  ;;  %v4271_v19 = vshrl.u32 %v7098_v58, 16  ;;  %v4274_v40 = vshll.u32 %v7098_v58, 16 }
 0x23e   : > { %v1645_v63 = vpop.f32.mrf.mxu2  ;;  %v4273_v25 = vrot.slane %v4271_v19, 2  ;;  %v4276_v44 = vrot.slane %v4274_v40, 3 }
 0x23f   : > { %v1743_v20 = vadd.f32 %v1645_v63, %v1222_v55  ;;  %v7125_v55 = vld [vmem:[%s7635_s25 + $0x40] sm:$0xff]  ;;  %v5366_v63 = vld [vmem:[%s9008_s3 + $0x50] sm:$0xff] }
 0x240   : > { %v1127_v32 = vpop.f32.mrf.mxu1  ;;  %5450 = vperm.xlu1 %7365, %v5366_v63   ;;  %v4885_v58 = vrot.slane %v7125_v55, 3  ;;  %v8351_v63 = vld [vmem:[%s7635_s25 + $0x48] sm:$0xff] }
 0x241   : > { %v2263_v51 = vadd.f32 %v8227_v3, %v1743_v20  ;;  %v1223_v29 = vadd.f32 %v1127_v32, %v9040_v54  ;;  %v4277_v20 = vor.u32 %v4276_v44, %v4273_v25 }
 0x243   : > { %v2843_v22 = vpop.f32.mrf.mxu0  ;;  %3298 = vmatmul.bf16.gmra.mxu1 %v3168_v52  ;;  %3818 = vmatmul.bf16.gmra.mxu2 %v3688_v48  ;;  %v8308_v9 = vadd.f32 %v2840_v60, %v2263_v51  ;;  %v3169_v52 = vrot.slane %v8316_v7, 2  ;;  %v3689_v48 = vrot.slane %v8319_v8, 2  ;;  %v4278_v51 = vsel %vm4198_vm3, %v4268_v21, %v4277_v20  ;;  %v9043_v7 = vld [vmem:[#allocation12_spill] sm:$0xff] }
 0x244   : > { %v8321_v60 = vpop.f32.mrf.mxu3  ;;  %v4886_v21 = vsel %vm4873_vm5, %v4883_v24, %v4885_v58  ;;  %v8348_v24 = vld [vmem:[%s7635_s25 + $0x40] sm:$0xff] }
 0x245   : > { %v3690_v19 = vsel %vm3157_vm4, %v3687_v46, %v3689_v48  ;;  %v7099_v46 = vld [vmem:[%s7635_s25 + $0x58] sm:$0xff] }
 0x246   : > { %5014 = vmatmul.bf16.gmra.mxu0 %v4884_v53  ;;  %v1648_v3 = vpop.f32.mrf.mxu2  ;;  %v9041_v53 = vld [vmem:[#allocation21_spill] sm:$0xff]  ;;  %v4280_v25 = vshrl.u32 %v7099_v46, 16  ;;  %v4283_v44 = vshll.u32 %v7099_v46, 16 }
 0x247   : > { %v1744_v13 = vadd.f32 %v1648_v3, %v1223_v29  ;;  %v3170_v3 = vsel %vm3157_vm4, %v3167_v28, %v3169_v52  ;;  %v5364_v28 = vld [vmem:[%s9008_s3 + $0x40] sm:$0xff]  ;;  %v9045_v46 = vld [vmem:[#allocation13_spill] sm:$0xff] }
 0x248   : > { %v1129_v23 = vpop.f32.mrf.mxu1  ;;  %5440 = vperm.xlu2 %7366, %v5364_v28  }
 0x249   : > { %v2264_v5 = vadd.f32 %v8237_v2, %v1744_v13  ;;  %v1224_v36 = vadd.f32 %v1129_v23, %v9041_v53  ;;  %v4285_v53 = vrot.slane %v4283_v44, 3 }
 0x24b   : > { %v2845_v6 = vpop.f32.mrf.mxu0  ;;  %v8328_v32 = vadd.f32 %v2843_v22, %v2264_v5  ;;  %4508 = vmatmul.bf16.gmra.mxu3 %v4278_v51  ;;  %v4282_v51 = vrot.slane %v4280_v25, 2 }
 0x24c   : > { %v8336_v22 = vpop.f32.mrf.mxu3 }
 0x24e   : > { %v1650_v2 = vpop.f32.mrf.mxu2 }
 0x24f   : > { %v1745_v54 = vadd.f32 %v1650_v2, %v1224_v36 }
 0x250   : > { %v1132_v29 = vpop.f32.mrf.mxu1 }
 0x251   : > { %v2265_v40 = vadd.f32 %v8251_v11, %v1745_v54  ;;  %v1225_v8 = vadd.f32 %v1132_v29, %v9043_v7  ;;  %v7126_v54 = vld [vmem:[%s7635_s25 + $0x48] sm:$0xff]  ;;  %v5368_v29 = vld [vmem:[%s9008_s3 + $0x60] sm:$0xff] }
 0x252   : > { %5460 = vperm.xlu0 %7364, %v5368_v29  }
 0x253   : > { %v2848_v13 = vpop.f32.mrf.mxu0  ;;  %3303 = vmatmul.bf16.gmra.mxu1 %v3170_v3  ;;  %3823 = vmatmul.bf16.gmra.mxu2 %v3690_v19  ;;  %v8340_v23 = vadd.f32 %v2845_v6, %v2265_v40  ;;  %v4286_v3 = vor.u32 %v4285_v53, %v4282_v51  ;;  %v3171_v40 = vrot.slane %v8348_v24, 2  ;;  %v9047_v51 = vld [vmem:[#allocation14_spill] sm:$0xff] }
 0x254   : > { %v8353_v6 = vpop.f32.mrf.mxu3 }
 0x255   : > { %9042 = vst [vmem:[#allocation18_spill] sm:$0xff] %v8340_v23  ;;  %v4287_v28 = vsel %vm4198_vm3, %v4277_v20, %v4286_v3  ;;  %v3172_v44 = vsel %vm3157_vm4, %v3169_v52, %v3171_v40  ;;  %v5369_v52 = vld [vmem:[%s9008_s3 + $0x68] sm:$0xff] }
 0x256   : > { %5019 = vmatmul.bf16.gmra.mxu0 %v4886_v21  ;;  %v1653_v11 = vpop.f32.mrf.mxu2  ;;  %v3691_v21 = vrot.slane %v8351_v63, 2  ;;  %5465 = vperm.xlu1 %7365, %v5369_v52  }
 0x257   : > { %v1746_v5 = vadd.f32 %v1653_v11, %v1225_v8  ;;  %v4887_v8 = vrot.slane %v7126_v54, 3 }
 0x258   : > { %v1134_v55 = vpop.f32.mrf.mxu1 }
 0x259   : > { %v2266_v36 = vadd.f32 %v8269_v45, %v1746_v5  ;;  %v1226_v7 = vadd.f32 %v1134_v55, %v9045_v46  ;;  %v3692_v5 = vsel %vm3157_vm4, %v3689_v48, %v3691_v21  ;;  %v4888_v20 = vsel %vm4873_vm5, %v4885_v58, %v4887_v8  ;;  %v7100_v48 = vld [vmem:[%s7635_s25 + $0x60] sm:$0xff]  ;;  %v8380_v58 = vld [vmem:[%s7635_s25 + $0x48] sm:$0xff]  ;;  %v8383_v46 = vld [vmem:[%s7635_s25 + $0x50] sm:$0xff] }
 0x25a   : > { %v4292_v54 = vshll.u32 %v7100_v48, 16  ;;  %v3173_v52 = vrot.slane %v8380_v58, 2 }
 0x25b   : > { %v2850_v2 = vpop.f32.mrf.mxu0  ;;  %v8360_v19 = vadd.f32 %v2848_v13, %v2266_v36  ;;  %4513 = vmatmul.bf16.gmra.mxu3 %v4287_v28  ;;  %v4289_v36 = vshrl.u32 %v7100_v48, 16  ;;  %v3693_v48 = vrot.slane %v8383_v46, 2 }
 0x25d   : > { %9044 = vst [vmem:[#allocation19_spill] sm:$0xff] %v8360_v19 }
 0x25e   : > { %v1655_v45 = vpop.f32.mrf.mxu2  ;;  %v8368_v13 = vpop.f32.mrf.mxu3 }
 0x25f   : > { %v1747_v11 = vadd.f32 %v1655_v45, %v1226_v7  ;;  %v4291_v7 = vrot.slane %v4289_v36, 2  ;;  %v4294_v45 = vrot.slane %v4292_v54, 3 }
 0x260   : > { %v1137_v25 = vpop.f32.mrf.mxu1 }
 0x261   : > { %v2267_v24 = vadd.f32 %v8289_v35, %v1747_v11  ;;  %v1227_v53 = vadd.f32 %v1137_v25, %v9047_v51  ;;  %v5367_v25 = vld [vmem:[%s9008_s3 + $0x58] sm:$0xff] }
 0x262   : > { %5455 = vperm.xlu2 %7366, %v5367_v25  }
 0x263   : > { %v2853_v63 = vpop.f32.mrf.mxu0  ;;  %3308 = vmatmul.bf16.gmra.mxu1 %v3172_v44  ;;  %3828 = vmatmul.bf16.gmra.mxu2 %v3692_v5  ;;  %v8372_v55 = vadd.f32 %v2850_v2, %v2267_v24  ;;  %v7127_v5 = vld [vmem:[%s7635_s25 + $0x50] sm:$0xff]  ;;  %v4295_v24 = vor.u32 %v4294_v45, %v4291_v7  ;;  %v3174_v7 = vsel %vm3157_vm4, %v3171_v40, %v3173_v52  ;;  %v5371_v40 = vld [vmem:[%s9008_s3 + $0x78] sm:$0xff] }
 0x264   : > { %v4889_v36 = vrot.slane %v7127_v5, 3  ;;  %5475 = vperm.xlu0 %7364, %v5371_v40  }
 0x265   : > { %9046 = vst [vmem:[#allocation20_spill] sm:$0xff] %v8372_v55  ;;  %v4296_v51 = vsel %vm4198_vm3, %v4286_v3, %v4295_v24 }
 0x266   : > { %5024 = vmatmul.bf16.gmra.mxu0 %v4888_v20  ;;  %v1658_v35 = vpop.f32.mrf.mxu2  ;;  %v8385_v2 = vpop.f32.mrf.mxu3  ;;  %v4890_v46 = vsel %vm4873_vm5, %v4887_v8, %v4889_v36 }
 0x267   : > { %v1748_v29 = vadd.f32 %v1658_v35, %v1227_v53  ;;  %v9049_v53 = vld [vmem:[#allocation15_spill] sm:$0xff] }
 0x268   : > { %v1139_v28 = vpop.f32.mrf.mxu1 }
 0x269   : > { %v2268_v11 = vadd.f32 %v8304_v1, %v1748_v29  ;;  %v1228_v35 = vadd.f32 %v1139_v28, %v9049_v53 }
 0x26b   : > { %v2855_v44 = vpop.f32.mrf.mxu0  ;;  %v8392_v20 = vadd.f32 %v2853_v63, %v2268_v11  ;;  %4518 = vmatmul.bf16.gmra.mxu3 %v4296_v51  ;;  %v3694_v63 = vsel %vm3157_vm4, %v3691_v21, %v3693_v48  ;;  %v7101_v21 = vld [vmem:[%s7635_s25 + $0x68] sm:$0xff]  ;;  %v9051_v11 = vld [vmem:[#allocation16_spill] sm:$0xff] }
 0x26c   : > { %v4298_v25 = vshrl.u32 %v7101_v21, 16  ;;  %v4301_v8 = vshll.u32 %v7101_v21, 16 }
 0x26d   : > { %9048 = vst [vmem:[#allocation21_spill] sm:$0xff] %v8392_v20 }
 0x26e   : > { %v1660_v1 = vpop.f32.mrf.mxu2  ;;  %v8402_v3 = vpop.f32.mrf.mxu3 }
 0x26f   : > { %v1749_v54 = vadd.f32 %v1660_v1, %v1228_v35  ;;  %v8412_v35 = vld [vmem:[%s7635_s25 + $0x50] sm:$0xff]  ;;  %v8415_v1 = vld [vmem:[%s7635_s25 + $0x58] sm:$0xff] }
 0x270   : > { %v1142_v29 = vpop.f32.mrf.mxu1  ;;  %v3175_v21 = vrot.slane %v8412_v35, 2 }
 0x271   : > { %v2269_v45 = vadd.f32 %v8321_v60, %v1749_v54  ;;  %v1229_v60 = vadd.f32 %v1142_v29, %v9051_v11  ;;  %v4303_v54 = vrot.slane %v4301_v8, 3  ;;  %v3695_v11 = vrot.slane %v8415_v1, 2 }
 0x272   : > { %v3176_v35 = vsel %vm3157_vm4, %v3173_v52, %v3175_v21  ;;  %v5370_v52 = vld [vmem:[%s9008_s3 + $0x70] sm:$0xff] }
 0x273   : > { %v2858_v58 = vpop.f32.mrf.mxu0  ;;  %3313 = vmatmul.bf16.gmra.mxu1 %v3174_v7  ;;  %3833 = vmatmul.bf16.gmra.mxu2 %v3694_v63  ;;  %v8404_v28 = vadd.f32 %v2855_v44, %v2269_v45  ;;  %v4300_v44 = vrot.slane %v4298_v25, 2  ;;  %v8419_v45 = vld [vmem:[%s7635_s25 + $0x58] sm:$0xff]  ;;  %v3696_v1 = vsel %vm3157_vm4, %v3693_v48, %v3695_v11  ;;  %v7102_v48 = vld [vmem:[%s7635_s25 + $0x70] sm:$0xff] }
 0x274   : > { %v4891_v25 = vrot.slane %v8419_v45, 3  ;;  %5470 = vperm.xlu2 %7366, %v5370_v52   ;;  %v4307_v45 = vshrl.u32 %v7102_v48, 16 }
 0x275   : > { %9050 = vst [vmem:[#allocation12_spill] sm:$0xff] %v8404_v28  ;;  %v4304_v29 = vor.u32 %v4303_v54, %v4300_v44 }
 0x276   : > { %5029 = vmatmul.bf16.gmra.mxu0 %v4890_v46  ;;  %v1663_v5 = vpop.f32.mrf.mxu2  ;;  %v8421_v46 = vpop.f32.mrf.mxu3 }
 0x277   : > { %v1750_v51 = vadd.f32 %v1663_v5, %v1229_v60  ;;  %v4305_v60 = vsel %vm4198_vm3, %v4295_v24, %v4304_v29  ;;  %v9053_v5 = vld [vmem:[#allocation17_spill] sm:$0xff] }
 0x278   : > { %v1144_v53 = vpop.f32.mrf.mxu1 }
 0x279   : > { %v2270_v7 = vadd.f32 %v8336_v22, %v1750_v51  ;;  %v1230_v28 = vadd.f32 %v1144_v53, %v9053_v5  ;;  %v5372_v22 = vld [vmem:[%s9008_s3 + $0x80] sm:$0xff]  ;;  %v4892_v53 = vsel %vm4873_vm5, %v4889_v36, %v4891_v25  ;;  %v4310_v36 = vshll.u32 %v7102_v48, 16 }
 0x27a   : > { %5480 = vperm.xlu1 %7365, %v5372_v22   ;;  %v8447_v22 = vld [vmem:[%s7635_s25 + $0x58] sm:$0xff] }
 0x27b   : > { %v2860_v63 = vpop.f32.mrf.mxu0  ;;  %v8423_v40 = vadd.f32 %v2858_v58, %v2270_v7  ;;  %4523 = vmatmul.bf16.gmra.mxu3 %v4305_v60  ;;  %v9015_v52 = vrot.slane %v8447_v22, 2 }
 0x27d   : > { %9052 = vst [vmem:[#allocation13_spill] sm:$0xff] %v8423_v40 }
 0x27e   : > { %v1665_v8 = vpop.f32.mrf.mxu2  ;;  %v8437_v54 = vpop.f32.mrf.mxu3 }
 0x27f   : > { %v1751_v58 = vadd.f32 %v1665_v8, %v1230_v28  ;;  %v8450_v8 = vld [vmem:[%s7635_s25 + $0x60] sm:$0xff] }
 0x280   : > { %v3279_v51 = vpop.f32.mrf.mxu1  ;;  %v9014_v48 = vrot.slane %v8450_v8, 2 }
 0x281   : > { %v2271_v24 = vadd.f32 %v8353_v6, %v1751_v58  ;;  %v3426_v6 = vadd.f32 %v3279_v51, %v7856_v41  ;;  %v4312_v58 = vrot.slane %v4310_v36, 3  ;;  %v5401_v51 = vpop.permute.xlu0 %5400  ;;  %v5374_v36 = vld [vmem:[%s9008_s3 + $0x90] sm:$0xff] }
 0x282   : > { %5490 = vperm.xlu0 %7364, %v5374_v36  }
 0x283   : > { %v4995_v44 = vpop.f32.mrf.mxu0  ;;  %3318 = vmatmul.bf16.gmra.mxu1 %v3176_v35  ;;  %3838 = vmatmul.bf16.gmra.mxu2 %v3696_v1  ;;  %v8439_v7 = vadd.f32 %v2860_v63, %v2271_v24  ;;  %v4309_v63 = vrot.slane %v4307_v45, 2  ;;  %v8454_v24 = vld [vmem:[%s7635_s25 + $0x60] sm:$0xff] }
 0x284   : > { %v9013_v45 = vrot.slane %v8454_v24, 3 }
 0x285   : > { %9054 = vst [vmem:[#allocation14_spill] sm:$0xff] %v8439_v7  ;;  %v4313_v41 = vor.u32 %v4312_v58, %v4309_v63  ;;  %v9055_v7 = vld [vmem:[#allocation22_spill] sm:$0xff] }
 0x286   : > { %5034 = vmatmul.bf16.gmra.mxu0 %v4892_v53  ;;  %v3799_v28 = vpop.f32.mrf.mxu2  ;;  %v8456_v53 = vpop.f32.mrf.mxu3 }
 0x287   : > { %v3946_v60 = vadd.f32 %v3799_v28, %v3426_v6  ;;  %v4314_v6 = vsel %vm4198_vm3, %v4304_v29, %v4313_v41 }
 0x288   : > { %v3281_v5 = vpop.f32.mrf.mxu1 }
 0x289   : > { %v4621_v35 = vadd.f32 %v8368_v13, %v3946_v60  ;;  %v3427_v40 = vadd.f32 %v3281_v5, %v9055_v7  ;;  %v8465_v13 = vld [vmem:[%s9007_s2] ss:$0 sm:$0xff]  ;;  %v3698_v7 = vsel %vm3157_vm4, %v3695_v11, %v9014_v48  ;;  %v8495_v48 = vld [vmem:[%s7635_s25 + $0x68] sm:$0xff] }
 0x28b   : > { %v4997_v1 = vpop.f32.mrf.mxu0  ;;  %v5142_v28 = vadd.f32 %v4995_v44, %v4621_v35  ;;  %4528 = vmatmul.bf16.gmra.mxu3 %v4314_v6  ;;  %v3178_v44 = vsel %vm3157_vm4, %v3175_v21, %v9015_v52  ;;  %v4894_v6 = vsel %vm4873_vm5, %v4891_v25, %v9013_v45  ;;  %v7103_v21 = vld [vmem:[%s7635_s25 + $0x78] sm:$0xff]  ;;  %v8492_v45 = vld [vmem:[%s7635_s25 + $0x60] sm:$0xff] }
 0x28d   : > { %v5272_v58 = vadd.f32 %v8465_v13, %v5142_v28 }
 0x28e   : > { %v3801_v60 = vpop.f32.mrf.mxu2 }
 0x28f   : > { %v3947_v63 = vadd.f32 %v3801_v60, %v3427_v40  ;;  %v8482_v40 = vpop.f32.mrf.mxu3  ;;  %v5314_v11 = vmax.f32 %v5272_v58, 0.0 }
 0x290   : > { %v3284_v29 = vpop.f32.mrf.mxu1 }
 0x291   : > { %v4622_v5 = vadd.f32 %v8385_v2, %v3947_v63  ;;  %v5375_v2 = vld [vmem:[%s9008_s3 + $0x98] sm:$0xff]  ;;  %v3428_v28 = vadd.f32 %v3284_v29, %v7878_v49  ;;  %v5406_v63 = vpop.permute.xlu0 %5405  ;;  %v5608_v20 = vmul.f32 %v5401_v51, %v5314_v11 }
 0x292   : > { %5495 = vperm.xlu1 %7365, %v5375_v2   ;;  %v8499_v2 = vld [vmem:[%s7635_s25 + $0x68] sm:$0xff] }
 0x293   : > { %v5000_v35 = vpop.f32.mrf.mxu0  ;;  %3323 = vmatmul.bf16.gmra.mxu1 %v3178_v44  ;;  %3843 = vmatmul.bf16.gmra.mxu2 %v3698_v7  ;;  %v5143_v36 = vadd.f32 %v4997_v1, %v4622_v5  ;;  %v4316_v44 = vshrl.u32 %v7103_v21, 16  ;;  %v4319_v1 = vshll.u32 %v7103_v21, 16  ;;  %v4895_v51 = vrot.slane %v8499_v2, 3  ;;  %v5380_v2 = vld [vmem:[%s9008_s3 + $0xc0] sm:$0xff] }
 0x295   : > { %v5273_v60 = vadd.f32 %v8465_v13, %v5143_v36  ;;  %v4318_v52 = vrot.slane %v4316_v44, 2  ;;  %v4321_v58 = vrot.slane %v4319_v1, 3 }
 0x296   : > { %5039 = vmatmul.bf16.gmra.mxu0 %v4894_v6  ;;  %v3804_v25 = vpop.f32.mrf.mxu2 }
 0x297   : > { %v3948_v7 = vadd.f32 %v3804_v25, %v3428_v28  ;;  %v5315_v5 = vmax.f32 %v5273_v60, 0.0  ;;  %v8501_v55 = vpop.f32.mrf.mxu3  ;;  %v4322_v19 = vor.u32 %v4321_v58, %v4318_v52  ;;  %v5411_v28 = vpop.permute.xlu1 %5410  ;;  %v3179_v60 = vrot.slane %v8492_v45, 2 }
 0x298   : > { %v3286_v6 = vpop.f32.mrf.mxu1  ;;  %v3699_v25 = vrot.slane %v8495_v48, 2  ;;  %v5381_v48 = vld [vmem:[%s9008_s3 + $0xc8] sm:$0xff] }
 0x299   : > { %v4623_v49 = vadd.f32 %v8402_v3, %v3948_v7  ;;  %v5609_v29 = vmul.f32 %v5406_v63, %v5315_v5  ;;  %v4323_v23 = vsel %vm4198_vm3, %v4313_v41, %v4322_v19  ;;  %v3429_v3 = vadd.f32 %v3286_v6, %v7889_v0 }
 0x29a   : > { %v9056_v41 = vrot.slane %v8447_v22, 2  ;;  %v9057_v0 = vrot.slane %v8450_v8, 2  ;;  %v9058_v6 = vrot.slane %v8454_v24, 3  ;;  %v7104_v8 = vld [vmem:[%s7635_s25 + $0x80] sm:$0xff] }
 0x29b   : > { %v5002_v36 = vpop.f32.mrf.mxu0  ;;  %v7151_v21 = vpack.c.bf16 %v5609_v29, %v5608_v20  ;;  %v5144_v44 = vadd.f32 %v5000_v35, %v4623_v49  ;;  %4533 = vmatmul.bf16.gmra.mxu3 %v4323_v23  ;;  %v5373_v20 = vld [vmem:[%s9008_s3 + $0x88] sm:$0xff] }
 0x29c   : > { %5485 = vperm.xlu2 %7366, %v5373_v20   ;;  %v3180_v35 = vsel %vm3157_vm4, %v9056_v41, %v3179_v60  ;;  %v3700_v23 = vsel %vm3157_vm4, %v9057_v0, %v3699_v25  ;;  %v4896_v58 = vsel %vm4873_vm5, %v9058_v6, %v4895_v51  ;;  %v4325_v20 = vshrl.u32 %v7104_v8, 16  ;;  %v8543_v0 = vld [vmem:[%s7635_s25 + $0x70] sm:$0xff] }
 0x29d   : > { %7152 = vst [vmem:[%s8506_s10] sm:$0xff] %v7151_v21   ;;  %v5274_v7 = vadd.f32 %v8465_v13, %v5144_v44 }
 0x29e   : > { %v3806_v52 = vpop.f32.mrf.mxu2 }
 0x29f   : > { %v3949_v11 = vadd.f32 %v3806_v52, %v3429_v3  ;;  %v8531_v22 = vpop.f32.mrf.mxu3  ;;  %v5316_v29 = vmax.f32 %v5274_v7, 0.0  ;;  %v5416_v3 = vpop.permute.xlu1 %5415  ;;  %v4328_v52 = vshll.u32 %v7104_v8, 16 }
 0x2a0   : > { %v3289_v63 = vpop.f32.mrf.mxu1 }
 0x2a1   : > { %v4624_v1 = vadd.f32 %v8421_v46, %v3949_v11  ;;  %v5377_v46 = vld [vmem:[%s9008_s3 + $0xa8] sm:$0xff]  ;;  %v3430_v21 = vadd.f32 %v3289_v63, %v7903_v16  ;;  %v5610_v7 = vmul.f32 %v5411_v28, %v5316_v29 }
 0x2a2   : > { %5505 = vperm.xlu0 %7364, %v5377_v46  }
 0x2a3   : > { %v5005_v5 = vpop.f32.mrf.mxu0  ;;  %3328 = vmatmul.bf16.gmra.mxu1 %v3180_v35  ;;  %3848 = vmatmul.bf16.gmra.mxu2 %v3700_v23  ;;  %v5145_v49 = vadd.f32 %v5002_v36, %v4624_v1  ;;  %v8540_v35 = vld [vmem:[%s7635_s25 + $0x68] sm:$0xff]  ;;  %v4327_v23 = vrot.slane %v4325_v20, 2  ;;  %v4330_v1 = vrot.slane %v4328_v52, 3 }
 0x2a5   : > { %v5275_v24 = vadd.f32 %v8465_v13, %v5145_v49  ;;  %v8551_v46 = vor.u32 %v4330_v1, %v4327_v23 }
 0x2a6   : > { %5044 = vmatmul.bf16.gmra.mxu0 %v4896_v58  ;;  %v3809_v44 = vpop.f32.mrf.mxu2  ;;  %v8547_v58 = vld [vmem:[%s7635_s25 + $0x70] sm:$0xff] }
 0x2a7   : > { %v3950_v11 = vadd.f32 %v3809_v44, %v3430_v21  ;;  %v5317_v36 = vmax.f32 %v5275_v24, 0.0  ;;  %v8549_v49 = vpop.f32.mrf.mxu3  ;;  %v5421_v21 = vpop.permute.xlu2 %5420  ;;  %v3181_v24 = vrot.slane %v8540_v35, 2  ;;  %v3701_v44 = vrot.slane %v8543_v0, 2  ;;  %v5387_v0 = vld [vmem:[%s9008_s3 + $0xf8] sm:$0xff] }
 0x2a8   : > { %v3291_v41 = vpop.f32.mrf.mxu1  ;;  %v4332_v20 = vsel %vm4198_vm3, %v4322_v19, %v8551_v46  ;;  %v4897_v29 = vrot.slane %v8547_v58, 3  ;;  %v5386_v58 = vld [vmem:[%s9008_s3 + $0xf0] sm:$0xff] }
 0x2a9   : > { %v4625_v16 = vadd.f32 %v8437_v54, %v3950_v11  ;;  %v5611_v63 = vmul.f32 %v5416_v3, %v5317_v36  ;;  %v3431_v54 = vadd.f32 %v3291_v41, %v7915_v33  ;;  %v5378_v3 = vld [vmem:[%s9008_s3 + $0xb0] sm:$0xff]  ;;  %v3182_v19 = vsel %vm3157_vm4, %v3179_v60, %v3181_v24 }
 0x2aa   : > { %5510 = vperm.xlu1 %7365, %v5378_v3   ;;  %v3702_v33 = vsel %vm3157_vm4, %v3699_v25, %v3701_v44  ;;  %v4898_v45 = vsel %vm4873_vm5, %v4895_v51, %v4897_v29  ;;  %5520 = vperm.xlu0 %7364, %v5380_v2  }
 0x2ab   : > { %v5007_v6 = vpop.f32.mrf.mxu0  ;;  %v7156_v8 = vpack.c.bf16 %v5611_v63, %v5610_v7  ;;  %v5146_v28 = vadd.f32 %v5005_v5, %v4625_v16  ;;  %4538 = vmatmul.bf16.gmra.mxu3 %v4332_v20  ;;  %v7105_v16 = vld [vmem:[%s7635_s25 + $0x88] sm:$0xff] }
 0x2ad   : > { %7253 = vst [vmem:[%s8506_s10 + $0x8] sm:$0xff] %v7156_v8   ;;  %v5276_v41 = vadd.f32 %v8465_v13, %v5146_v28  ;;  %v4334_v28 = vshrl.u32 %v7105_v16, 16 }
 0x2ae   : > { %v3811_v52 = vpop.f32.mrf.mxu2 }
 0x2af   : > { %v3951_v11 = vadd.f32 %v3811_v52, %v3431_v54  ;;  %v8580_v1 = vpop.f32.mrf.mxu3  ;;  %v5318_v25 = vmax.f32 %v5276_v41, 0.0  ;;  %v4337_v54 = vshll.u32 %v7105_v16, 16  ;;  %v8595_v52 = vld [vmem:[%s7635_s25 + $0x70] sm:$0xff]  ;;  %v5383_v16 = vld [vmem:[%s9008_s3 + $0xd8] sm:$0xff] }
 0x2b0   : > { %v3294_v36 = vpop.f32.mrf.mxu1 }
 0x2b1   : > { %v4626_v5 = vadd.f32 %v8456_v53, %v3951_v11  ;;  %v5376_v53 = vld [vmem:[%s9008_s3 + $0xa0] sm:$0xff]  ;;  %v3432_v51 = vadd.f32 %v3294_v36, %v7930_v15  ;;  %v8598_v11 = vld [vmem:[%s7635_s25 + $0x78] sm:$0xff]  ;;  %v5612_v15 = vmul.f32 %v5421_v21, %v5318_v25 }
 0x2b2   : > { %5500 = vperm.xlu2 %7366, %v5376_v53   ;;  %5525 = vperm.xlu1 %7365, %v5381_v48   ;;  %v3183_v48 = vrot.slane %v8595_v52, 2  ;;  %v3703_v2 = vrot.slane %v8598_v11, 2  ;;  %v5384_v25 = vld [vmem:[%s9008_s3 + $0xe0] sm:$0xff]  ;;  %v5393_v11 = vld [vmem:[%s9008_s3 + $0x128] sm:$0xff] }
 0x2b3   : > { %v5010_v23 = vpop.f32.mrf.mxu0  ;;  %3333 = vmatmul.bf16.gmra.mxu1 %v3182_v19  ;;  %3853 = vmatmul.bf16.gmra.mxu2 %v3702_v33  ;;  %v5147_v60 = vadd.f32 %v5007_v6, %v4626_v5  ;;  %v5426_v6 = vpop.permute.xlu2 %5425  ;;  %v8602_v5 = vld [vmem:[%s7635_s25 + $0x78] sm:$0xff] }
 0x2b4   : > { %5535 = vperm.xlu0 %7364, %v5383_v16   ;;  %v8654_v16 = vld [vmem:[%s7635_s25 + $0x78] sm:$0xff] }
 0x2b5   : > { %v5277_v7 = vadd.f32 %v8465_v13, %v5147_v60  ;;  %v4339_v60 = vrot.slane %v4337_v54, 3 }
 0x2b6   : > { %5049 = vmatmul.bf16.gmra.mxu0 %v4898_v45  ;;  %v3814_v63 = vpop.f32.mrf.mxu2  ;;  %v4336_v45 = vrot.slane %v4334_v28, 2 }
 0x2b7   : > { %v3952_v8 = vadd.f32 %v3814_v63, %v3432_v51  ;;  %v5319_v20 = vmax.f32 %v5277_v7, 0.0  ;;  %v8604_v41 = vpop.f32.mrf.mxu3 }
 0x2b8   : > { %v3296_v3 = vpop.f32.mrf.mxu1  ;;  %v8608_v51 = vor.u32 %v4339_v60, %v4336_v45  ;;  %v5436_v45 = vpop.permute.xlu1 %5435 }
 0x2b9   : > { %v4627_v36 = vadd.f32 %v8482_v40, %v3952_v8  ;;  %v5613_v19 = vmul.f32 %v5426_v6, %v5319_v20  ;;  %v3433_v21 = vadd.f32 %v3296_v3, %v7942_v4  ;;  %v4899_v40 = vrot.slane %v8602_v5, 3  ;;  %v5392_v5 = vld [vmem:[%s9008_s3 + $0x120] sm:$0xff] }
 0x2ba   : > { %v4341_v6 = vsel %vm4198_vm3, %v8551_v46, %v8608_v51  ;;  %5540 = vperm.xlu1 %7365, %v5384_v25   ;;  %v3184_v8 = vsel %vm3157_vm4, %v3181_v24, %v3183_v48  ;;  %v3704_v20 = vsel %vm3157_vm4, %v3701_v44, %v3703_v2  ;;  %v5431_v44 = vpop.permute.xlu0 %5430 }
 0x2bb   : > { %v5012_v33 = vpop.f32.mrf.mxu0  ;;  %v7161_v53 = vpack.c.bf16 %v5613_v19, %v5612_v15  ;;  %v5148_v7 = vadd.f32 %v5010_v23, %v4627_v36  ;;  %4543 = vmatmul.bf16.gmra.mxu3 %v4341_v6  ;;  %v4900_v35 = vsel %vm4873_vm5, %v4897_v29, %v4899_v40  ;;  %v7106_v19 = vld [vmem:[%s7635_s25 + $0x90] sm:$0xff] }
 0x2bc   : > { %5550 = vperm.xlu0 %7364, %v5386_v58  }
 0x2bd   : > { %7254 = vst [vmem:[%s8506_s10 + $0x10] sm:$0xff] %v7161_v53   ;;  %v5278_v46 = vadd.f32 %v8465_v13, %v5148_v7  ;;  %v4343_v7 = vshrl.u32 %v7106_v19, 16 }
 0x2be   : > { %v3816_v63 = vpop.f32.mrf.mxu2 }
 0x2bf   : > { %v3953_v23 = vadd.f32 %v3816_v63, %v3433_v21  ;;  %v8639_v3 = vpop.f32.mrf.mxu3  ;;  %v5320_v29 = vmax.f32 %v5278_v46, 0.0  ;;  %v4346_v21 = vshll.u32 %v7106_v19, 16  ;;  %v8657_v63 = vld [vmem:[%s7635_s25 + $0x80] sm:$0xff] }
 0x2c0   : > { %v3299_v4 = vpop.f32.mrf.mxu1 }
 0x2c1   : > { %v4628_v28 = vadd.f32 %v8501_v55, %v3953_v23  ;;  %v5379_v55 = vld [vmem:[%s9008_s3 + $0xb8] sm:$0xff]  ;;  %v3434_v15 = vadd.f32 %v3299_v4, %v7952_v27  ;;  %v5614_v27 = vmul.f32 %v5431_v44, %v5320_v29  ;;  %v4348_v46 = vrot.slane %v4346_v21, 3  ;;  %v5382_v29 = vld [vmem:[%s9008_s3 + $0xd0] sm:$0xff] }
 0x2c2   : > { %5515 = vperm.xlu2 %7366, %v5379_v55   ;;  %5555 = vperm.xlu1 %7365, %v5387_v0   ;;  %v3705_v55 = vrot.slane %v8657_v63, 2  ;;  %v7108_v63 = vld [vmem:[%s7635_s25 + $0xa0] sm:$0xff] }
 0x2c3   : > { %v5015_v54 = vpop.f32.mrf.mxu0  ;;  %3338 = vmatmul.bf16.gmra.mxu1 %v3184_v8  ;;  %3858 = vmatmul.bf16.gmra.mxu2 %v3704_v20  ;;  %v5149_v24 = vadd.f32 %v5012_v33, %v4628_v28  ;;  %v8661_v8 = vld [vmem:[%s7635_s25 + $0x80] sm:$0xff]  ;;  %v4345_v28 = vrot.slane %v4343_v7, 2 }
 0x2c5   : > { %v5279_v36 = vadd.f32 %v8465_v13, %v5149_v24  ;;  %v3185_v24 = vrot.slane %v8654_v16, 2  ;;  %v8667_v0 = vor.u32 %v4348_v46, %v4345_v28 }
 0x2c6   : > { %5054 = vmatmul.bf16.gmra.mxu0 %v4900_v35  ;;  %v3819_v33 = vpop.f32.mrf.mxu2 }
 0x2c7   : > { %v3954_v60 = vadd.f32 %v3819_v33, %v3434_v15  ;;  %v5321_v53 = vmax.f32 %v5279_v36, 0.0  ;;  %v8663_v20 = vpop.f32.mrf.mxu3  ;;  %v5390_v15 = vld [vmem:[%s9008_s3 + $0x110] sm:$0xff]  ;;  %v5389_v36 = vld [vmem:[%s9008_s3 + $0x108] sm:$0xff] }
 0x2c8   : > { %v3301_v25 = vpop.f32.mrf.mxu1  ;;  %5565 = vperm.xlu0 %7364, %v5389_v36  }
 0x2c9   : > { %v4629_v6 = vadd.f32 %v8531_v22, %v3954_v60  ;;  %v5615_v23 = vmul.f32 %v5436_v45, %v5321_v53  ;;  %v3435_v44 = vadd.f32 %v3301_v25, %v7963_v59  ;;  %v4901_v22 = vrot.slane %v8661_v8, 3 }
 0x2ca   : > { %5530 = vperm.xlu2 %7366, %v5382_v29   ;;  %5570 = vperm.xlu1 %7365, %v5390_v15   ;;  %v3186_v45 = vsel %vm3157_vm4, %v3183_v48, %v3185_v24  ;;  %v3706_v60 = vsel %vm3157_vm4, %v3703_v2, %v3705_v55  ;;  %v5441_v2 = vpop.permute.xlu2 %5440  ;;  %v8716_v29 = vld [vmem:[%s7635_s25 + $0x80] sm:$0xff]  ;;  %v8719_v15 = vld [vmem:[%s7635_s25 + $0x88] sm:$0xff] }
 0x2cb   : > { %v5017_v4 = vpop.f32.mrf.mxu0  ;;  %v7166_v35 = vpack.c.bf16 %v5615_v23, %v5614_v27  ;;  %v5150_v58 = vadd.f32 %v5015_v54, %v4629_v6  ;;  %v4350_v54 = vsel %vm4198_vm3, %v8608_v51, %v8667_v0  ;;  %v4902_v52 = vsel %vm4873_vm5, %v4899_v40, %v4901_v22  ;;  %v7107_v6 = vld [vmem:[%s7635_s25 + $0x98] sm:$0xff] }
 0x2cc   : > { %4548 = vmatmul.bf16.gmra.mxu3 %v4350_v54 }
 0x2cd   : > { %7255 = vst [vmem:[%s8506_s10 + $0x18] sm:$0xff] %v7166_v35   ;;  %v5280_v53 = vadd.f32 %v8465_v13, %v5150_v58  ;;  %v4352_v35 = vshrl.u32 %v7107_v6, 16  ;;  %v4355_v58 = vshll.u32 %v7107_v6, 16 }
 0x2ce   : > { %v3821_v19 = vpop.f32.mrf.mxu2 }
 0x2cf   : > { %v3955_v59 = vadd.f32 %v3821_v19, %v3435_v44  ;;  %v8701_v21 = vpop.f32.mrf.mxu3  ;;  %v5322_v40 = vmax.f32 %v5280_v53, 0.0  ;;  %v3187_v53 = vrot.slane %v8716_v29, 2 }
 0x2d0   : > { %v3304_v33 = vpop.f32.mrf.mxu1  ;;  %5580 = vperm.xlu0 %7364, %v5392_v5   ;;  %v5388_v5 = vld [vmem:[%s9008_s3 + $0x100] sm:$0xff] }
 0x2d1   : > { %v4630_v51 = vadd.f32 %v8549_v49, %v3955_v59  ;;  %v5385_v49 = vld [vmem:[%s9008_s3 + $0xe8] sm:$0xff]  ;;  %v3436_v25 = vadd.f32 %v3304_v33, %v7977_v12  ;;  %v5616_v12 = vmul.f32 %v5441_v2, %v5322_v40  ;;  %v5396_v2 = vld [vmem:[%s9008_s3 + $0x140] sm:$0xff]  ;;  %v5395_v40 = vld [vmem:[%s9008_s3 + $0x138] sm:$0xff]  ;;  %v3188_v6 = vsel %vm3157_vm4, %v3185_v24, %v3187_v53 }
 0x2d2   : > { %5545 = vperm.xlu2 %7366, %v5385_v49   ;;  %5585 = vperm.xlu1 %7365, %v5393_v11   ;;  %v8723_v59 = vld [vmem:[%s7635_s25 + $0x88] sm:$0xff] }
 0x2d3   : > { %v5020_v7 = vpop.f32.mrf.mxu0  ;;  %3343 = vmatmul.bf16.gmra.mxu1 %v3186_v45  ;;  %3863 = vmatmul.bf16.gmra.mxu2 %v3706_v60  ;;  %v5151_v48 = vadd.f32 %v5017_v4, %v4630_v51  ;;  %v5446_v4 = vpop.permute.xlu0 %5445  ;;  %v4354_v45 = vrot.slane %v4352_v35, 2  ;;  %v4357_v60 = vrot.slane %v4355_v58, 3 }
 0x2d5   : > { %v5281_v27 = vadd.f32 %v8465_v13, %v5151_v48  ;;  %v4358_v48 = vor.u32 %v4357_v60, %v4354_v45  ;;  %v8769_v60 = vld [vmem:[%s7635_s25 + $0x88] sm:$0xff] }
 0x2d6   : > { %5059 = vmatmul.bf16.gmra.mxu0 %v4902_v52  ;;  %v3824_v23 = vpop.f32.mrf.mxu2  ;;  %v3707_v52 = vrot.slane %v8719_v15, 2  ;;  %v5397_v15 = vld [vmem:[%s9008_s3 + $0x148] sm:$0xff] }
 0x2d7   : > { %v3956_v28 = vadd.f32 %v3824_v23, %v3436_v25  ;;  %v5323_v46 = vmax.f32 %v5281_v27, 0.0  ;;  %v8725_v33 = vpop.f32.mrf.mxu3 }
 0x2d8   : > { %v3306_v44 = vpop.f32.mrf.mxu1  ;;  %5595 = vperm.xlu0 %7364, %v5395_v40   ;;  %v3708_v23 = vsel %vm3157_vm4, %v3705_v55, %v3707_v52  ;;  %v5451_v55 = vpop.permute.xlu1 %5450 }
 0x2d9   : > { %v4631_v36 = vadd.f32 %v8580_v1, %v3956_v28  ;;  %v5617_v19 = vmul.f32 %v5446_v4, %v5323_v46  ;;  %v3437_v11 = vadd.f32 %v3306_v44, %v7989_v39  ;;  %v4903_v1 = vrot.slane %v8723_v59, 3  ;;  %v5456_v44 = vpop.permute.xlu2 %5455 }
 0x2da   : > { %5560 = vperm.xlu2 %7366, %v5388_v5   ;;  %5600 = vperm.xlu1 %7365, %v5396_v2  }
 0x2db   : > { %v5022_v54 = vpop.f32.mrf.mxu0  ;;  %v7171_v51 = vpack.c.bf16 %v5617_v19, %v5616_v12  ;;  %v5152_v49 = vadd.f32 %v5020_v7, %v4631_v36  ;;  %v4359_v7 = vsel %vm4198_vm3, %v8667_v0, %v4358_v48  ;;  %v4904_v46 = vsel %vm4873_vm5, %v4901_v22, %v4903_v1 }
 0x2dc   : > { %4553 = vmatmul.bf16.gmra.mxu3 %v4359_v7  ;;  %v4361_v12 = vshrl.u32 %v7108_v63, 16  ;;  %v4364_v36 = vshll.u32 %v7108_v63, 16 }
 0x2dd   : > { %7256 = vst [vmem:[%s8506_s10 + $0x20] sm:$0xff] %v7171_v51   ;;  %v5282_v4 = vadd.f32 %v8465_v13, %v5152_v49  ;;  %v8772_v51 = vld [vmem:[%s7635_s25 + $0x90] sm:$0xff] }
 0x2de   : > { %v3826_v25 = vpop.f32.mrf.mxu2  ;;  %v4363_v49 = vrot.slane %v4361_v12, 2 }
 0x2df   : > { %v3957_v39 = vadd.f32 %v3826_v25, %v3437_v11  ;;  %v8760_v16 = vpop.f32.mrf.mxu3  ;;  %v5324_v35 = vmax.f32 %v5282_v4, 0.0  ;;  %v4366_v11 = vrot.slane %v4364_v36, 3  ;;  %v8776_v25 = vld [vmem:[%s7635_s25 + $0x90] sm:$0xff] }
 0x2e0   : > { %v3309_v27 = vpop.f32.mrf.mxu1  ;;  %v5466_v12 = vpop.permute.xlu1 %5465 }
 0x2e1   : > { %v4632_v0 = vadd.f32 %v8604_v41, %v3957_v39  ;;  %v5391_v41 = vld [vmem:[%s9008_s3 + $0x118] sm:$0xff]  ;;  %v3438_v58 = vadd.f32 %v3309_v27, %v8004_v17  ;;  %v5618_v5 = vmul.f32 %v5451_v55, %v5324_v35  ;;  %v4367_v39 = vor.u32 %v4366_v11, %v4363_v49 }
 0x2e2   : > { %5575 = vperm.xlu2 %7366, %v5391_v41   ;;  %v8812_v49 = vld [vmem:[%s7635_s25 + $0x98] sm:$0xff] }
 0x2e3   : > { %v5025_v28 = vpop.f32.mrf.mxu0  ;;  %3348 = vmatmul.bf16.gmra.mxu1 %v3188_v6  ;;  %3868 = vmatmul.bf16.gmra.mxu2 %v3708_v23  ;;  %v5153_v24 = vadd.f32 %v5022_v54, %v4632_v0  ;;  %v3189_v6 = vrot.slane %v8769_v60, 2  ;;  %v3709_v23 = vrot.slane %v8772_v51, 2  ;;  %v4368_v0 = vsel %vm4198_vm3, %v4358_v48, %v4367_v39  ;;  %v8809_v51 = vld [vmem:[%s7635_s25 + $0x90] sm:$0xff] }
 0x2e5   : > { %v5283_v8 = vadd.f32 %v8465_v13, %v5153_v24  ;;  %v5394_v24 = vld [vmem:[%s9008_s3 + $0x130] sm:$0xff]  ;;  %v3190_v48 = vsel %vm3157_vm4, %v3187_v53, %v3189_v6  ;;  %v5461_v53 = vpop.permute.xlu0 %5460 }
 0x2e6   : > { %5064 = vmatmul.bf16.gmra.mxu0 %v4904_v46  ;;  %v3829_v22 = vpop.f32.mrf.mxu2 }
 0x2e7   : > { %v3958_v19 = vadd.f32 %v3829_v22, %v3438_v58  ;;  %v5325_v54 = vmax.f32 %v5283_v8, 0.0  ;;  %v8778_v7 = vpop.f32.mrf.mxu3 }
 0x2e8   : > { %v3311_v45 = vpop.f32.mrf.mxu1 }
 0x2e9   : > { %v4633_v17 = vadd.f32 %v8639_v3, %v3958_v19  ;;  %v5619_v2 = vmul.f32 %v5456_v44, %v5325_v54  ;;  %v3439_v46 = vadd.f32 %v3311_v45, %v8016_v30  ;;  %v4905_v3 = vrot.slane %v8776_v25, 3  ;;  %v8816_v25 = vld [vmem:[%s7635_s25 + $0x98] sm:$0xff] }
 0x2ea   : > { %5590 = vperm.xlu2 %7366, %v5394_v24   ;;  %v3710_v30 = vsel %vm3157_vm4, %v3707_v52, %v3709_v23  ;;  %v3711_v24 = vrot.slane %v8812_v49, 2 }
 0x2eb   : > { %v5027_v40 = vpop.f32.mrf.mxu0  ;;  %v7176_v27 = vpack.c.bf16 %v5619_v2, %v5618_v5  ;;  %v5154_v4 = vadd.f32 %v5025_v28, %v4633_v17  ;;  %v4906_v8 = vsel %vm4873_vm5, %v4903_v1, %v4905_v3 }
 0x2ec   : > { %4558 = vmatmul.bf16.gmra.mxu3 %v4368_v0 }
 0x2ed   : > { %7257 = vst [vmem:[%s8506_s10 + $0x28] sm:$0xff] %v7176_v27   ;;  %v5284_v35 = vadd.f32 %v8465_v13, %v5154_v4 }
 0x2ee   : > { %v3831_v41 = vpop.f32.mrf.mxu2 }
 0x2ef   : > { %v3959_v63 = vadd.f32 %v3831_v41, %v3439_v46  ;;  %v8800_v22 = vpop.f32.mrf.mxu3  ;;  %v5326_v52 = vmax.f32 %v5284_v35, 0.0  ;;  %v3191_v46 = vrot.slane %v8809_v51, 2 }
 0x2f0   : > { %v3314_v55 = vpop.f32.mrf.mxu1 }
 0x2f1   : > { %v4634_v28 = vadd.f32 %v8663_v20, %v3959_v63  ;;  %v7109_v20 = vld [vmem:[%s7635_s25 + $0xa8] sm:$0xff]  ;;  %v3440_v44 = vadd.f32 %v3314_v55, %v8031_v26  ;;  %v5620_v17 = vmul.f32 %v5461_v53, %v5326_v52  ;;  %v3192_v35 = vsel %vm3157_vm4, %v3189_v6, %v3191_v46  ;;  %v7110_v53 = vld [vmem:[%s7635_s25 + $0xb0] sm:$0xff]  ;;  %v5471_v52 = vpop.permute.xlu2 %5470 }
 0x2f2   : > { %5605 = vperm.xlu2 %7366, %v5397_v15   ;;  %v4370_v36 = vshrl.u32 %v7109_v20, 16  ;;  %v4373_v19 = vshll.u32 %v7109_v20, 16 }
 0x2f3   : > { %v5030_v58 = vpop.f32.mrf.mxu0  ;;  %3353 = vmatmul.bf16.gmra.mxu1 %v3190_v48  ;;  %3873 = vmatmul.bf16.gmra.mxu2 %v3710_v30  ;;  %v5155_v29 = vadd.f32 %v5027_v40, %v4634_v28 }
 0x2f4   : > { %v4372_v11 = vrot.slane %v4370_v36, 2  ;;  %v4375_v5 = vrot.slane %v4373_v19, 3 }
 0x2f5   : > { %v5285_v59 = vadd.f32 %v8465_v13, %v5155_v29 }
 0x2f6   : > { %5069 = vmatmul.bf16.gmra.mxu0 %v4906_v8  ;;  %v3834_v1 = vpop.f32.mrf.mxu2  ;;  %v4376_v0 = vor.u32 %v4375_v5, %v4372_v11  ;;  %v3712_v8 = vsel %vm3157_vm4, %v3709_v23, %v3711_v24 }
 0x2f7   : > { %v3960_v54 = vadd.f32 %v3834_v1, %v3440_v44  ;;  %v5327_v45 = vmax.f32 %v5285_v59, 0.0  ;;  %v8818_v27 = vpop.f32.mrf.mxu3  ;;  %v5476_v59 = vpop.permute.xlu0 %5475  ;;  %v4379_v1 = vshrl.u32 %v7110_v53, 16 }
 0x2f8   : > { %v3316_v60 = vpop.f32.mrf.mxu1  ;;  %v4377_v41 = vsel %vm4198_vm3, %v4367_v39, %v4376_v0 }
 0x2f9   : > { %v4635_v26 = vadd.f32 %v8701_v21, %v3960_v54  ;;  %v5621_v2 = vmul.f32 %v5466_v12, %v5327_v45  ;;  %v3441_v55 = vadd.f32 %v3316_v60, %v8043_v57  ;;  %v4907_v21 = vrot.slane %v8816_v25, 3  ;;  %v8837_v54 = vld [vmem:[%s7635_s25 + $0x98] sm:$0xff]  ;;  %v8840_v45 = vld [vmem:[%s7635_s25 + $0xa0] sm:$0xff] }
 0x2fa   : > { %v4381_v60 = vrot.slane %v4379_v1, 2  ;;  %v3193_v25 = vrot.slane %v8837_v54, 2  ;;  %v7051_v54 = vld [vmem:[%s7635_s25 + $0xa0] sm:$0xff] }
 0x2fb   : > { %v5032_v40 = vpop.f32.mrf.mxu0  ;;  %v7181_v4 = vpack.c.bf16 %v5621_v2, %v5620_v17  ;;  %v5156_v63 = vadd.f32 %v5030_v58, %v4635_v26  ;;  %v4908_v58 = vsel %vm4873_vm5, %v4905_v3, %v4907_v21  ;;  %v4382_v3 = vshll.u32 %v7110_v53, 16  ;;  %v8844_v17 = vld [vmem:[%s7635_s25 + $0xa0] sm:$0xff] }
 0x2fc   : > { %4563 = vmatmul.bf16.gmra.mxu3 %v4377_v41 }
 0x2fd   : > { %7258 = vst [vmem:[%s8506_s10 + $0x30] sm:$0xff] %v7181_v4   ;;  %v5286_v15 = vadd.f32 %v8465_v13, %v5156_v63  ;;  %v4384_v51 = vrot.slane %v4382_v3, 3  ;;  %v3713_v4 = vrot.slane %v8840_v45, 2  ;;  %v7080_v45 = vld [vmem:[%s7635_s25 + $0xa8] sm:$0xff] }
 0x2fe   : > { %v3836_v48 = vpop.f32.mrf.mxu2 }
 0x2ff   : > { %v3961_v30 = vadd.f32 %v3836_v48, %v3441_v55  ;;  %v8831_v20 = vpop.f32.mrf.mxu3  ;;  %v5328_v6 = vmax.f32 %v5286_v15, 0.0  ;;  %v4385_v2 = vor.u32 %v4384_v51, %v4381_v60  ;;  %v9059_v55 = vld [vmem:[#allocation23_spill] sm:$0xff] }
 0x300   : > { %v3319_v28 = vpop.f32.mrf.mxu1 }
 0x301   : > { %v4636_v29 = vadd.f32 %v8725_v33, %v3961_v30  ;;  %v3442_v23 = vadd.f32 %v3319_v28, %v8058_v31  ;;  %v5622_v49 = vmul.f32 %v5471_v52, %v5328_v6  ;;  %v4386_v41 = vsel %vm4198_vm3, %v4376_v0, %v4385_v2 }
 0x303   : > { %v5035_v39 = vpop.f32.mrf.mxu0  ;;  %3358 = vmatmul.bf16.gmra.mxu1 %v3192_v35  ;;  %3878 = vmatmul.bf16.gmra.mxu2 %v3712_v8  ;;  %v5157_v57 = vadd.f32 %v5032_v40, %v4636_v29  ;;  %v3194_v8 = vsel %vm3157_vm4, %v3191_v46, %v3193_v25  ;;  %v3714_v29 = vsel %vm3157_vm4, %v3711_v24, %v3713_v4 }
 0x305   : > { %v5287_v33 = vadd.f32 %v8465_v13, %v5157_v57 }
 0x306   : > { %5074 = vmatmul.bf16.gmra.mxu0 %v4908_v58  ;;  %v3839_v44 = vpop.f32.mrf.mxu2 }
 0x307   : > { %v3962_v12 = vadd.f32 %v3839_v44, %v3442_v23  ;;  %v5329_v36 = vmax.f32 %v5287_v33, 0.0  ;;  %v8846_v26 = vpop.f32.mrf.mxu3  ;;  %v5481_v23 = vpop.permute.xlu1 %5480  ;;  %v9060_v33 = vld [vmem:[#allocation24_spill] sm:$0xff] }
 0x308   : > { %v3321_v19 = vpop.f32.mrf.mxu1 }
 0x309   : > { %v4637_v31 = vadd.f32 %v8760_v16, %v3962_v12  ;;  %v5623_v11 = vmul.f32 %v5476_v59, %v5329_v36  ;;  %v3443_v48 = vadd.f32 %v3321_v19, %v9059_v55  ;;  %v4909_v16 = vrot.slane %v8844_v17, 3  ;;  %v7138_v17 = vld [vmem:[%s7635_s25 + $0xa8] sm:$0xff] }
 0x30a   : > { %v3715_v55 = vrot.slane %v7080_v45, 2 }
 0x30b   : > { %v5037_v5 = vpop.f32.mrf.mxu0  ;;  %v7186_v40 = vpack.c.bf16 %v5623_v11, %v5622_v49  ;;  %v5158_v63 = vadd.f32 %v5035_v39, %v4637_v31  ;;  %v4910_v0 = vsel %vm4873_vm5, %v4907_v21, %v4909_v16  ;;  %v4072_v39 = vld [vmem:[%s7635_s25 + $0xb8] sm:$0x7]  ;;  %v5486_v21 = vpop.permute.xlu2 %5485 }
 0x30c   : > { %4568 = vmatmul.bf16.gmra.mxu3 %v4386_v41  ;;  %v4175_v52 = vunpack.c.l.b16 %v4072_v39  ;;  %v3716_v39 = vsel %vm3157_vm4, %v3713_v4, %v3715_v55 }
 0x30d   : > { %7259 = vst [vmem:[%s8506_s10 + $0x38] sm:$0xff] %v7186_v40   ;;  %v5288_v58 = vadd.f32 %v8465_v13, %v5158_v63  ;;  %v3195_v63 = vrot.slane %v7051_v54, 2 }
 0x30e   : > { %v3841_v30 = vpop.f32.mrf.mxu2  ;;  %v4197_v46 = vpack.c.b16 %v4175_v52, %v4175_v52 }
 0x30f   : > { %v3963_v28 = vadd.f32 %v3841_v30, %v3443_v48  ;;  %v8860_v53 = vpop.f32.mrf.mxu3  ;;  %v5330_v24 = vmax.f32 %v5288_v58, 0.0 }
 0x310   : > { %v3324_v35 = vpop.f32.mrf.mxu1  ;;  %v4388_v1 = vshrl.u32 %v4197_v46, 16  ;;  %v4391_v3 = vshll.u32 %v4197_v46, 16 }
 0x311   : > { %v4638_v15 = vadd.f32 %v8778_v7, %v3963_v28  ;;  %v3444_v7 = vadd.f32 %v3324_v35, %v9060_v33  ;;  %v5624_v49 = vmul.f32 %v5481_v23, %v5330_v24  ;;  %v9061_v35 = vld [vmem:[#allocation25_spill] sm:$0xff]  ;;  %v5491_v23 = vpop.permute.xlu0 %5490  ;;  %v5496_v33 = vpop.permute.xlu1 %5495 }
 0x312   : > { %v4390_v60 = vrot.slane %v4388_v1, 2  ;;  %v4393_v51 = vrot.slane %v4391_v3, 3  ;;  %v8886_v1 = vld [vmem:[%s7635_s25 + $0xb0] sm:$0xff] }
 0x313   : > { %v5040_v57 = vpop.f32.mrf.mxu0  ;;  %3363 = vmatmul.bf16.gmra.mxu1 %v3194_v8  ;;  %3883 = vmatmul.bf16.gmra.mxu2 %v3714_v29  ;;  %v5159_v6 = vadd.f32 %v5037_v5, %v4638_v15  ;;  %v4911_v29 = vrot.slane %v7138_v17, 3  ;;  %v3717_v45 = vrot.slane %v8886_v1, 2 }
 0x314   : > { %v4394_v40 = vor.u32 %v4393_v51, %v4390_v60 }
 0x315   : > { %v5289_v44 = vadd.f32 %v8465_v13, %v5159_v6  ;;  %v3718_v17 = vsel %vm3157_vm4, %v3715_v55, %v3717_v45 }
 0x316   : > { %5079 = vmatmul.bf16.gmra.mxu0 %v4910_v0  ;;  %v3844_v59 = vpop.f32.mrf.mxu2  ;;  %v4395_v30 = vsel %vm4198_vm3, %v4385_v2, %v4394_v40  ;;  %v3196_v0 = vsel %vm3157_vm4, %v3193_v25, %v3195_v63  ;;  %v4912_v2 = vsel %vm4873_vm5, %v4909_v16, %v4911_v29 }
 0x317   : > { %v3964_v12 = vadd.f32 %v3844_v59, %v3444_v7  ;;  %v5331_v36 = vmax.f32 %v5289_v44, 0.0  ;;  %v8868_v48 = vpop.f32.mrf.mxu3 }
 0x318   : > { %v3326_v19 = vpop.f32.mrf.mxu1 }
 0x319   : > { %v4639_v31 = vadd.f32 %v8800_v22, %v3964_v12  ;;  %v5625_v11 = vmul.f32 %v5486_v21, %v5331_v36  ;;  %v3445_v8 = vadd.f32 %v3326_v19, %v9061_v35  ;;  %v8883_v21 = vld [vmem:[%s7635_s25 + $0xa8] sm:$0xff] }
 0x31b   : > { %v5042_v5 = vpop.f32.mrf.mxu0  ;;  %v7191_v41 = vpack.c.bf16 %v5625_v11, %v5624_v49  ;;  %v5160_v28 = vadd.f32 %v5040_v57, %v4639_v31 }
 0x31c   : > { %4573 = vmatmul.bf16.gmra.mxu3 %v4395_v30  ;;  %v8905_v30 = vld [vmem:[%s9007_s2] ss:$0 sm:$0xff] }
 0x31d   : > { %7260 = vst [vmem:[%s8506_s10 + $0x40] sm:$0xff] %v7191_v41   ;;  %v5290_v6 = vadd.f32 %v8465_v13, %v5160_v28 }
 0x31e   : > { %v3846_v15 = vpop.f32.mrf.mxu2 }
 0x31f   : > { %v3965_v58 = vadd.f32 %v3846_v15, %v3445_v8  ;;  %v5332_v24 = vmax.f32 %v5290_v6, 0.0  ;;  %v8880_v7 = vpop.f32.mrf.mxu3  ;;  %v3031_v8 = vld [vmem:[%s7635_s25 + $0xb0] sm:$0x3]  ;;  %v3552_v15 = vld [vmem:[%s7635_s25 + $0xb8] sm:$0x3] }
 0x320   : > { %v3329_v22 = vpop.f32.mrf.mxu1  ;;  %v3134_v55 = vunpack.c.l.b16 %v3031_v8 }
 0x321   : > { %v4640_v52 = vadd.f32 %v8818_v27, %v3965_v58  ;;  %v3446_v25 = vadd.f32 %v3329_v22, %v8120_v42  ;;  %v5626_v3 = vmul.f32 %v5491_v23, %v5332_v24  ;;  %v8890_v42 = vld [vmem:[%s7635_s25 + $0xb0] sm:$0xff]  ;;  %v4747_v58 = vld [vmem:[%s7635_s25 + $0xb8] sm:$0x7]  ;;  %v3655_v22 = vunpack.c.l.b16 %v3552_v15  ;;  %s7301_s25 = smul.u32 168, %s7553_s19  ;;  %s5735_s19 = scalar_lea.sflag [#allocation5], %s7631_s20 }
 0x322   : > { %v4913_v49 = vrot.slane %v8890_v42, 3  ;;  %v4850_v6 = vunpack.c.l.b16 %v4747_v58  ;;  %v3156_v24 = vpack.c.b16 %v3134_v55, %v3134_v55 }
 0x323   : > { %v5045_v46 = vpop.f32.mrf.mxu0  ;;  %v5161_v57 = vadd.f32 %v5042_v5, %v4640_v52  ;;  %3368 = vmatmul.bf16.gmra.mxu1 %v3196_v0  ;;  %3888 = vmatmul.bf16.gmra.mxu2 %v3716_v39  ;;  %s5746_s28 = scalar_lea.hbm %s9009_s4, %s7301_s25 }
 0x324   : > { %v4914_v35 = vsel %vm4873_vm5, %v4911_v29, %v4913_v49  ;;  %s5749_s7 = sshll.u32 %s5746_s28, 4  ;;  %s5750_s7 = int_to_ptr.hbm [resolvable:$true] %s5749_s7 }
 0x325   : > { %v5291_v4 = vadd.f32 %v8465_v13, %v5161_v57  ;;  %v3197_v13 = vrot.slane %v8883_v21, 2  ;;  %s7443_s11 = sshra.s32 %s5750_s7, 4  ;;  %s7444_s11 = int_to_ptr.hbm [resolvable:$true] %s7443_s11 }
 0x326   : > { %5084 = vmatmul.bf16.gmra.mxu0 %v4912_v2  ;;  %v3849_v27 = vpop.f32.mrf.mxu2  ;;  %v5506_v2 = vpop.permute.xlu0 %5505  ;;  %s7445_s13 = scalar_lea.hbm %s7444_s11, 168  ;;  %p7450_p11 = scmp.lt.s32.totalorder %s7444_s11, %s9009_s4 }
 0x327   : > { %v3966_v44 = vadd.f32 %v3849_v27, %v3446_v25  ;;  %v5333_v59 = vmax.f32 %v5291_v4, 0.0  ;;  %v3198_v5 = vsel %vm3157_vm4, %v3195_v63, %v3197_v13  ;;  %v8899_v40 = vpop.f32.mrf.mxu3  ;;  %v3677_v25 = vpack.c.b16 %v3655_v22, %v3655_v22  ;;  %p7446_p1 = scmp.ne.s32.totalorder %s7444_s11, %s7445_s13  ;;  %p7451_p9 = scmp.lt.s32.totalorder %s7449_s30, %s7445_s13 }
 0x328   : > { %v3331_v16 = vpop.f32.mrf.mxu1 }
 0x329   : > { %v4641_v12 = vadd.f32 %v8831_v20, %v3966_v44  ;;  %v5627_v36 = vmul.f32 %v5496_v33, %v5333_v59  ;;  %v3447_v51 = vadd.f32 %v3331_v16, %v8136_v34  ;;  %v4872_v59 = vpack.c.b16 %v4850_v6, %v4850_v6  ;;  %p7447_p4 = pnand %p7446_p1, %p7602_p7  ;;  %p7452_p2 = por %p7451_p9, %p7450_p11 }
 0x32a   : > { %v3719_v1 = vrot.slane %v3677_v25, 2 }
 0x32b   : > { %v5047_v19 = vpop.f32.mrf.mxu0  ;;  %v7196_v54 = vpack.c.bf16 %v5627_v36, %v5626_v3  ;;  %v5162_v60 = vadd.f32 %v5045_v46, %v4641_v12  ;;  %v4915_v36 = vrot.slane %v4872_v59, 3  ;;  %p7448_p8 = pneg %p7447_p4 }
 0x32d   : > { %7261 = vst [vmem:[%s8506_s10 + $0x48] sm:$0xff] %v7196_v54   ;;  %v5292_v34 = vadd.f32 %v8905_v30, %v5162_v60  ;;  %p7453_p10 = pnand %p7452_p2, %p7448_p8 }
 0x32e   : > { %v3851_v31 = vpop.f32.mrf.mxu2 }
 0x32f   : > { %v3967_v20 = vadd.f32 %v3851_v31, %v3447_v51  ;;  %v5334_v0 = vmax.f32 %v5292_v34, 0.0  ;;  %v4539_v16 = vpop.f32.mrf.mxu3  ;;  %v3720_v51 = vsel %vm3157_vm4, %v3717_v45, %v3719_v1  ;;  %v5511_v34 = vpop.permute.xlu1 %5510 }
 0x330   : > { %v3334_v11 = vpop.f32.mrf.mxu1 }
 0x331   : > { %v4642_v41 = vadd.f32 %v8846_v26, %v3967_v20  ;;  %v5501_v26 = vpop.permute.xlu2 %5500  ;;  %v3448_v39 = vadd.f32 %v3334_v11, %v8144_v38  ;;  %v3199_v38 = vrot.slane %v3156_v24, 2  ;;  %v4916_v11 = vsel %vm4873_vm5, %v4913_v49, %v4915_v36 }
 0x332   : > { %v5628_v33 = vmul.f32 %v5501_v26, %v5334_v0 }
 0x333   : > { %v5050_v28 = vpop.f32.mrf.mxu0  ;;  %v5163_v63 = vadd.f32 %v5047_v19, %v4642_v41  ;;  %3373 = vmatmul.bf16.gmra.mxu1 %v3198_v5  ;;  %3893 = vmatmul.bf16.gmra.mxu2 %v3718_v17  ;;  %v3200_v60 = vsel %vm3157_vm4, %v3197_v13, %v3199_v38 }
 0x335   : > { %v5293_v52 = vadd.f32 %v8905_v30, %v5163_v63 }
 0x336   : > { %5089 = vmatmul.bf16.gmra.mxu0 %v4914_v35  ;;  %v3854_v46 = vpop.f32.mrf.mxu2 }
 0x337   : > { %v3968_v29 = vadd.f32 %v3854_v46, %v3448_v39  ;;  %v5335_v57 = vmax.f32 %v5293_v52, 0.0  ;;  %v5526_v25 = vpop.permute.xlu1 %5525 }
 0x338   : > { %v3336_v23 = vpop.f32.mrf.mxu1 }
 0x339   : > { %v4643_v4 = vadd.f32 %v8860_v53, %v3968_v29  ;;  %v5629_v27 = vmul.f32 %v5506_v2, %v5335_v57  ;;  %v3449_v12 = vadd.f32 %v3336_v23, %v8154_v61  ;;  %v4541_v61 = vpop.f32.mrf.mxu3  ;;  %v5516_v35 = vpop.permute.xlu2 %5515 }
 0x33b   : > { %v5052_v44 = vpop.f32.mrf.mxu0  ;;  %v7201_v21 = vpack.c.bf16 %v5629_v27, %v5628_v33  ;;  %v5164_v3 = vadd.f32 %v5050_v28, %v4643_v4  ;;  %v5521_v33 = vpop.permute.xlu0 %5520 }
 0x33d   : > { %7262 = vst [vmem:[%s8506_s10 + $0x50] sm:$0xff] %v7201_v21   ;;  %v5294_v31 = vadd.f32 %v8905_v30, %v5164_v3 }
 0x33e   : > { %v3856_v19 = vpop.f32.mrf.mxu2 }
 0x33f   : > { %v3969_v42 = vadd.f32 %v3856_v19, %v3449_v12  ;;  %v5336_v41 = vmax.f32 %v5294_v31, 0.0 }
 0x340   : > { %v3339_v54 = vpop.f32.mrf.mxu1 }
 0x341   : > { %v4644_v53 = vadd.f32 %v8868_v48, %v3969_v42  ;;  %v3450_v13 = vadd.f32 %v3339_v54, %v8179_v50  ;;  %v5630_v58 = vmul.f32 %v5511_v34, %v5336_v41  ;;  %v4544_v39 = vpop.f32.mrf.mxu3 }
 0x343   : > { %v5055_v20 = vpop.f32.mrf.mxu0  ;;  %v5165_v5 = vadd.f32 %v5052_v44, %v4644_v53  ;;  %3378 = vmatmul.bf16.gmra.mxu1 %v3200_v60  ;;  %3898 = vmatmul.bf16.gmra.mxu2 %v3720_v51 }
 0x345   : > { %v5295_v17 = vadd.f32 %v8905_v30, %v5165_v5  ;;  %v5531_v5 = vpop.permute.xlu2 %5530 }
 0x346   : > { %5094 = vmatmul.bf16.gmra.mxu0 %v4916_v11  ;;  %v3859_v45 = vpop.f32.mrf.mxu2 }
 0x347   : > { %v5337_v28 = vmax.f32 %v5295_v17, 0.0  ;;  %v3970_v48 = vadd.f32 %v3859_v45, %v3450_v13 }
 0x348   : > { %v3341_v8 = vpop.f32.mrf.mxu1 }
 0x349   : > { %v5631_v15 = vmul.f32 %v5516_v35, %v5337_v28  ;;  %v4645_v49 = vadd.f32 %v8880_v7, %v3970_v48  ;;  %v3451_v26 = vadd.f32 %v3341_v8, %v8192_v62  ;;  %v4546_v44 = vpop.f32.mrf.mxu3 }
 0x34b   : > { %v5057_v63 = vpop.f32.mrf.mxu0  ;;  %v7206_v55 = vpack.c.bf16 %v5631_v15, %v5630_v58  ;;  %v5166_v22 = vadd.f32 %v5055_v20, %v4645_v49 }
 0x34d   : > { %7263 = vst [vmem:[%s8506_s10 + $0x58] sm:$0xff] %v7206_v55   ;;  %v5296_v6 = vadd.f32 %v8905_v30, %v5166_v22 }
 0x34e   : > { %v3861_v0 = vpop.f32.mrf.mxu2 }
 0x34f   : > { %v3971_v52 = vadd.f32 %v3861_v0, %v3451_v26  ;;  %v5338_v57 = vmax.f32 %v5296_v6, 0.0 }
 0x350   : > { %v3344_v50 = vpop.f32.mrf.mxu1 }
 0x351   : > { %v4646_v46 = vadd.f32 %v8899_v40, %v3971_v52  ;;  %v3452_v23 = vadd.f32 %v3344_v50, %v8208_v56  ;;  %v5632_v59 = vmul.f32 %v5521_v33, %v5338_v57  ;;  %v4549_v51 = vpop.f32.mrf.mxu3 }
 0x353   : > { %v5060_v2 = vpop.f32.mrf.mxu0  ;;  %v5167_v29 = vadd.f32 %v5057_v63, %v4646_v46  ;;  %v5546_v46 = vpop.permute.xlu2 %5545 }
 0x355   : > { %v5297_v7 = vadd.f32 %v8905_v30, %v5167_v29 }
 0x356   : > { %v3864_v24 = vpop.f32.mrf.mxu2 }
 0x357   : > { %v5339_v62 = vmax.f32 %v5297_v7, 0.0  ;;  %v3972_v4 = vadd.f32 %v3864_v24, %v3452_v23 }
 0x358   : > { %v3346_v27 = vpop.f32.mrf.mxu1 }
 0x359   : > { %v5633_v21 = vmul.f32 %v5526_v25, %v5339_v62  ;;  %v4647_v38 = vadd.f32 %v4539_v16, %v3972_v4  ;;  %v3453_v12 = vadd.f32 %v3346_v27, %v8218_v10  ;;  %v5536_v10 = vpop.permute.xlu0 %5535  ;;  %v4551_v35 = vpop.f32.mrf.mxu3 }
 0x35b   : > { %v5062_v1 = vpop.f32.mrf.mxu0  ;;  %v7211_v40 = vpack.c.bf16 %v5633_v21, %v5632_v59  ;;  %v5168_v3 = vadd.f32 %v5060_v2, %v4647_v38 }
 0x35d   : > { %7264 = vst [vmem:[%s8506_s10 + $0x60] sm:$0xff] %v7211_v40   ;;  %v5298_v56 = vadd.f32 %v8905_v30, %v5168_v3 }
 0x35e   : > { %v3866_v36 = vpop.f32.mrf.mxu2 }
 0x35f   : > { %v3973_v19 = vadd.f32 %v3866_v36, %v3453_v12  ;;  %v5340_v31 = vmax.f32 %v5298_v56, 0.0 }
 0x360   : > { %v3349_v42 = vpop.f32.mrf.mxu1 }
 0x361   : > { %v4648_v54 = vadd.f32 %v4541_v61, %v3973_v19  ;;  %v3454_v16 = vadd.f32 %v3349_v42, %v8231_v37  ;;  %v5634_v34 = vmul.f32 %v5531_v5, %v5340_v31  ;;  %v4554_v6 = vpop.f32.mrf.mxu3 }
 0x363   : > { %v5065_v60 = vpop.f32.mrf.mxu0  ;;  %v5169_v53 = vadd.f32 %v5062_v1, %v4648_v54 }
 0x365   : > { %v5299_v20 = vadd.f32 %v8905_v30, %v5169_v53 }
 0x366   : > { %v3869_v11 = vpop.f32.mrf.mxu2 }
 0x367   : > { %v5341_v17 = vmax.f32 %v5299_v20, 0.0  ;;  %v3974_v41 = vadd.f32 %v3869_v11, %v3454_v16 }
 0x368   : > { %v3351_v13 = vpop.f32.mrf.mxu1 }
 0x369   : > { %v5635_v45 = vmul.f32 %v5536_v10, %v5341_v17  ;;  %v4649_v28 = vadd.f32 %v4544_v39, %v3974_v41  ;;  %v3455_v15 = vadd.f32 %v3351_v13, %v8241_v43  ;;  %v5541_v43 = vpop.permute.xlu1 %5540 }
 0x36b   : > { %v5067_v48 = vpop.f32.mrf.mxu0  ;;  %v7216_v61 = vpack.c.bf16 %v5635_v45, %v5634_v34  ;;  %v5170_v8 = vadd.f32 %v5065_v60, %v4649_v28 }
 0x36d   : > { %7265 = vst [vmem:[%s8506_s10 + $0x68] sm:$0xff] %v7216_v61   ;;  %v5300_v37 = vadd.f32 %v8905_v30, %v5170_v8 }
 0x36e   : > { %v3871_v58 = vpop.f32.mrf.mxu2 }
 0x36f   : > { %v3975_v49 = vadd.f32 %v3871_v58, %v3455_v15  ;;  %v5342_v0 = vmax.f32 %v5300_v37, 0.0  ;;  %v5561_v58 = vpop.permute.xlu2 %5560 }
 0x370   : > { %v3354_v63 = vpop.f32.mrf.mxu1 }
 0x371   : > { %v4650_v55 = vadd.f32 %v4546_v44, %v3975_v49  ;;  %v3456_v39 = vadd.f32 %v3354_v63, %v8260_v14  ;;  %v5636_v7 = vmul.f32 %v5541_v43, %v5342_v0  ;;  %v4556_v14 = vpop.f32.mrf.mxu3  ;;  %v5556_v42 = vpop.permute.xlu1 %5555 }
 0x373   : > { %v5070_v22 = vpop.f32.mrf.mxu0  ;;  %v5171_v26 = vadd.f32 %v5067_v48, %v4650_v55 }
 0x375   : > { %v5301_v52 = vadd.f32 %v8905_v30, %v5171_v26 }
 0x376   : > { %v3874_v50 = vpop.f32.mrf.mxu2 }
 0x377   : > { %v5343_v2 = vmax.f32 %v5301_v52, 0.0  ;;  %v3976_v29 = vadd.f32 %v3874_v50, %v3456_v39  ;;  %v9062_v50 = vld [vmem:[#allocation18_spill] sm:$0xff] }
 0x378   : > { %v3356_v57 = vpop.f32.mrf.mxu1 }
 0x379   : > { %v5637_v23 = vmul.f32 %v5546_v46, %v5343_v2  ;;  %v4651_v24 = vadd.f32 %v4549_v51, %v3976_v29  ;;  %v3457_v4 = vadd.f32 %v3356_v57, %v8273_v18  ;;  %v5551_v18 = vpop.permute.xlu0 %5550  ;;  %v4559_v16 = vpop.f32.mrf.mxu3 }
 0x37b   : > { %v5072_v25 = vpop.f32.mrf.mxu0  ;;  %v7221_v33 = vpack.c.bf16 %v5637_v23, %v5636_v7  ;;  %v5172_v62 = vadd.f32 %v5070_v22, %v4651_v24 }
 0x37d   : > { %7266 = vst [vmem:[%s8506_s10 + $0x70] sm:$0xff] %v7221_v33   ;;  %v5302_v21 = vadd.f32 %v8905_v30, %v5172_v62  ;;  %v9063_v33 = vld [vmem:[#allocation19_spill] sm:$0xff] }
 0x37e   : > { %v3876_v27 = vpop.f32.mrf.mxu2 }
 0x37f   : > { %v3977_v44 = vadd.f32 %v3876_v27, %v3457_v4  ;;  %v5344_v3 = vmax.f32 %v5302_v21, 0.0  ;;  %v5576_v27 = vpop.permute.xlu2 %5575 }
 0x380   : > { %v3359_v59 = vpop.f32.mrf.mxu1 }
 0x381   : > { %v4652_v38 = vadd.f32 %v4551_v35, %v3977_v44  ;;  %v3458_v36 = vadd.f32 %v3359_v59, %v8296_v47  ;;  %v5638_v51 = vmul.f32 %v5551_v18, %v5344_v3  ;;  %v4561_v48 = vpop.f32.mrf.mxu3  ;;  %v5571_v44 = vpop.permute.xlu1 %5570 }
 0x383   : > { %v5075_v1 = vpop.f32.mrf.mxu0  ;;  %v5173_v40 = vadd.f32 %v5072_v25, %v4652_v38 }
 0x385   : > { %v5303_v12 = vadd.f32 %v8905_v30, %v5173_v40 }
 0x386   : > { %v3879_v19 = vpop.f32.mrf.mxu2 }
 0x387   : > { %v5345_v56 = vmax.f32 %v5303_v12, 0.0  ;;  %v3978_v54 = vadd.f32 %v3879_v19, %v3458_v36 }
 0x388   : > { %v3361_v60 = vpop.f32.mrf.mxu1 }
 0x389   : > { %v5639_v53 = vmul.f32 %v5556_v42, %v5345_v56  ;;  %v4653_v31 = vadd.f32 %v4554_v6, %v3978_v54  ;;  %v3459_v17 = vadd.f32 %v3361_v60, %v8308_v9  ;;  %v5566_v9 = vpop.permute.xlu0 %5565  ;;  %v4564_v2 = vpop.f32.mrf.mxu3  ;;  %v9064_v42 = vld [vmem:[#allocation20_spill] sm:$0xff] }
 0x38b   : > { %v5077_v20 = vpop.f32.mrf.mxu0  ;;  %v7226_v11 = vpack.c.bf16 %v5639_v53, %v5638_v51  ;;  %v5174_v5 = vadd.f32 %v5075_v1, %v4653_v31 }
 0x38d   : > { %7267 = vst [vmem:[%s8506_s10 + $0x78] sm:$0xff] %v7226_v11   ;;  %v5304_v47 = vadd.f32 %v8905_v30, %v5174_v5 }
 0x38e   : > { %v3881_v41 = vpop.f32.mrf.mxu2 }
 0x38f   : > { %v3979_v10 = vadd.f32 %v3881_v41, %v3459_v17  ;;  %v5346_v61 = vmax.f32 %v5304_v47, 0.0  ;;  %v9065_v17 = vld [vmem:[#allocation21_spill] sm:$0xff] }
 0x390   : > { %v3364_v13 = vpop.f32.mrf.mxu1 }
 0x391   : > { %v4654_v34 = vadd.f32 %v4556_v14, %v3979_v10  ;;  %v3460_v8 = vadd.f32 %v3364_v13, %v8328_v32  ;;  %v5640_v55 = vmul.f32 %v5561_v58, %v5346_v61  ;;  %v4566_v38 = vpop.f32.mrf.mxu3  ;;  %v5586_v13 = vpop.permute.xlu1 %5585 }
 0x393   : > { %v5080_v45 = vpop.f32.mrf.mxu0  ;;  %v5175_v28 = vadd.f32 %v5077_v20, %v4654_v34 }
 0x395   : > { %v5305_v35 = vadd.f32 %v8905_v30, %v5175_v28 }
 0x396   : > { %v3884_v15 = vpop.f32.mrf.mxu2 }
 0x397   : > { %v5347_v49 = vmax.f32 %v5305_v35, 0.0  ;;  %v3980_v63 = vadd.f32 %v3884_v15, %v3460_v8 }
 0x398   : > { %v3366_v37 = vpop.f32.mrf.mxu1 }
 0x399   : > { %v5641_v22 = vmul.f32 %v5566_v9, %v5347_v49  ;;  %v4655_v26 = vadd.f32 %v4559_v16, %v3980_v63  ;;  %v3461_v6 = vadd.f32 %v3366_v37, %v9062_v50  ;;  %v4569_v31 = vpop.f32.mrf.mxu3  ;;  %v9066_v49 = vld [vmem:[#allocation12_spill] sm:$0xff] }
 0x39b   : > { %v5082_v0 = vpop.f32.mrf.mxu0  ;;  %v7231_v52 = vpack.c.bf16 %v5641_v22, %v5640_v55  ;;  %v5176_v39 = vadd.f32 %v5080_v45, %v4655_v26  ;;  %v5581_v45 = vpop.permute.xlu0 %5580 }
 0x39d   : > { %7268 = vst [vmem:[%s8506_s10 + $0x80] sm:$0xff] %v7231_v52   ;;  %v5306_v32 = vadd.f32 %v8905_v30, %v5176_v39 }
 0x39e   : > { %v3886_v46 = vpop.f32.mrf.mxu2 }
 0x39f   : > { %v3981_v29 = vadd.f32 %v3886_v46, %v3461_v6  ;;  %v5348_v24 = vmax.f32 %v5306_v32, 0.0  ;;  %v9067_v6 = vld [vmem:[#allocation13_spill] sm:$0xff] }
 0x3a0   : > { %v3369_v43 = vpop.f32.mrf.mxu1 }
 0x3a1   : > { %v4656_v57 = vadd.f32 %v4561_v48, %v3981_v29  ;;  %v3462_v62 = vadd.f32 %v3369_v43, %v9063_v33  ;;  %v5642_v1 = vmul.f32 %v5571_v44, %v5348_v24  ;;  %v4571_v15 = vpop.f32.mrf.mxu3  ;;  %v5591_v43 = vpop.permute.xlu2 %5590  ;;  %v9068_v44 = vld [vmem:[#allocation14_spill] sm:$0xff] }
 0x3a3   : > { %v5085_v7 = vpop.f32.mrf.mxu0  ;;  %v5177_v23 = vadd.f32 %v5082_v0, %v4656_v57 }
 0x3a5   : > { %v5307_v25 = vadd.f32 %v8905_v30, %v5177_v23 }
 0x3a6   : > { %v3889_v4 = vpop.f32.mrf.mxu2 }
 0x3a7   : > { %v5349_v59 = vmax.f32 %v5307_v25, 0.0  ;;  %v3982_v14 = vadd.f32 %v3889_v4, %v3462_v62 }
 0x3a8   : > { %v3371_v21 = vpop.f32.mrf.mxu1 }
 0x3a9   : > { %v5643_v40 = vmul.f32 %v5576_v27, %v5349_v59  ;;  %v4657_v3 = vadd.f32 %v4564_v2, %v3982_v14  ;;  %v3463_v56 = vadd.f32 %v3371_v21, %v9064_v42  ;;  %v4574_v2 = vpop.f32.mrf.mxu3 }
 0x3ab   : > { %v5087_v12 = vpop.f32.mrf.mxu0  ;;  %v7236_v36 = vpack.c.bf16 %v5643_v40, %v5642_v1  ;;  %v5178_v19 = vadd.f32 %v5085_v7, %v4657_v3  ;;  %v5596_v7 = vpop.permute.xlu0 %5595 }
 0x3ad   : > { %7269 = vst [vmem:[%s8506_s10 + $0x88] sm:$0xff] %v7236_v36   ;;  %v5308_v51 = vadd.f32 %v8905_v30, %v5178_v19 }
 0x3ae   : > { %v3891_v54 = vpop.f32.mrf.mxu2 }
 0x3af   : > { %v3983_v18 = vadd.f32 %v3891_v54, %v3463_v56  ;;  %v5350_v11 = vmax.f32 %v5308_v51, 0.0  ;;  %v5606_v56 = vpop.permute.xlu2 %5605  ;;  %v5601_v54 = vpop.permute.xlu1 %5600 }
 0x3b0   : > { %v3374_v60 = vpop.f32.mrf.mxu1 }
 0x3b1   : > { %v4658_v53 = vadd.f32 %v4566_v38, %v3983_v18  ;;  %v3464_v41 = vadd.f32 %v3374_v60, %v9065_v17  ;;  %v5644_v48 = vmul.f32 %v5581_v45, %v5350_v11  ;;  %v4576_v38 = vpop.f32.mrf.mxu3 }
 0x3b3   : > { %v5179_v20 = vadd.f32 %v5087_v12, %v4658_v53  ;;  %v5090_v16 = vpop.f32.mrf.mxu0 }
 0x3b5   : > { %v5309_v5 = vadd.f32 %v8905_v30, %v5179_v20 }
 0x3b6   : > { %v3894_v10 = vpop.f32.mrf.mxu2 }
 0x3b7   : > { %v5351_v47 = vmax.f32 %v5309_v5, 0.0  ;;  %v3984_v34 = vadd.f32 %v3894_v10, %v3464_v41 }
 0x3b8   : > { %v3376_v28 = vpop.f32.mrf.mxu1 }
 0x3b9   : > { %v5645_v61 = vmul.f32 %v5586_v13, %v5351_v47  ;;  %v4659_v35 = vadd.f32 %v4569_v31, %v3984_v34  ;;  %v3465_v63 = vadd.f32 %v3376_v28, %v9066_v49 }
 0x3bb   : > { %v7241_v8 = vpack.c.bf16 %v5645_v61, %v5644_v48  ;;  %v5180_v58 = vadd.f32 %v5090_v16, %v4659_v35  ;;  %v5092_v9 = vpop.f32.mrf.mxu0 }
 0x3bd   : > { %7270 = vst [vmem:[%s8506_s10 + $0x90] sm:$0xff] %v7241_v8   ;;  %v5310_v26 = vadd.f32 %v8905_v30, %v5180_v58 }
 0x3be   : > { %v3896_v37 = vpop.f32.mrf.mxu2 }
 0x3bf   : > { %v3985_v55 = vadd.f32 %v3896_v37, %v3465_v63  ;;  %v5352_v39 = vmax.f32 %v5310_v26, 0.0 }
 0x3c0   : > { %v3379_v22 = vpop.f32.mrf.mxu1 }
 0x3c1   : > { %v4660_v0 = vadd.f32 %v4571_v15, %v3985_v55  ;;  %v3466_v46 = vadd.f32 %v3379_v22, %v9067_v6  ;;  %v5646_v24 = vmul.f32 %v5591_v43, %v5352_v39 }
 0x3c3   : > { %v5181_v52 = vadd.f32 %v5092_v9, %v4660_v0  ;;  %v5095_v23 = vpop.f32.mrf.mxu0 }
 0x3c5   : > { %v5311_v50 = vadd.f32 %v8905_v30, %v5181_v52 }
 0x3c6   : > { %v3899_v29 = vpop.f32.mrf.mxu2 }
 0x3c7   : > { %v5353_v32 = vmax.f32 %v5311_v50, 0.0  ;;  %v3986_v57 = vadd.f32 %v3899_v29, %v3466_v46 }
 0x3c8   : > { %v3381_v62 = vpop.f32.mrf.mxu1 }
 0x3c9   : > { %v5647_v25 = vmul.f32 %v5596_v7, %v5353_v32  ;;  %v4661_v33 = vadd.f32 %v4574_v2, %v3986_v57  ;;  %v3467_v59 = vadd.f32 %v3381_v62, %v9068_v44 }
 0x3cb   : > { %v7246_v4 = vpack.c.bf16 %v5647_v25, %v5646_v24  ;;  %v5182_v27 = vadd.f32 %v5095_v23, %v4661_v33  ;;  %v5097_v3 = vpop.f32.mrf.mxu0 }
 0x3cd   : > { %7271 = vst [vmem:[%s8506_s10 + $0x98] sm:$0xff] %v7246_v4   ;;  %v5312_v1 = vadd.f32 %v8905_v30, %v5182_v27 }
 0x3ce   : > { %v3901_v14 = vpop.f32.mrf.mxu2 }
 0x3cf   : > { %v3987_v21 = vadd.f32 %v3901_v14, %v3467_v59  ;;  %v5354_v36 = vmax.f32 %v5312_v1, 0.0 }
 0x3d1   : > { %v4662_v40 = vadd.f32 %v4576_v38, %v3987_v21  ;;  %v5648_v18 = vmul.f32 %v5601_v54, %v5354_v36 }
 0x3d3   : > { %v5183_v12 = vadd.f32 %v5097_v3, %v4662_v40 }
 0x3d5   : > { %v5313_v19 = vadd.f32 %v8905_v30, %v5183_v12 }
 0x3d7   : > { %v5355_v42 = vmax.f32 %v5313_v19, 0.0 }
 0x3d9   : > { %v5649_v60 = vmul.f32 %v5606_v56, %v5355_v42 }
 0x3db   : > { %v7251_v51 = vpack.c.bf16 %v5649_v60, %v5648_v18 }
 0x3dd   : > { %7272 = vst [vmem:[%s8506_s10 + $0xa0] sm:$0xff] %v7251_v51  }
 0x3de   : > { %7456 = shalt.err (!%p7453_p10)
}
 0x3df   : > { %s7505_s20 = smov 64   ;;  %s7506_s10 = smov 4  }
 0x3e0   : > { %7308 = dma.vmem_to_hbm [thread:$0]  (%p7602_p7), %s5748_s6, 2688, %s5750_s7, %s5735_s19, %s7505_s20, %s7505_s20, %s7506_s10  }
 0x3e1 PF: > { %s5764_s26 = sand.u32 1, %s7487_s15   ;;  %p9069_p12 = scmp.ge.s32.totalorder %s7499_s18, 2 }
 0x3e2   : > { %s5765_s23 = scalar_lea.sflag [#allocation5], %s5764_s26 }
 0x3e3   : > { %p7319_p13 = pnand %p9069_p12, %p7567_p6 }
 0x3e5   : > { %p7320_p0 = pneg %p7319_p13 }
 0x3e7   : > { %7482 = dma.done.wait (%p7320_p0), %s5765_s23, 2688  }
 0x3e8   : > { %7484 = vsyncadd (%p7320_p0), %s5765_s23, 4294964608  ;;  %p18_p3 = scmp.ge.s32.totalorder %s7585_s29, 4   ;;  %s9070_s15 = smov %s7491_s16 }
 0x3e9   : > { %s9071_s16 = smov %s7495_s17  ;;  %s9072_s17 = smov %s7598_s8 }
 0x3ea   : > { %s9073_s18 = smov %s7585_s29  ;;  %20 = sbr.rel (!%p18_p3) target bundleno = 6 (0x6), region = 93 }
 0x3ef   :  { %5771 = vsyncpa [#allocation4], 1 }
 0x3f0   :  { %5773 = vsyncpa [#allocation4 + $0x1], 1 }
 0x3f1   :  { %5774 = vsyncpa [#allocation7], 1 }
 0x3f2   :  { %5775 = vsyncpa [#allocation5], 1 }
 0x3f3   :  { %5777 = vsyncpa [#allocation5 + $0x1], 1 }

</bundles_post_ra>
